<compile_context>
chip_gen: v7x
topology: tpu7x:2x2x1
jax: 0.10.0
libtpu: 0.0.40
codegen_flags: <defaults>
</compile_context>

<pallas_src>
import functools

import jax
import jax.numpy as jnp
from jax.experimental import pallas as pl
from jax.experimental.pallas import tpu as pltpu

EPS = 1e-5
LANE = 128


# ------------------------------- small helpers ------------------------------

def _round_up(x, m):
    return (x + m - 1) // m * m


def _vmem_limit_bytes():
    """~half of physical VMEM: 64 MiB on v5e/v6e (128 MiB), 32 MiB on v7x."""
    try:
        cap = int(pltpu.get_tpu_info().vmem_capacity_bytes)
    except Exception:
        cap = 64 * 1024 * 1024          # conservative (v7x-sized) fallback
    return int(min(96 * 1024 * 1024, max(32 * 1024 * 1024, cap // 2)))


VMEM_LIMIT = _vmem_limit_bytes()


def _row_tiling(m):
    """Row tile (multiple of 8, <=512) and padded row count for flat passes."""
    tm = min(512, _round_up(m, 8))
    return tm, _round_up(m, tm)


def _pick_th(ho, wo):
    """Output-row tile for K3: divisor of Ho, TH*Wo <= 256, TH <= 16."""
    best = 1
    for th in range(1, min(ho, 16) + 1):
        if ho % th == 0 and th * wo <= 256:
            best = th
    return best


def _fold_stats(partials, count, gamma, beta):
    """Fold per-tile (.., 8, C) partial sum/sumsq into a BN affine (train mode,
    batch stats, biased variance)."""
    c = partials.shape[-1]
    s = partials[..., 0, :].reshape(-1, c).sum(axis=0)
    ss = partials[..., 1, :].reshape(-1, c).sum(axis=0)
    mean = s / count
    var = jnp.maximum(ss / count - mean * mean, 0.0)
    inv = jax.lax.rsqrt(var + EPS)
    scale = gamma * inv
    shift = beta - mean * scale
    return scale.reshape(1, -1), shift.reshape(1, -1)


# --------------------------- K1: bn1 batch statistics ------------------------

def _stats_kernel(x_ref, st_ref):
    x = x_ref[...]
    st_ref[0:1, :] = jnp.sum(x, axis=0, keepdims=True)
    st_ref[1:2, :] = jnp.sum(x * x, axis=0, keepdims=True)
    st_ref[2:8, :] = jnp.zeros((6, x.shape[1]), jnp.float32)


def channel_stats(x2d, tm):
    m_pad, c = x2d.shape
    g = m_pad // tm
    return pl.pallas_call(
        _stats_kernel,
        grid=(g,),
        in_specs=[pl.BlockSpec((tm, c), lambda i: (i, 0))],
        out_specs=pl.BlockSpec((None, 8, c), lambda i: (i, 0, 0)),
        out_shape=jax.ShapeDtypeStruct((g, 8, c), jnp.float32),
        compiler_params=pltpu.CompilerParams(
            dimension_semantics=("parallel",),
            vmem_limit_bytes=VMEM_LIMIT),
        cost_estimate=pl.CostEstimate(
            flops=2 * m_pad * c, transcendentals=0,
            bytes_accessed=int(m_pad * c * 4 + g * 8 * c * 4)),
    )(x2d)


# ---------- K2: bn1+relu -> conv1 (1x1) -> bn2 stats (+conv4 if s==1) --------

def _bn_conv1_kernel(project, need_mask, tm, m_true, *refs):
    if project:
        x_ref, s1_ref, b1_ref, w1_ref, w4_ref, h1_ref, res_ref, st_ref = refs
    else:
        x_ref, s1_ref, b1_ref, w1_ref, h1_ref, st_ref = refs

    a = jnp.maximum(x_ref[...] * s1_ref[...] + b1_ref[...], 0.0)   # bn1 + relu
    if need_mask:                       # zero the M-padding rows (stats!)
        row = (pl.program_id(0) * tm
               + jax.lax.broadcasted_iota(jnp.int32, (tm, 1), 0))
        a = jnp.where(row < m_true, a, 0.0)
    ab = a.astype(jnp.bfloat16)

    h = jnp.dot(ab, w1_ref[...], preferred_element_type=jnp.float32)
    h1_ref[...] = h.astype(jnp.bfloat16)
    st_ref[0:1, :] = jnp.sum(h, axis=0, keepdims=True)             # bn2 stats
    st_ref[1:2, :] = jnp.sum(h * h, axis=0, keepdims=True)
    st_ref[2:8, :] = jnp.zeros((6, h.shape[1]), jnp.float32)

    if project:                          # conv4 (1x1, stride 1) residual
        res_ref[...] = jnp.dot(ab, w4_ref[...],
                               preferred_element_type=jnp.float32
                               ).astype(jnp.bfloat16)


def bn1_conv1(x2d, scale1, shift1, w1p, tm, m_true, w4p=None):
    m_pad, cin_p = x2d.shape
    cm_p = w1p.shape[1]
    g = m_pad // tm
    project = w4p is not None
    need_mask = m_pad != m_true

    in_specs = [pl.BlockSpec((tm, cin_p), lambda i: (i, 0)),
                pl.BlockSpec((1, cin_p), lambda i: (0, 0)),
                pl.BlockSpec((1, cin_p), lambda i: (0, 0)),
                pl.BlockSpec((cin_p, cm_p), lambda i: (0, 0))]
    inputs = [x2d, scale1, shift1, w1p]
    out_shape = [jax.ShapeDtypeStruct((m_pad, cm_p), jnp.bfloat16)]
    out_specs = [pl.BlockSpec((tm, cm_p), lambda i: (i, 0))]
    flops = 2 * m_pad * cin_p * cm_p
    bytes_acc = m_pad * (cin_p * 4 + cm_p * 2) + cin_p * cm_p * 2
    if project:
        cout_p = w4p.shape[1]
        in_specs.append(pl.BlockSpec((cin_p, cout_p), lambda i: (0, 0)))
        inputs.append(w4p)
        out_shape.append(jax.ShapeDtypeStruct((m_pad, cout_p), jnp.bfloat16))
        out_specs.append(pl.BlockSpec((tm, cout_p), lambda i: (i, 0)))
        flops += 2 * m_pad * cin_p * cout_p
        bytes_acc += m_pad * cout_p * 2 + cin_p * cout_p * 2
    out_shape.append(jax.ShapeDtypeStruct((g, 8, cm_p), jnp.float32))
    out_specs.append(pl.BlockSpec((None, 8, cm_p), lambda i: (i, 0, 0)))

    outs = pl.pallas_call(
        functools.partial(_bn_conv1_kernel, project, need_mask, tm, m_true),
        grid=(g,),
        in_specs=in_specs, out_specs=out_specs, out_shape=out_shape,
        compiler_params=pltpu.CompilerParams(
            dimension_semantics=("parallel",),
            vmem_limit_bytes=VMEM_LIMIT),
        cost_estimate=pl.CostEstimate(flops=int(flops), transcendentals=0,
                                      bytes_accessed=int(bytes_acc)),
    )(*inputs)

    if project:
        h1, res, st = outs
    else:
        h1, st = outs
        res = None
    return h1, res, st


# ---- K3: bn2+relu -> conv2 (3x3, stride) -> bn3 stats (+conv4 if s!=1) ------

def _conv2_kernel(project, stride, TH, H, W, Wo, cm_p, *refs):
    if project:
        (h1_ref, s2_ref, b2_ref, w2_ref, x_ref, s1_ref, b1_ref, w4_ref,
         h2_ref, res_ref, st_ref,
         lhs_ref, pad_ref, lhs4_ref, xrow_ref) = refs
    else:
        (h1_ref, s2_ref, b2_ref, w2_ref,
         h2_ref, st_ref,
         lhs_ref, pad_ref) = refs

    t = pl.program_id(1)
    s2 = s2_ref[...]
    b2 = b2_ref[...]

    # Zero only the two W-halo rows of the small row scratch (not the whole
    # scratch).  Done every step so it is correct under any megacore schedule.
    pad_ref[0:1, :] = jnp.zeros((1, cm_p), jnp.float32)
    pad_ref[W + 1:W + 2, :] = jnp.zeros((1, cm_p), jnp.float32)

    nih = (TH - 1) * stride + 3
    # ---- assemble the (TH*Wo, 9*cm_p) bf16 LHS: bn2-affine + relu applied
    #      once per input row; the 3 column taps come from one padded-row
    #      scratch (contiguous / strided pl.ds loads) and are lane-concatenated.
    for r in range(nih):                                   # static unroll
        ih = t * (TH * stride) + r - 1                     # global input row
        valid = jnp.logical_and(ih >= 0, ih < H)
        ihc = jnp.clip(ih, 0, H - 1)
        row = h1_ref[ihc]                                  # (W, cm_p) bf16
        a = jnp.maximum(row.astype(jnp.float32) * s2 + b2, 0.0)
        a = a * valid.astype(jnp.float32)                  # zero out-of-image rows
        pad_ref[1:W + 1, :] = a
        if stride == 1:
            taps = [pad_ref[pl.ds(dj, Wo), :] for dj in range(3)]
        else:
            taps = [pad_ref[pl.ds(dj, Wo, stride), :] for dj in range(3)]
        tap3 = jnp.concatenate(taps, axis=1).astype(jnp.bfloat16)  # (Wo, 3*cm_p)
        for di in range(3):
            if (r - di) % stride != 0:
                continue
            oh = (r - di) // stride
            if oh < 0 or oh >= TH:
                continue
            lhs_ref[oh * Wo:(oh + 1) * Wo,
                    3 * di * cm_p:3 * (di + 1) * cm_p] = tap3

    # ---- the whole TH x Wo conv2 tile is ONE wide-K MXU matmul ----
    out = jnp.dot(lhs_ref[...], w2_ref[...],
                  preferred_element_type=jnp.float32)      # (TH*Wo, cm_p) f32
    h2_ref[...] = out.reshape(h2_ref.shape).astype(jnp.bfloat16)
    st_ref[0:1, :] = jnp.sum(out, axis=0, keepdims=True)   # bn3 stats
    st_ref[1:2, :] = jnp.sum(out * out, axis=0, keepdims=True)
    st_ref[2:8, :] = jnp.zeros((6, cm_p), jnp.float32)

    if project:
        # conv4: 1x1 stride-s projection, recomputing bn1-affine+relu from x at
        # the strided sample positions only (no out1 HBM round-trip).
        s1 = s1_ref[...]
        b1 = b1_ref[...]
        for oh in range(TH):                               # static unroll
            ih2 = (t * TH + oh) * stride
            a1 = jnp.maximum(x_ref[ih2] * s1 + b1, 0.0)    # (W, cin_p) f32
            xrow_ref[...] = a1
            lhs4_ref[oh * Wo:(oh + 1) * Wo, :] = (
                xrow_ref[pl.ds(0, Wo, stride), :].astype(jnp.bfloat16))
        r4 = jnp.dot(lhs4_ref[...], w4_ref[...],
                     preferred_element_type=jnp.float32)
        res_ref[...] = r4.reshape(res_ref.shape).astype(jnp.bfloat16)


def bn2_conv2(h1_img, scale2, shift2, w2w, stride,
              x_img=None, scale1=None, shift1=None, w4p=None):
    n, H, W, cm_p = h1_img.shape
    Ho = (H - 1) // stride + 1
    Wo = (W - 1) // stride + 1
    TH = _pick_th(Ho, Wo)
    T = Ho // TH
    project = x_img is not None

    in_specs = [
        pl.BlockSpec((None, H, W, cm_p), lambda b, t: (b, 0, 0, 0)),
        pl.BlockSpec((1, cm_p), lambda b, t: (0, 0)),
        pl.BlockSpec((1, cm_p), lambda b, t: (0, 0)),
        pl.BlockSpec((9 * cm_p, cm_p), lambda b, t: (0, 0)),
    ]
    inputs = [h1_img, scale2, shift2, w2w]
    scratch = [pltpu.VMEM((TH * Wo, 9 * cm_p), jnp.bfloat16),
               pltpu.VMEM((W + 2, cm_p), jnp.float32)]
    out_shape = [jax.ShapeDtypeStruct((n, Ho, Wo, cm_p), jnp.bfloat16)]
    out_specs = [pl.BlockSpec((None, TH, Wo, cm_p), lambda b, t: (b, t, 0, 0))]
    flops = 2 * n * Ho * Wo * 9 * cm_p * cm_p
    bytes_acc = (n * H * W * cm_p * 2 + n * Ho * Wo * cm_p * 2
                 + 9 * cm_p * cm_p * 2)
    if project:
        cin_p = x_img.shape[-1]
        cout_p = w4p.shape[1]
        in_specs += [
            pl.BlockSpec((None, H, W, cin_p), lambda b, t: (b, 0, 0, 0)),
            pl.BlockSpec((1, cin_p), lambda b, t: (0, 0)),
            pl.BlockSpec((1, cin_p), lambda b, t: (0, 0)),
            pl.BlockSpec((cin_p, cout_p), lambda b, t: (0, 0)),
        ]
        inputs += [x_img, scale1, shift1, w4p]
        out_shape.append(jax.ShapeDtypeStruct((n, Ho, Wo, cout_p), jnp.bfloat16))
        out_specs.append(pl.BlockSpec((None, TH, Wo, cout_p),
                                      lambda b, t: (b, t, 0, 0)))
        scratch += [pltpu.VMEM((TH * Wo, cin_p), jnp.bfloat16),
                    pltpu.VMEM((W, cin_p), jnp.float32)]
        flops += 2 * n * Ho * Wo * cin_p * cout_p
        bytes_acc += (n * H * W * cin_p * 4 + n * Ho * Wo * cout_p * 2
                      + cin_p * cout_p * 2)
    out_shape.append(jax.ShapeDtypeStruct((n, T, 8, cm_p), jnp.float32))
    out_specs.append(pl.BlockSpec((None, None, 8, cm_p),
                                  lambda b, t: (b, t, 0, 0)))

    outs = pl.pallas_call(
        functools.partial(_conv2_kernel, project, stride, TH, H, W, Wo, cm_p),
        grid=(n, T),
        in_specs=in_specs, out_specs=out_specs, out_shape=out_shape,
        scratch_shapes=scratch,
        compiler_params=pltpu.CompilerParams(
            dimension_semantics=("parallel", "parallel"),
            vmem_limit_bytes=VMEM_LIMIT),
        cost_estimate=pl.CostEstimate(flops=int(flops), transcendentals=0,
                                      bytes_accessed=int(bytes_acc)),
    )(*inputs)

    if project:
        h2, res, st = outs
    else:
        h2, st = outs
        res = None
    return h2, res, st, Ho, Wo


# ---------------- K4: bn3+relu -> conv3 (1x1) -> + residual ------------------

def _bn_conv3_kernel(h2_ref, s3_ref, b3_ref, w3_ref, r_ref, o_ref):
    a = jnp.maximum(h2_ref[...].astype(jnp.float32) * s3_ref[...] + b3_ref[...],
                    0.0)
    o_ref[...] = (jnp.dot(a.astype(jnp.bfloat16), w3_ref[...],
                          preferred_element_type=jnp.float32)
                  + r_ref[...].astype(jnp.float32))


def bn3_conv3_add(h2_2d, scale3, shift3, w3p, residual_2d, tm):
    m_pad, cm_p = h2_2d.shape
    cout_p = w3p.shape[1]
    g = m_pad // tm
    rbytes = residual_2d.dtype.itemsize
    return pl.pallas_call(
        _bn_conv3_kernel,
        grid=(g,),
        in_specs=[pl.BlockSpec((tm, cm_p), lambda i: (i, 0)),
                  pl.BlockSpec((1, cm_p), lambda i: (0, 0)),
                  pl.BlockSpec((1, cm_p), lambda i: (0, 0)),
                  pl.BlockSpec((cm_p, cout_p), lambda i: (0, 0)),
                  pl.BlockSpec((tm, cout_p), lambda i: (i, 0))],
        out_specs=pl.BlockSpec((tm, cout_p), lambda i: (i, 0)),
        out_shape=jax.ShapeDtypeStruct((m_pad, cout_p), jnp.float32),
        compiler_params=pltpu.CompilerParams(
            dimension_semantics=("parallel",),
            vmem_limit_bytes=VMEM_LIMIT),
        cost_estimate=pl.CostEstimate(
            flops=2 * m_pad * cm_p * cout_p, transcendentals=0,
            bytes_accessed=int(m_pad * (cm_p * 2 + cout_p * (4 + rbytes))
                               + cm_p * cout_p * 2)),
    )(h2_2d, scale3, shift3, w3p, residual_2d)


# ------------------------------ block forward -------------------------------

def residual_block_forward(x, params, input_channels, output_channels, stride=1):
    N, Cin, H, W = x.shape
    Cout = output_channels
    Cm = Cout // 4
    cin_p = _round_up(Cin, LANE)
    cm_p = _round_up(Cm, LANE)
    cout_p = _round_up(Cout, LANE)
    project = (input_channels != output_channels) or (stride != 1)

    M = N * H * W
    tm, m_pad = _row_tiling(M)

    # layout glue: NCHW -> NHWC, channels zero-padded to lane multiples.  A
    # full model would keep activations in this layout between blocks; here we
    # only convert once at entry/exit to keep the PyTorch NCHW interface.
    x_img = jnp.pad(jnp.transpose(x, (0, 2, 3, 1)).astype(jnp.float32),
                    ((0, 0), (0, 0), (0, 0), (0, cin_p - Cin)))
    x2d = jnp.pad(x_img.reshape(M, cin_p), ((0, m_pad - M), (0, 0)))

    # padded weights (bf16 for the MXU) / BN parameters (f32)
    w1p = jnp.pad(params["w1"][:, :, 0, 0].T,
                  ((0, cin_p - Cin), (0, cm_p - Cm))).astype(jnp.bfloat16)
    w2w = jnp.pad(jnp.transpose(params["w2"], (2, 3, 1, 0)),
                  ((0, 0), (0, 0), (0, cm_p - Cm), (0, cm_p - Cm)))
    w2w = w2w.reshape(9 * cm_p, cm_p).astype(jnp.bfloat16)
    w3p = jnp.pad(params["w3"][:, :, 0, 0].T,
                  ((0, cm_p - Cm), (0, cout_p - Cout))).astype(jnp.bfloat16)
    g1 = jnp.pad(params["g1"], (0, cin_p - Cin))
    b1 = jnp.pad(params["b1"], (0, cin_p - Cin))
    g2 = jnp.pad(params["g2"], (0, cm_p - Cm))
    b2 = jnp.pad(params["b2"], (0, cm_p - Cm))
    g3 = jnp.pad(params["g3"], (0, cm_p - Cm))
    b3 = jnp.pad(params["b3"], (0, cm_p - Cm))
    w4p = None
    if project:
        w4p = jnp.pad(params["w4"][:, :, 0, 0].T,
                      ((0, cin_p - Cin), (0, cout_p - Cout))).astype(jnp.bfloat16)

    # K1: bn1 batch statistics (two-pass BN, pass 1)
    st1 = channel_stats(x2d, tm)
    scale1, shift1 = _fold_stats(st1, M, g1, b1)

    # K2: bn1+relu -> conv1 -> bn2 stats  (+ conv4 residual when stride == 1)
    h1_2d, res2d, st2 = bn1_conv1(
        x2d, scale1, shift1, w1p, tm, M,
        w4p=w4p if (project and stride == 1) else None)
    scale2, shift2 = _fold_stats(st2, M, g2, b2)

    # K3: bn2+relu -> 3x3 conv2 -> bn3 stats (+ conv4 residual when stride != 1)
    h1_img = h1_2d[:M].reshape(N, H, W, cm_p)
    if project and stride != 1:
        h2, res_img, st3, Ho, Wo = bn2_conv2(
            h1_img, scale2, shift2, w2w, stride,
            x_img=x_img, scale1=scale1, shift1=shift1, w4p=w4p)
    else:
        h2, res_img, st3, Ho, Wo = bn2_conv2(h1_img, scale2, shift2, w2w, stride)
    M2 = N * Ho * Wo
    scale3, shift3 = _fold_stats(st3, M2, g3, b3)

    # K4: bn3+relu -> conv3 -> + residual
    tm2, m2_pad = _row_tiling(M2)
    h2_2d = jnp.pad(h2.reshape(M2, cm_p), ((0, m2_pad - M2), (0, 0)))
    if not project:
        residual_2d = x2d                       # identity: cin_p == cout_p, M2 == M
    elif stride == 1:
        residual_2d = res2d                     # from K2 (m_pad rows, bf16)
    else:
        residual_2d = jnp.pad(res_img.reshape(M2, cout_p),
                              ((0, m2_pad - M2), (0, 0)))
    out2d = bn3_conv3_add(h2_2d, scale3, shift3, w3p, residual_2d, tm2)

    out = out2d[:M2, :Cout].reshape(N, Ho, Wo, Cout)
    return jnp.transpose(out, (0, 3, 1, 2))                # back to NCHW


# ----------------------------- pure-JAX reference ----------------------------

def reference_forward(x, params, input_channels, output_channels, stride=1):
    def bn_relu_ref(x, g, b):
        mean = x.mean(axis=(0, 2, 3), keepdims=True)
        var = ((x - mean) ** 2).mean(axis=(0, 2, 3), keepdims=True)
        y = (x - mean) / jnp.sqrt(var + EPS) * g.reshape(1, -1, 1, 1) \
            + b.reshape(1, -1, 1, 1)
        return jnp.maximum(y, 0.0)

    def conv(x, w, stride=1, pad=0):
        return jax.lax.conv_general_dilated(
            x, w, (stride, stride), [(pad, pad), (pad, pad)],
            dimension_numbers=("NCHW", "OIHW", "NCHW"))

    out1 = bn_relu_ref(x, params["g1"], params["b1"])
    out = conv(out1, params["w1"])
    out = bn_relu_ref(out, params["g2"], params["b2"])
    out = conv(out, params["w2"], stride=stride, pad=1)
    out = bn_relu_ref(out, params["g3"], params["b3"])
    out = conv(out, params["w3"])
    if input_channels != output_channels or stride != 1:
        residual = conv(out1, params["w4"], stride=stride)
    else:
        residual = x
    return out + residual


# ----------------------------------- main ------------------------------------

if __name__ == "__main__":
    def make_params(key, cin, cout):
        cm = cout // 4
        ks = jax.random.split(key, 10)
        return dict(
            g1=1.0 + 0.1 * jax.random.normal(ks[0], (cin,), jnp.float32),
            b1=0.1 * jax.random.normal(ks[1], (cin,), jnp.float32),
            w1=0.2 * jax.random.normal(ks[2], (cm, cin, 1, 1), jnp.float32),
            g2=1.0 + 0.1 * jax.random.normal(ks[3], (cm,), jnp.float32),
            b2=0.1 * jax.random.normal(ks[4], (cm,), jnp.float32),
            w2=0.2 * jax.random.normal(ks[5], (cm, cm, 3, 3), jnp.float32),
            g3=1.0 + 0.1 * jax.random.normal(ks[6], (cm,), jnp.float32),
            b3=0.1 * jax.random.normal(ks[7], (cm,), jnp.float32),
            w3=0.2 * jax.random.normal(ks[8], (cout, cm, 1, 1), jnp.float32),
            w4=0.2 * jax.random.normal(ks[9], (cout, cin, 1, 1), jnp.float32),
        )

    key = jax.random.PRNGKey(0)
    configs = [
        # (N, Cin, H, W, Cout, stride)
        (2, 4, 16, 16, 16, 2),    # projection shortcut (conv4), stride 2
        (2, 8, 16, 16, 32, 1),    # projection shortcut (conv4), stride 1
        (2, 16, 16, 16, 16, 1),   # identity shortcut
    ]
    for idx, (n, cin, h, w, cout, stride) in enumerate(configs):
        kp, kx, key = jax.random.split(key, 3)
        params = make_params(kp, cin, cout)
        x = jax.random.normal(kx, (n, cin, h, w), jnp.float32)

        fwd = jax.jit(functools.partial(
            residual_block_forward,
            input_channels=cin, output_channels=cout, stride=stride))
        out = fwd(x, params)
        jax.block_until_ready(out)

        ref = reference_forward(x, params, cin, cout, stride)
        assert out.shape == ref.shape, (idx, out.shape, ref.shape)
        max_err = float(jnp.max(jnp.abs(out - ref)))
        # bf16 MXU matmuls (f32 accumulation) -> relax vs the f32 reference
        assert jnp.allclose(out, ref, rtol=5e-2, atol=5e-2), (idx, max_err)

    print("KERNEL_OK")
</pallas_src>

<mosaic_0001>
module attributes {stable_mosaic.version = 11 : i64} {
  func.func @_stats_kernel(%arg0: i32, %arg1: memref<512x128xf32, #tpu.memory_space<vmem>>, %arg2: memref<1x8x128xf32, #tpu.memory_space<vmem>>) attributes {dimension_semantics = [#tpu.dimension_semantics<parallel>], iteration_bounds = array<i64: 1>, scalar_prefetch = 0 : i64, scratch_operands = 0 : i64, tpu.core_type = #tpu.core_type<tc>, window_params = [{transform_indices = @transform_0, window_bounds = array<i64: 512, 128>}, {transform_indices = @transform_1, window_bounds = array<i64: 1, 8, 128>}]} {
    %c0 = arith.constant 0 : index
    %c0_0 = arith.constant 0 : index
    %0 = vector.load %arg1[%c0, %c0_0] : memref<512x128xf32, #tpu.memory_space<vmem>>, vector<512x128xf32>
    %cst = arith.constant dense<0.000000e+00> : vector<128xf32>
    %1 = vector.multi_reduction <add>, %0, %cst [0] : vector<512x128xf32> to vector<128xf32>
    %2 = vector.shape_cast %1 : vector<128xf32> to vector<1x128xf32>
    %c0_1 = arith.constant 0 : index
    %c0_2 = arith.constant 0 : index
    %c0_3 = arith.constant 0 : index
    %3 = vector.load %arg2[%c0_1, %c0_2, %c0_3] : memref<1x8x128xf32, #tpu.memory_space<vmem>>, vector<1x1x128xf32>
    %4 = vector.shape_cast %3 : vector<1x1x128xf32> to vector<1x128xf32>
    %5 = vector.shape_cast %2 : vector<1x128xf32> to vector<1x1x128xf32>
    tpu.vector_store %arg2[%c0_1, %c0_2, %c0_3], %5 {strides = array<i32>} : memref<1x8x128xf32, #tpu.memory_space<vmem>>, vector<1x1x128xf32>,
    %6 = arith.mulf %0, %0 : vector<512x128xf32>
    %cst_4 = arith.constant dense<0.000000e+00> : vector<128xf32>
    %7 = vector.multi_reduction <add>, %6, %cst_4 [0] : vector<512x128xf32> to vector<128xf32>
    %8 = vector.shape_cast %7 : vector<128xf32> to vector<1x128xf32>
    %c0_5 = arith.constant 0 : index
    %c1 = arith.constant 1 : index
    %c0_6 = arith.constant 0 : index
    %9 = vector.load %arg2[%c0_5, %c1, %c0_6] : memref<1x8x128xf32, #tpu.memory_space<vmem>>, vector<1x1x128xf32>
    %10 = vector.shape_cast %9 : vector<1x1x128xf32> to vector<1x128xf32>
    %11 = vector.shape_cast %8 : vector<1x128xf32> to vector<1x1x128xf32>
    tpu.vector_store %arg2[%c0_5, %c1, %c0_6], %11 {strides = array<i32>} : memref<1x8x128xf32, #tpu.memory_space<vmem>>, vector<1x1x128xf32>,
    %cst_7 = arith.constant 0.000000e+00 : f32
    %12 = vector.broadcast %cst_7 : f32 to vector<6x128xf32>
    %c0_8 = arith.constant 0 : index
    %c2 = arith.constant 2 : index
    %c0_9 = arith.constant 0 : index
    %13 = vector.load %arg2[%c0_8, %c2, %c0_9] : memref<1x8x128xf32, #tpu.memory_space<vmem>>, vector<1x6x128xf32>
    %14 = vector.shape_cast %13 : vector<1x6x128xf32> to vector<6x128xf32>
    %15 = vector.shape_cast %12 : vector<6x128xf32> to vector<1x6x128xf32>
    tpu.vector_store %arg2[%c0_8, %c2, %c0_9], %15 {strides = array<i32>} : memref<1x8x128xf32, #tpu.memory_space<vmem>>, vector<1x6x128xf32>,
    return
  }
  func.func @transform_0(%arg0: i32) -> (i32, i32) {
    %c0_i32 = arith.constant 0 : i32
    %c0_i32_0 = arith.constant 0 : i32
    return %arg0, %c0_i32 : i32, i32
  }
  func.func @transform_1(%arg0: i32) -> (i32, i32, i32) {
    %c0_i32 = arith.constant 0 : i32
    %c0_i32_0 = arith.constant 0 : i32
    %c0_i32_1 = arith.constant 0 : i32
    return %arg0, %c0_i32, %c0_i32_0 : i32, i32, i32
  }
}

module attributes {stable_mosaic.version = 11 : i64} {
  func.func @_bn_conv1_kernel(%arg0: i32, %arg1: memref<512x128xf32, #tpu.memory_space<vmem>>, %arg2: memref<1x128xf32, #tpu.memory_space<vmem>>, %arg3: memref<1x128xf32, #tpu.memory_space<vmem>>, %arg4: memref<128x128xbf16, #tpu.memory_space<vmem>>, %arg5: memref<512x128xbf16, #tpu.memory_space<vmem>>, %arg6: memref<1x8x128xf32, #tpu.memory_space<vmem>>) attributes {dimension_semantics = [#tpu.dimension_semantics<parallel>], iteration_bounds = array<i64: 1>, scalar_prefetch = 0 : i64, scratch_operands = 0 : i64, tpu.core_type = #tpu.core_type<tc>, window_params = [{transform_indices = @transform_0, window_bounds = array<i64: 512, 128>}, {pipeline_mode = #tpu.pipeline_mode<synchronous>, transform_indices = @transform_1, window_bounds = array<i64: 1, 128>}, {pipeline_mode = #tpu.pipeline_mode<synchronous>, transform_indices = @transform_2, window_bounds = array<i64: 1, 128>}, {pipeline_mode = #tpu.pipeline_mode<synchronous>, transform_indices = @transform_3, window_bounds = array<i64: 128, 128>}, {transform_indices = @transform_4, window_bounds = array<i64: 512, 128>}, {transform_indices = @transform_5, window_bounds = array<i64: 1, 8, 128>}]} {
    %c0 = arith.constant 0 : index
    %c0_0 = arith.constant 0 : index
    %0 = vector.load %arg1[%c0, %c0_0] : memref<512x128xf32, #tpu.memory_space<vmem>>, vector<512x128xf32>
    %c0_1 = arith.constant 0 : index
    %c0_2 = arith.constant 0 : index
    %1 = vector.load %arg2[%c0_1, %c0_2] : memref<1x128xf32, #tpu.memory_space<vmem>>, vector<1x128xf32>
    %2 = vector.broadcast %1 : vector<1x128xf32> to vector<512x128xf32>
    %3 = arith.mulf %0, %2 : vector<512x128xf32>
    %c0_3 = arith.constant 0 : index
    %c0_4 = arith.constant 0 : index
    %4 = vector.load %arg3[%c0_3, %c0_4] : memref<1x128xf32, #tpu.memory_space<vmem>>, vector<1x128xf32>
    %5 = vector.broadcast %4 : vector<1x128xf32> to vector<512x128xf32>
    %6 = arith.addf %3, %5 : vector<512x128xf32>
    %cst = arith.constant 0.000000e+00 : f32
    %7 = vector.broadcast %cst : f32 to vector<512x128xf32>
    %8 = arith.maximumf %6, %7 : vector<512x128xf32>
    %9 = arith.truncf %8 : vector<512x128xf32> to vector<512x128xbf16>
    %c0_5 = arith.constant 0 : index
    %c0_6 = arith.constant 0 : index
    %10 = vector.load %arg4[%c0_5, %c0_6] : memref<128x128xbf16, #tpu.memory_space<vmem>>, vector<128x128xbf16>
    %cst_7 = arith.constant dense<0.000000e+00> : vector<512x128xf32>
    %11 = tpu.matmul %9, %10, %cst_7 {dimension_numbers = #tpu.dot_dimension_numbers<[1], [0], [0], [1], [0, 0, 1, 1], [], []>} : vector<512x128xbf16>, vector<128x128xbf16>, vector<512x128xf32> -> vector<512x128xf32>
    %12 = arith.truncf %11 : vector<512x128xf32> to vector<512x128xbf16>
    %c0_8 = arith.constant 0 : index
    %c0_9 = arith.constant 0 : index
    %13 = vector.load %arg5[%c0_8, %c0_9] : memref<512x128xbf16, #tpu.memory_space<vmem>>, vector<512x128xbf16>
    tpu.vector_store %arg5[%c0_8, %c0_9], %12 {strides = array<i32>} : memref<512x128xbf16, #tpu.memory_space<vmem>>, vector<512x128xbf16>,
    %cst_10 = arith.constant dense<0.000000e+00> : vector<128xf32>
    %14 = vector.multi_reduction <add>, %11, %cst_10 [0] : vector<512x128xf32> to vector<128xf32>
    %15 = vector.shape_cast %14 : vector<128xf32> to vector<1x128xf32>
    %c0_11 = arith.constant 0 : index
    %c0_12 = arith.constant 0 : index
    %c0_13 = arith.constant 0 : index
    %16 = vector.load %arg6[%c0_11, %c0_12, %c0_13] : memref<1x8x128xf32, #tpu.memory_space<vmem>>, vector<1x1x128xf32>
    %17 = vector.shape_cast %16 : vector<1x1x128xf32> to vector<1x128xf32>
    %18 = vector.shape_cast %15 : vector<1x128xf32> to vector<1x1x128xf32>
    tpu.vector_store %arg6[%c0_11, %c0_12, %c0_13], %18 {strides = array<i32>} : memref<1x8x128xf32, #tpu.memory_space<vmem>>, vector<1x1x128xf32>,
    %19 = arith.mulf %11, %11 : vector<512x128xf32>
    %cst_14 = arith.constant dense<0.000000e+00> : vector<128xf32>
    %20 = vector.multi_reduction <add>, %19, %cst_14 [0] : vector<512x128xf32> to vector<128xf32>
    %21 = vector.shape_cast %20 : vector<128xf32> to vector<1x128xf32>
    %c0_15 = arith.constant 0 : index
    %c1 = arith.constant 1 : index
    %c0_16 = arith.constant 0 : index
    %22 = vector.load %arg6[%c0_15, %c1, %c0_16] : memref<1x8x128xf32, #tpu.memory_space<vmem>>, vector<1x1x128xf32>
    %23 = vector.shape_cast %22 : vector<1x1x128xf32> to vector<1x128xf32>
    %24 = vector.shape_cast %21 : vector<1x128xf32> to vector<1x1x128xf32>
    tpu.vector_store %arg6[%c0_15, %c1, %c0_16], %24 {strides = array<i32>} : memref<1x8x128xf32, #tpu.memory_space<vmem>>, vector<1x1x128xf32>,
    %cst_17 = arith.constant 0.000000e+00 : f32
    %25 = vector.broadcast %cst_17 : f32 to vector<6x128xf32>
    %c0_18 = arith.constant 0 : index
    %c2 = arith.constant 2 : index
    %c0_19 = arith.constant 0 : index
    %26 = vector.load %arg6[%c0_18, %c2, %c0_19] : memref<1x8x128xf32, #tpu.memory_space<vmem>>, vector<1x6x128xf32>
    %27 = vector.shape_cast %26 : vector<1x6x128xf32> to vector<6x128xf32>
    %28 = vector.shape_cast %25 : vector<6x128xf32> to vector<1x6x128xf32>
    tpu.vector_store %arg6[%c0_18, %c2, %c0_19], %28 {strides = array<i32>} : memref<1x8x128xf32, #tpu.memory_space<vmem>>, vector<1x6x128xf32>,
    return
  }
  func.func @transform_0(%arg0: i32) -> (i32, i32) {
    %c0_i32 = arith.constant 0 : i32
    %c0_i32_0 = arith.constant 0 : i32
    return %arg0, %c0_i32 : i32, i32
  }
  func.func @transform_1(%arg0: i32) -> (i32, i32) {
    %c0_i32 = arith.constant 0 : i32
    %c0_i32_0 = arith.constant 0 : i32
    %c0_i32_1 = arith.constant 0 : i32
    return %c0_i32, %c0_i32_0 : i32, i32
  }
  func.func @transform_2(%arg0: i32) -> (i32, i32) {
    %c0_i32 = arith.constant 0 : i32
    %c0_i32_0 = arith.constant 0 : i32
    %c0_i32_1 = arith.constant 0 : i32
    return %c0_i32, %c0_i32_0 : i32, i32
  }
  func.func @transform_3(%arg0: i32) -> (i32, i32) {
    %c0_i32 = arith.constant 0 : i32
    %c0_i32_0 = arith.constant 0 : i32
    %c0_i32_1 = arith.constant 0 : i32
    return %c0_i32, %c0_i32_0 : i32, i32
  }
  func.func @transform_4(%arg0: i32) -> (i32, i32) {
    %c0_i32 = arith.constant 0 : i32
    %c0_i32_0 = arith.constant 0 : i32
    return %arg0, %c0_i32 : i32, i32
  }
  func.func @transform_5(%arg0: i32) -> (i32, i32, i32) {
    %c0_i32 = arith.constant 0 : i32
    %c0_i32_0 = arith.constant 0 : i32
    %c0_i32_1 = arith.constant 0 : i32
    return %arg0, %c0_i32, %c0_i32_0 : i32, i32, i32
  }
}

module attributes {stable_mosaic.version = 11 : i64} {
  func.func @_conv2_kernel(%arg0: i32, %arg1: i32, %arg2: memref<1x16x16x128xbf16, #tpu.memory_space<vmem>>, %arg3: memref<1x128xf32, #tpu.memory_space<vmem>>, %arg4: memref<1x128xf32, #tpu.memory_space<vmem>>, %arg5: memref<1152x128xbf16, #tpu.memory_space<vmem>>, %arg6: memref<1x16x16x128xf32, #tpu.memory_space<vmem>>, %arg7: memref<1x128xf32, #tpu.memory_space<vmem>>, %arg8: memref<1x128xf32, #tpu.memory_space<vmem>>, %arg9: memref<128x128xbf16, #tpu.memory_space<vmem>>, %arg10: memref<1x8x8x128xbf16, #tpu.memory_space<vmem>>, %arg11: memref<1x8x8x128xbf16, #tpu.memory_space<vmem>>, %arg12: memref<1x1x8x128xf32, #tpu.memory_space<vmem>>, %arg13: memref<64x1152xbf16, #tpu.memory_space<vmem>>, %arg14: memref<18x128xf32, #tpu.memory_space<vmem>>, %arg15: memref<64x128xbf16, #tpu.memory_space<vmem>>, %arg16: memref<16x128xf32, #tpu.memory_space<vmem>>) attributes {dimension_semantics = [#tpu.dimension_semantics<parallel>, #tpu.dimension_semantics<parallel>], iteration_bounds = array<i64: 2, 1>, scalar_prefetch = 0 : i64, scratch_operands = 4 : i64, tpu.core_type = #tpu.core_type<tc>, window_params = [{transform_indices = @transform_0, window_bounds = array<i64: 1, 16, 16, 128>}, {pipeline_mode = #tpu.pipeline_mode<synchronous>, transform_indices = @transform_1, window_bounds = array<i64: 1, 128>}, {pipeline_mode = #tpu.pipeline_mode<synchronous>, transform_indices = @transform_2, window_bounds = array<i64: 1, 128>}, {pipeline_mode = #tpu.pipeline_mode<synchronous>, transform_indices = @transform_3, window_bounds = array<i64: 1152, 128>}, {transform_indices = @transform_4, window_bounds = array<i64: 1, 16, 16, 128>}, {pipeline_mode = #tpu.pipeline_mode<synchronous>, transform_indices = @transform_5, window_bounds = array<i64: 1, 128>}, {pipeline_mode = #tpu.pipeline_mode<synchronous>, transform_indices = @transform_6, window_bounds = array<i64: 1, 128>}, {pipeline_mode = #tpu.pipeline_mode<synchronous>, transform_indices = @transform_7, window_bounds = array<i64: 128, 128>}, {transform_indices = @transform_8, window_bounds = array<i64: 1, 8, 8, 128>}, {transform_indices = @transform_9, window_bounds = array<i64: 1, 8, 8, 128>}, {transform_indices = @transform_10, window_bounds = array<i64: 1, 1, 8, 128>}]} {
    %c0 = arith.constant 0 : index
    %c0_0 = arith.constant 0 : index
    %0 = vector.load %arg3[%c0, %c0_0] : memref<1x128xf32, #tpu.memory_space<vmem>>, vector<1x128xf32>
    %c0_1 = arith.constant 0 : index
    %c0_2 = arith.constant 0 : index
    %1 = vector.load %arg4[%c0_1, %c0_2] : memref<1x128xf32, #tpu.memory_space<vmem>>, vector<1x128xf32>
    %cst = arith.constant 0.000000e+00 : f32
    %2 = vector.broadcast %cst : f32 to vector<1x128xf32>
    %c0_3 = arith.constant 0 : index
    %c0_4 = arith.constant 0 : index
    %3 = vector.load %arg14[%c0_3, %c0_4] : memref<18x128xf32, #tpu.memory_space<vmem>>, vector<1x128xf32>
    tpu.vector_store %arg14[%c0_3, %c0_4], %2 {strides = array<i32>} : memref<18x128xf32, #tpu.memory_space<vmem>>, vector<1x128xf32>,
    %cst_5 = arith.constant 0.000000e+00 : f32
    %4 = vector.broadcast %cst_5 : f32 to vector<1x128xf32>
    %c17 = arith.constant 17 : index
    %c0_6 = arith.constant 0 : index
    %5 = vector.load %arg14[%c17, %c0_6] : memref<18x128xf32, #tpu.memory_space<vmem>>, vector<1x128xf32>
    tpu.vector_store %arg14[%c17, %c0_6], %4 {strides = array<i32>} : memref<18x128xf32, #tpu.memory_space<vmem>>, vector<1x128xf32>,
    %c16_i32 = arith.constant 16 : i32
    %6 = arith.muli %arg1, %c16_i32 : i32
    %c0_i32 = arith.constant 0 : i32
    %7 = arith.addi %6, %c0_i32 : i32
    %c1_i32 = arith.constant 1 : i32
    %8 = arith.subi %7, %c1_i32 : i32
    %c0_i32_7 = arith.constant 0 : i32
    %9 = arith.cmpi sge, %8, %c0_i32_7 : i32
    %c16_i32_8 = arith.constant 16 : i32
    %10 = arith.cmpi slt, %8, %c16_i32_8 : i32
    %11 = arith.andi %9, %10 : i1
    %c0_i32_9 = arith.constant 0 : i32
    %c15_i32 = arith.constant 15 : i32
    %12 = arith.maxsi %c0_i32_9, %8 : i32
    %13 = arith.minsi %c15_i32, %12 : i32
    %c0_10 = arith.constant 0 : index
    %14 = arith.index_cast %13 : i32 to index
    %c0_11 = arith.constant 0 : index
    %c0_12 = arith.constant 0 : index
    %15 = vector.load %arg2[%c0_10, %14, %c0_11, %c0_12] : memref<1x16x16x128xbf16, #tpu.memory_space<vmem>>, vector<1x1x16x128xbf16>
    %16 = vector.shape_cast %15 : vector<1x1x16x128xbf16> to vector<16x128xbf16>
    %17 = arith.extf %16 : vector<16x128xbf16> to vector<16x128xf32>
    %18 = vector.broadcast %0 : vector<1x128xf32> to vector<16x128xf32>
    %19 = arith.mulf %17, %18 : vector<16x128xf32>
    %20 = vector.broadcast %1 : vector<1x128xf32> to vector<16x128xf32>
    %21 = arith.addf %19, %20 : vector<16x128xf32>
    %cst_13 = arith.constant 0.000000e+00 : f32
    %22 = vector.broadcast %cst_13 : f32 to vector<16x128xf32>
    %23 = arith.maximumf %21, %22 : vector<16x128xf32>
    %24 = arith.extui %11 : i1 to i32
    %25 = arith.sitofp %24 : i32 to f32
    %26 = vector.broadcast %25 : f32 to vector<16x128xf32>
    %27 = arith.mulf %23, %26 : vector<16x128xf32>
    %c1 = arith.constant 1 : index
    %c0_14 = arith.constant 0 : index
    %28 = vector.load %arg14[%c1, %c0_14] : memref<18x128xf32, #tpu.memory_space<vmem>>, vector<16x128xf32>
    tpu.vector_store %arg14[%c1, %c0_14], %27 {strides = array<i32>} : memref<18x128xf32, #tpu.memory_space<vmem>>, vector<16x128xf32>,
    %c0_15 = arith.constant 0 : index
    %c0_16 = arith.constant 0 : index
    %29 = tpu.strided_load %arg14[%c0_15, %c0_16] {strides = array<i32: 2, 1>} : memref<18x128xf32, #tpu.memory_space<vmem>>, vector<8x128xf32>
    %c1_17 = arith.constant 1 : index
    %c0_18 = arith.constant 0 : index
    %30 = tpu.strided_load %arg14[%c1_17, %c0_18] {strides = array<i32: 2, 1>} : memref<18x128xf32, #tpu.memory_space<vmem>>, vector<8x128xf32>
    %c2 = arith.constant 2 : index
    %c0_19 = arith.constant 0 : index
    %31 = tpu.strided_load %arg14[%c2, %c0_19] {strides = array<i32: 2, 1>} : memref<18x128xf32, #tpu.memory_space<vmem>>, vector<8x128xf32>
    %32 = tpu.concatenate %29, %30, %31 in 1 : vector<8x128xf32>, vector<8x128xf32>, vector<8x128xf32> -> vector<8x384xf32>
    %33 = arith.truncf %32 : vector<8x384xf32> to vector<8x384xbf16>
    %c0_20 = arith.constant 0 : index
    %c0_21 = arith.constant 0 : index
    %34 = vector.load %arg13[%c0_20, %c0_21] : memref<64x1152xbf16, #tpu.memory_space<vmem>>, vector<8x384xbf16>
    tpu.vector_store %arg13[%c0_20, %c0_21], %33 {strides = array<i32>} : memref<64x1152xbf16, #tpu.memory_space<vmem>>, vector<8x384xbf16>,
    %c16_i32_22 = arith.constant 16 : i32
    %35 = arith.muli %arg1, %c16_i32_22 : i32
    %c1_i32_23 = arith.constant 1 : i32
    %36 = arith.addi %35, %c1_i32_23 : i32
    %c1_i32_24 = arith.constant 1 : i32
    %37 = arith.subi %36, %c1_i32_24 : i32
    %c0_i32_25 = arith.constant 0 : i32
    %38 = arith.cmpi sge, %37, %c0_i32_25 : i32
    %c16_i32_26 = arith.constant 16 : i32
    %39 = arith.cmpi slt, %37, %c16_i32_26 : i32
    %40 = arith.andi %38, %39 : i1
    %c0_i32_27 = arith.constant 0 : i32
    %c15_i32_28 = arith.constant 15 : i32
    %41 = arith.maxsi %c0_i32_27, %37 : i32
    %42 = arith.minsi %c15_i32_28, %41 : i32
    %c0_29 = arith.constant 0 : index
    %43 = arith.index_cast %42 : i32 to index
    %c0_30 = arith.constant 0 : index
    %c0_31 = arith.constant 0 : index
    %44 = vector.load %arg2[%c0_29, %43, %c0_30, %c0_31] : memref<1x16x16x128xbf16, #tpu.memory_space<vmem>>, vector<1x1x16x128xbf16>
    %45 = vector.shape_cast %44 : vector<1x1x16x128xbf16> to vector<16x128xbf16>
    %46 = arith.extf %45 : vector<16x128xbf16> to vector<16x128xf32>
    %47 = vector.broadcast %0 : vector<1x128xf32> to vector<16x128xf32>
    %48 = arith.mulf %46, %47 : vector<16x128xf32>
    %49 = vector.broadcast %1 : vector<1x128xf32> to vector<16x128xf32>
    %50 = arith.addf %48, %49 : vector<16x128xf32>
    %cst_32 = arith.constant 0.000000e+00 : f32
    %51 = vector.broadcast %cst_32 : f32 to vector<16x128xf32>
    %52 = arith.maximumf %50, %51 : vector<16x128xf32>
    %53 = arith.extui %40 : i1 to i32
    %54 = arith.sitofp %53 : i32 to f32
    %55 = vector.broadcast %54 : f32 to vector<16x128xf32>
    %56 = arith.mulf %52, %55 : vector<16x128xf32>
    %c1_33 = arith.constant 1 : index
    %c0_34 = arith.constant 0 : index
    %57 = vector.load %arg14[%c1_33, %c0_34] : memref<18x128xf32, #tpu.memory_space<vmem>>, vector<16x128xf32>
    tpu.vector_store %arg14[%c1_33, %c0_34], %56 {strides = array<i32>} : memref<18x128xf32, #tpu.memory_space<vmem>>, vector<16x128xf32>,
    %c0_35 = arith.constant 0 : index
    %c0_36 = arith.constant 0 : index
    %58 = tpu.strided_load %arg14[%c0_35, %c0_36] {strides = array<i32: 2, 1>} : memref<18x128xf32, #tpu.memory_space<vmem>>, vector<8x128xf32>
    %c1_37 = arith.constant 1 : index
    %c0_38 = arith.constant 0 : index
    %59 = tpu.strided_load %arg14[%c1_37, %c0_38] {strides = array<i32: 2, 1>} : memref<18x128xf32, #tpu.memory_space<vmem>>, vector<8x128xf32>
    %c2_39 = arith.constant 2 : index
    %c0_40 = arith.constant 0 : index
    %60 = tpu.strided_load %arg14[%c2_39, %c0_40] {strides = array<i32: 2, 1>} : memref<18x128xf32, #tpu.memory_space<vmem>>, vector<8x128xf32>
    %61 = tpu.concatenate %58, %59, %60 in 1 : vector<8x128xf32>, vector<8x128xf32>, vector<8x128xf32> -> vector<8x384xf32>
    %62 = arith.truncf %61 : vector<8x384xf32> to vector<8x384xbf16>
    %c0_41 = arith.constant 0 : index
    %c384 = arith.constant 384 : index
    %63 = vector.load %arg13[%c0_41, %c384] : memref<64x1152xbf16, #tpu.memory_space<vmem>>, vector<8x384xbf16>
    tpu.vector_store %arg13[%c0_41, %c384], %62 {strides = array<i32>} : memref<64x1152xbf16, #tpu.memory_space<vmem>>, vector<8x384xbf16>,
    %c16_i32_42 = arith.constant 16 : i32
    %64 = arith.muli %arg1, %c16_i32_42 : i32
    %c2_i32 = arith.constant 2 : i32
    %65 = arith.addi %64, %c2_i32 : i32
    %c1_i32_43 = arith.constant 1 : i32
    %66 = arith.subi %65, %c1_i32_43 : i32
    %c0_i32_44 = arith.constant 0 : i32
    %67 = arith.cmpi sge, %66, %c0_i32_44 : i32
    %c16_i32_45 = arith.constant 16 : i32
    %68 = arith.cmpi slt, %66, %c16_i32_45 : i32
    %69 = arith.andi %67, %68 : i1
    %c0_i32_46 = arith.constant 0 : i32
    %c15_i32_47 = arith.constant 15 : i32
    %70 = arith.maxsi %c0_i32_46, %66 : i32
    %71 = arith.minsi %c15_i32_47, %70 : i32
    %c0_48 = arith.constant 0 : index
    %72 = arith.index_cast %71 : i32 to index
    %c0_49 = arith.constant 0 : index
    %c0_50 = arith.constant 0 : index
    %73 = vector.load %arg2[%c0_48, %72, %c0_49, %c0_50] : memref<1x16x16x128xbf16, #tpu.memory_space<vmem>>, vector<1x1x16x128xbf16>
    %74 = vector.shape_cast %73 : vector<1x1x16x128xbf16> to vector<16x128xbf16>
    %75 = arith.extf %74 : vector<16x128xbf16> to vector<16x128xf32>
    %76 = vector.broadcast %0 : vector<1x128xf32> to vector<16x128xf32>
    %77 = arith.mulf %75, %76 : vector<16x128xf32>
    %78 = vector.broadcast %1 : vector<1x128xf32> to vector<16x128xf32>
    %79 = arith.addf %77, %78 : vector<16x128xf32>
    %cst_51 = arith.constant 0.000000e+00 : f32
    %80 = vector.broadcast %cst_51 : f32 to vector<16x128xf32>
    %81 = arith.maximumf %79, %80 : vector<16x128xf32>
    %82 = arith.extui %69 : i1 to i32
    %83 = arith.sitofp %82 : i32 to f32
    %84 = vector.broadcast %83 : f32 to vector<16x128xf32>
    %85 = arith.mulf %81, %84 : vector<16x128xf32>
    %c1_52 = arith.constant 1 : index
    %c0_53 = arith.constant 0 : index
    %86 = vector.load %arg14[%c1_52, %c0_53] : memref<18x128xf32, #tpu.memory_space<vmem>>, vector<16x128xf32>
    tpu.vector_store %arg14[%c1_52, %c0_53], %85 {strides = array<i32>} : memref<18x128xf32, #tpu.memory_space<vmem>>, vector<16x128xf32>,
    %c0_54 = arith.constant 0 : index
    %c0_55 = arith.constant 0 : index
    %87 = tpu.strided_load %arg14[%c0_54, %c0_55] {strides = array<i32: 2, 1>} : memref<18x128xf32, #tpu.memory_space<vmem>>, vector<8x128xf32>
    %c1_56 = arith.constant 1 : index
    %c0_57 = arith.constant 0 : index
    %88 = tpu.strided_load %arg14[%c1_56, %c0_57] {strides = array<i32: 2, 1>} : memref<18x128xf32, #tpu.memory_space<vmem>>, vector<8x128xf32>
    %c2_58 = arith.constant 2 : index
    %c0_59 = arith.constant 0 : index
    %89 = tpu.strided_load %arg14[%c2_58, %c0_59] {strides = array<i32: 2, 1>} : memref<18x128xf32, #tpu.memory_space<vmem>>, vector<8x128xf32>
    %90 = tpu.concatenate %87, %88, %89 in 1 : vector<8x128xf32>, vector<8x128xf32>, vector<8x128xf32> -> vector<8x384xf32>
    %91 = arith.truncf %90 : vector<8x384xf32> to vector<8x384xbf16>
    %c8 = arith.constant 8 : index
    %c0_60 = arith.constant 0 : index
    %92 = vector.load %arg13[%c8, %c0_60] : memref<64x1152xbf16, #tpu.memory_space<vmem>>, vector<8x384xbf16>
    tpu.vector_store %arg13[%c8, %c0_60], %91 {strides = array<i32>} : memref<64x1152xbf16, #tpu.memory_space<vmem>>, vector<8x384xbf16>,
    %c0_61 = arith.constant 0 : index
    %c768 = arith.constant 768 : index
    %93 = vector.load %arg13[%c0_61, %c768] : memref<64x1152xbf16, #tpu.memory_space<vmem>>, vector<8x384xbf16>
    tpu.vector_store %arg13[%c0_61, %c768], %91 {strides = array<i32>} : memref<64x1152xbf16, #tpu.memory_space<vmem>>, vector<8x384xbf16>,
    %c16_i32_62 = arith.constant 16 : i32
    %94 = arith.muli %arg1, %c16_i32_62 : i32
    %c3_i32 = arith.constant 3 : i32
    %95 = arith.addi %94, %c3_i32 : i32
    %c1_i32_63 = arith.constant 1 : i32
    %96 = arith.subi %95, %c1_i32_63 : i32
    %c0_i32_64 = arith.constant 0 : i32
    %97 = arith.cmpi sge, %96, %c0_i32_64 : i32
    %c16_i32_65 = arith.constant 16 : i32
    %98 = arith.cmpi slt, %96, %c16_i32_65 : i32
    %99 = arith.andi %97, %98 : i1
    %c0_i32_66 = arith.constant 0 : i32
    %c15_i32_67 = arith.constant 15 : i32
    %100 = arith.maxsi %c0_i32_66, %96 : i32
    %101 = arith.minsi %c15_i32_67, %100 : i32
    %c0_68 = arith.constant 0 : index
    %102 = arith.index_cast %101 : i32 to index
    %c0_69 = arith.constant 0 : index
    %c0_70 = arith.constant 0 : index
    %103 = vector.load %arg2[%c0_68, %102, %c0_69, %c0_70] : memref<1x16x16x128xbf16, #tpu.memory_space<vmem>>, vector<1x1x16x128xbf16>
    %104 = vector.shape_cast %103 : vector<1x1x16x128xbf16> to vector<16x128xbf16>
    %105 = arith.extf %104 : vector<16x128xbf16> to vector<16x128xf32>
    %106 = vector.broadcast %0 : vector<1x128xf32> to vector<16x128xf32>
    %107 = arith.mulf %105, %106 : vector<16x128xf32>
    %108 = vector.broadcast %1 : vector<1x128xf32> to vector<16x128xf32>
    %109 = arith.addf %107, %108 : vector<16x128xf32>
    %cst_71 = arith.constant 0.000000e+00 : f32
    %110 = vector.broadcast %cst_71 : f32 to vector<16x128xf32>
    %111 = arith.maximumf %109, %110 : vector<16x128xf32>
    %112 = arith.extui %99 : i1 to i32
    %113 = arith.sitofp %112 : i32 to f32
    %114 = vector.broadcast %113 : f32 to vector<16x128xf32>
    %115 = arith.mulf %111, %114 : vector<16x128xf32>
    %c1_72 = arith.constant 1 : index
    %c0_73 = arith.constant 0 : index
    %116 = vector.load %arg14[%c1_72, %c0_73] : memref<18x128xf32, #tpu.memory_space<vmem>>, vector<16x128xf32>
    tpu.vector_store %arg14[%c1_72, %c0_73], %115 {strides = array<i32>} : memref<18x128xf32, #tpu.memory_space<vmem>>, vector<16x128xf32>,
    %c0_74 = arith.constant 0 : index
    %c0_75 = arith.constant 0 : index
    %117 = tpu.strided_load %arg14[%c0_74, %c0_75] {strides = array<i32: 2, 1>} : memref<18x128xf32, #tpu.memory_space<vmem>>, vector<8x128xf32>
    %c1_76 = arith.constant 1 : index
    %c0_77 = arith.constant 0 : index
    %118 = tpu.strided_load %arg14[%c1_76, %c0_77] {strides = array<i32: 2, 1>} : memref<18x128xf32, #tpu.memory_space<vmem>>, vector<8x128xf32>
    %c2_78 = arith.constant 2 : index
    %c0_79 = arith.constant 0 : index
    %119 = tpu.strided_load %arg14[%c2_78, %c0_79] {strides = array<i32: 2, 1>} : memref<18x128xf32, #tpu.memory_space<vmem>>, vector<8x128xf32>
    %120 = tpu.concatenate %117, %118, %119 in 1 : vector<8x128xf32>, vector<8x128xf32>, vector<8x128xf32> -> vector<8x384xf32>
    %121 = arith.truncf %120 : vector<8x384xf32> to vector<8x384xbf16>
    %c8_80 = arith.constant 8 : index
    %c384_81 = arith.constant 384 : index
    %122 = vector.load %arg13[%c8_80, %c384_81] : memref<64x1152xbf16, #tpu.memory_space<vmem>>, vector<8x384xbf16>
    tpu.vector_store %arg13[%c8_80, %c384_81], %121 {strides = array<i32>} : memref<64x1152xbf16, #tpu.memory_space<vmem>>, vector<8x384xbf16>,
    %c16_i32_82 = arith.constant 16 : i32
    %123 = arith.muli %arg1, %c16_i32_82 : i32
    %c4_i32 = arith.constant 4 : i32
    %124 = arith.addi %123, %c4_i32 : i32
    %c1_i32_83 = arith.constant 1 : i32
    %125 = arith.subi %124, %c1_i32_83 : i32
    %c0_i32_84 = arith.constant 0 : i32
    %126 = arith.cmpi sge, %125, %c0_i32_84 : i32
    %c16_i32_85 = arith.constant 16 : i32
    %127 = arith.cmpi slt, %125, %c16_i32_85 : i32
    %128 = arith.andi %126, %127 : i1
    %c0_i32_86 = arith.constant 0 : i32
    %c15_i32_87 = arith.constant 15 : i32
    %129 = arith.maxsi %c0_i32_86, %125 : i32
    %130 = arith.minsi %c15_i32_87, %129 : i32
    %c0_88 = arith.constant 0 : index
    %131 = arith.index_cast %130 : i32 to index
    %c0_89 = arith.constant 0 : index
    %c0_90 = arith.constant 0 : index
    %132 = vector.load %arg2[%c0_88, %131, %c0_89, %c0_90] : memref<1x16x16x128xbf16, #tpu.memory_space<vmem>>, vector<1x1x16x128xbf16>
    %133 = vector.shape_cast %132 : vector<1x1x16x128xbf16> to vector<16x128xbf16>
    %134 = arith.extf %133 : vector<16x128xbf16> to vector<16x128xf32>
    %135 = vector.broadcast %0 : vector<1x128xf32> to vector<16x128xf32>
    %136 = arith.mulf %134, %135 : vector<16x128xf32>
    %137 = vector.broadcast %1 : vector<1x128xf32> to vector<16x128xf32>
    %138 = arith.addf %136, %137 : vector<16x128xf32>
    %cst_91 = arith.constant 0.000000e+00 : f32
    %139 = vector.broadcast %cst_91 : f32 to vector<16x128xf32>
    %140 = arith.maximumf %138, %139 : vector<16x128xf32>
    %141 = arith.extui %128 : i1 to i32
    %142 = arith.sitofp %141 : i32 to f32
    %143 = vector.broadcast %142 : f32 to vector<16x128xf32>
    %144 = arith.mulf %140, %143 : vector<16x128xf32>
    %c1_92 = arith.constant 1 : index
    %c0_93 = arith.constant 0 : index
    %145 = vector.load %arg14[%c1_92, %c0_93] : memref<18x128xf32, #tpu.memory_space<vmem>>, vector<16x128xf32>
    tpu.vector_store %arg14[%c1_92, %c0_93], %144 {strides = array<i32>} : memref<18x128xf32, #tpu.memory_space<vmem>>, vector<16x128xf32>,
    %c0_94 = arith.constant 0 : index
    %c0_95 = arith.constant 0 : index
    %146 = tpu.strided_load %arg14[%c0_94, %c0_95] {strides = array<i32: 2, 1>} : memref<18x128xf32, #tpu.memory_space<vmem>>, vector<8x128xf32>
    %c1_96 = arith.constant 1 : index
    %c0_97 = arith.constant 0 : index
    %147 = tpu.strided_load %arg14[%c1_96, %c0_97] {strides = array<i32: 2, 1>} : memref<18x128xf32, #tpu.memory_space<vmem>>, vector<8x128xf32>
    %c2_98 = arith.constant 2 : index
    %c0_99 = arith.constant 0 : index
    %148 = tpu.strided_load %arg14[%c2_98, %c0_99] {strides = array<i32: 2, 1>} : memref<18x128xf32, #tpu.memory_space<vmem>>, vector<8x128xf32>
    %149 = tpu.concatenate %146, %147, %148 in 1 : vector<8x128xf32>, vector<8x128xf32>, vector<8x128xf32> -> vector<8x384xf32>
    %150 = arith.truncf %149 : vector<8x384xf32> to vector<8x384xbf16>
    %c16 = arith.constant 16 : index
    %c0_100 = arith.constant 0 : index
    %151 = vector.load %arg13[%c16, %c0_100] : memref<64x1152xbf16, #tpu.memory_space<vmem>>, vector<8x384xbf16>
    tpu.vector_store %arg13[%c16, %c0_100], %150 {strides = array<i32>} : memref<64x1152xbf16, #tpu.memory_space<vmem>>, vector<8x384xbf16>,
    %c8_101 = arith.constant 8 : index
    %c768_102 = arith.constant 768 : index
    %152 = vector.load %arg13[%c8_101, %c768_102] : memref<64x1152xbf16, #tpu.memory_space<vmem>>, vector<8x384xbf16>
    tpu.vector_store %arg13[%c8_101, %c768_102], %150 {strides = array<i32>} : memref<64x1152xbf16, #tpu.memory_space<vmem>>, vector<8x384xbf16>,
    %c16_i32_103 = arith.constant 16 : i32
    %153 = arith.muli %arg1, %c16_i32_103 : i32
    %c5_i32 = arith.constant 5 : i32
    %154 = arith.addi %153, %c5_i32 : i32
    %c1_i32_104 = arith.constant 1 : i32
    %155 = arith.subi %154, %c1_i32_104 : i32
    %c0_i32_105 = arith.constant 0 : i32
    %156 = arith.cmpi sge, %155, %c0_i32_105 : i32
    %c16_i32_106 = arith.constant 16 : i32
    %157 = arith.cmpi slt, %155, %c16_i32_106 : i32
    %158 = arith.andi %156, %157 : i1
    %c0_i32_107 = arith.constant 0 : i32
    %c15_i32_108 = arith.constant 15 : i32
    %159 = arith.maxsi %c0_i32_107, %155 : i32
    %160 = arith.minsi %c15_i32_108, %159 : i32
    %c0_109 = arith.constant 0 : index
    %161 = arith.index_cast %160 : i32 to index
    %c0_110 = arith.constant 0 : index
    %c0_111 = arith.constant 0 : index
    %162 = vector.load %arg2[%c0_109, %161, %c0_110, %c0_111] : memref<1x16x16x128xbf16, #tpu.memory_space<vmem>>, vector<1x1x16x128xbf16>
    %163 = vector.shape_cast %162 : vector<1x1x16x128xbf16> to vector<16x128xbf16>
    %164 = arith.extf %163 : vector<16x128xbf16> to vector<16x128xf32>
    %165 = vector.broadcast %0 : vector<1x128xf32> to vector<16x128xf32>
    %166 = arith.mulf %164, %165 : vector<16x128xf32>
    %167 = vector.broadcast %1 : vector<1x128xf32> to vector<16x128xf32>
    %168 = arith.addf %166, %167 : vector<16x128xf32>
    %cst_112 = arith.constant 0.000000e+00 : f32
    %169 = vector.broadcast %cst_112 : f32 to vector<16x128xf32>
    %170 = arith.maximumf %168, %169 : vector<16x128xf32>
    %171 = arith.extui %158 : i1 to i32
    %172 = arith.sitofp %171 : i32 to f32
    %173 = vector.broadcast %172 : f32 to vector<16x128xf32>
    %174 = arith.mulf %170, %173 : vector<16x128xf32>
    %c1_113 = arith.constant 1 : index
    %c0_114 = arith.constant 0 : index
    %175 = vector.load %arg14[%c1_113, %c0_114] : memref<18x128xf32, #tpu.memory_space<vmem>>, vector<16x128xf32>
    tpu.vector_store %arg14[%c1_113, %c0_114], %174 {strides = array<i32>} : memref<18x128xf32, #tpu.memory_space<vmem>>, vector<16x128xf32>,
    %c0_115 = arith.constant 0 : index
    %c0_116 = arith.constant 0 : index
    %176 = tpu.strided_load %arg14[%c0_115, %c0_116] {strides = array<i32: 2, 1>} : memref<18x128xf32, #tpu.memory_space<vmem>>, vector<8x128xf32>
    %c1_117 = arith.constant 1 : index
    %c0_118 = arith.constant 0 : index
    %177 = tpu.strided_load %arg14[%c1_117, %c0_118] {strides = array<i32: 2, 1>} : memref<18x128xf32, #tpu.memory_space<vmem>>, vector<8x128xf32>
    %c2_119 = arith.constant 2 : index
    %c0_120 = arith.constant 0 : index
    %178 = tpu.strided_load %arg14[%c2_119, %c0_120] {strides = array<i32: 2, 1>} : memref<18x128xf32, #tpu.memory_space<vmem>>, vector<8x128xf32>
    %179 = tpu.concatenate %176, %177, %178 in 1 : vector<8x128xf32>, vector<8x128xf32>, vector<8x128xf32> -> vector<8x384xf32>
    %180 = arith.truncf %179 : vector<8x384xf32> to vector<8x384xbf16>
    %c16_121 = arith.constant 16 : index
    %c384_122 = arith.constant 384 : index
    %181 = vector.load %arg13[%c16_121, %c384_122] : memref<64x1152xbf16, #tpu.memory_space<vmem>>, vector<8x384xbf16>
    tpu.vector_store %arg13[%c16_121, %c384_122], %180 {strides = array<i32>} : memref<64x1152xbf16, #tpu.memory_space<vmem>>, vector<8x384xbf16>,
    %c16_i32_123 = arith.constant 16 : i32
    %182 = arith.muli %arg1, %c16_i32_123 : i32
    %c6_i32 = arith.constant 6 : i32
    %183 = arith.addi %182, %c6_i32 : i32
    %c1_i32_124 = arith.constant 1 : i32
    %184 = arith.subi %183, %c1_i32_124 : i32
    %c0_i32_125 = arith.constant 0 : i32
    %185 = arith.cmpi sge, %184, %c0_i32_125 : i32
    %c16_i32_126 = arith.constant 16 : i32
    %186 = arith.cmpi slt, %184, %c16_i32_126 : i32
    %187 = arith.andi %185, %186 : i1
    %c0_i32_127 = arith.constant 0 : i32
    %c15_i32_128 = arith.constant 15 : i32
    %188 = arith.maxsi %c0_i32_127, %184 : i32
    %189 = arith.minsi %c15_i32_128, %188 : i32
    %c0_129 = arith.constant 0 : index
    %190 = arith.index_cast %189 : i32 to index
    %c0_130 = arith.constant 0 : index
    %c0_131 = arith.constant 0 : index
    %191 = vector.load %arg2[%c0_129, %190, %c0_130, %c0_131] : memref<1x16x16x128xbf16, #tpu.memory_space<vmem>>, vector<1x1x16x128xbf16>
    %192 = vector.shape_cast %191 : vector<1x1x16x128xbf16> to vector<16x128xbf16>
    %193 = arith.extf %192 : vector<16x128xbf16> to vector<16x128xf32>
    %194 = vector.broadcast %0 : vector<1x128xf32> to vector<16x128xf32>
    %195 = arith.mulf %193, %194 : vector<16x128xf32>
    %196 = vector.broadcast %1 : vector<1x128xf32> to vector<16x128xf32>
    %197 = arith.addf %195, %196 : vector<16x128xf32>
    %cst_132 = arith.constant 0.000000e+00 : f32
    %198 = vector.broadcast %cst_132 : f32 to vector<16x128xf32>
    %199 = arith.maximumf %197, %198 : vector<16x128xf32>
    %200 = arith.extui %187 : i1 to i32
    %201 = arith.sitofp %200 : i32 to f32
    %202 = vector.broadcast %201 : f32 to vector<16x128xf32>
    %203 = arith.mulf %199, %202 : vector<16x128xf32>
    %c1_133 = arith.constant 1 : index
    %c0_134 = arith.constant 0 : index
    %204 = vector.load %arg14[%c1_133, %c0_134] : memref<18x128xf32, #tpu.memory_space<vmem>>, vector<16x128xf32>
    tpu.vector_store %arg14[%c1_133, %c0_134], %203 {strides = array<i32>} : memref<18x128xf32, #tpu.memory_space<vmem>>, vector<16x128xf32>,
    %c0_135 = arith.constant 0 : index
    %c0_136 = arith.constant 0 : index
    %205 = tpu.strided_load %arg14[%c0_135, %c0_136] {strides = array<i32: 2, 1>} : memref<18x128xf32, #tpu.memory_space<vmem>>, vector<8x128xf32>
    %c1_137 = arith.constant 1 : index
    %c0_138 = arith.constant 0 : index
    %206 = tpu.strided_load %arg14[%c1_137, %c0_138] {strides = array<i32: 2, 1>} : memref<18x128xf32, #tpu.memory_space<vmem>>, vector<8x128xf32>
    %c2_139 = arith.constant 2 : index
    %c0_140 = arith.constant 0 : index
    %207 = tpu.strided_load %arg14[%c2_139, %c0_140] {strides = array<i32: 2, 1>} : memref<18x128xf32, #tpu.memory_space<vmem>>, vector<8x128xf32>
    %208 = tpu.concatenate %205, %206, %207 in 1 : vector<8x128xf32>, vector<8x128xf32>, vector<8x128xf32> -> vector<8x384xf32>
    %209 = arith.truncf %208 : vector<8x384xf32> to vector<8x384xbf16>
    %c24 = arith.constant 24 : index
    %c0_141 = arith.constant 0 : index
    %210 = vector.load %arg13[%c24, %c0_141] : memref<64x1152xbf16, #tpu.memory_space<vmem>>, vector<8x384xbf16>
    tpu.vector_store %arg13[%c24, %c0_141], %209 {strides = array<i32>} : memref<64x1152xbf16, #tpu.memory_space<vmem>>, vector<8x384xbf16>,
    %c16_142 = arith.constant 16 : index
    %c768_143 = arith.constant 768 : index
    %211 = vector.load %arg13[%c16_142, %c768_143] : memref<64x1152xbf16, #tpu.memory_space<vmem>>, vector<8x384xbf16>
    tpu.vector_store %arg13[%c16_142, %c768_143], %209 {strides = array<i32>} : memref<64x1152xbf16, #tpu.memory_space<vmem>>, vector<8x384xbf16>,
    %c16_i32_144 = arith.constant 16 : i32
    %212 = arith.muli %arg1, %c16_i32_144 : i32
    %c7_i32 = arith.constant 7 : i32
    %213 = arith.addi %212, %c7_i32 : i32
    %c1_i32_145 = arith.constant 1 : i32
    %214 = arith.subi %213, %c1_i32_145 : i32
    %c0_i32_146 = arith.constant 0 : i32
    %215 = arith.cmpi sge, %214, %c0_i32_146 : i32
    %c16_i32_147 = arith.constant 16 : i32
    %216 = arith.cmpi slt, %214, %c16_i32_147 : i32
    %217 = arith.andi %215, %216 : i1
    %c0_i32_148 = arith.constant 0 : i32
    %c15_i32_149 = arith.constant 15 : i32
    %218 = arith.maxsi %c0_i32_148, %214 : i32
    %219 = arith.minsi %c15_i32_149, %218 : i32
    %c0_150 = arith.constant 0 : index
    %220 = arith.index_cast %219 : i32 to index
    %c0_151 = arith.constant 0 : index
    %c0_152 = arith.constant 0 : index
    %221 = vector.load %arg2[%c0_150, %220, %c0_151, %c0_152] : memref<1x16x16x128xbf16, #tpu.memory_space<vmem>>, vector<1x1x16x128xbf16>
    %222 = vector.shape_cast %221 : vector<1x1x16x128xbf16> to vector<16x128xbf16>
    %223 = arith.extf %222 : vector<16x128xbf16> to vector<16x128xf32>
    %224 = vector.broadcast %0 : vector<1x128xf32> to vector<16x128xf32>
    %225 = arith.mulf %223, %224 : vector<16x128xf32>
    %226 = vector.broadcast %1 : vector<1x128xf32> to vector<16x128xf32>
    %227 = arith.addf %225, %226 : vector<16x128xf32>
    %cst_153 = arith.constant 0.000000e+00 : f32
    %228 = vector.broadcast %cst_153 : f32 to vector<16x128xf32>
    %229 = arith.maximumf %227, %228 : vector<16x128xf32>
    %230 = arith.extui %217 : i1 to i32
    %231 = arith.sitofp %230 : i32 to f32
    %232 = vector.broadcast %231 : f32 to vector<16x128xf32>
    %233 = arith.mulf %229, %232 : vector<16x128xf32>
    %c1_154 = arith.constant 1 : index
    %c0_155 = arith.constant 0 : index
    %234 = vector.load %arg14[%c1_154, %c0_155] : memref<18x128xf32, #tpu.memory_space<vmem>>, vector<16x128xf32>
    tpu.vector_store %arg14[%c1_154, %c0_155], %233 {strides = array<i32>} : memref<18x128xf32, #tpu.memory_space<vmem>>, vector<16x128xf32>,
    %c0_156 = arith.constant 0 : index
    %c0_157 = arith.constant 0 : index
    %235 = tpu.strided_load %arg14[%c0_156, %c0_157] {strides = array<i32: 2, 1>} : memref<18x128xf32, #tpu.memory_space<vmem>>, vector<8x128xf32>
    %c1_158 = arith.constant 1 : index
    %c0_159 = arith.constant 0 : index
    %236 = tpu.strided_load %arg14[%c1_158, %c0_159] {strides = array<i32: 2, 1>} : memref<18x128xf32, #tpu.memory_space<vmem>>, vector<8x128xf32>
    %c2_160 = arith.constant 2 : index
    %c0_161 = arith.constant 0 : index
    %237 = tpu.strided_load %arg14[%c2_160, %c0_161] {strides = array<i32: 2, 1>} : memref<18x128xf32, #tpu.memory_space<vmem>>, vector<8x128xf32>
    %238 = tpu.concatenate %235, %236, %237 in 1 : vector<8x128xf32>, vector<8x128xf32>, vector<8x128xf32> -> vector<8x384xf32>
    %239 = arith.truncf %238 : vector<8x384xf32> to vector<8x384xbf16>
    %c24_162 = arith.constant 24 : index
    %c384_163 = arith.constant 384 : index
    %240 = vector.load %arg13[%c24_162, %c384_163] : memref<64x1152xbf16, #tpu.memory_space<vmem>>, vector<8x384xbf16>
    tpu.vector_store %arg13[%c24_162, %c384_163], %239 {strides = array<i32>} : memref<64x1152xbf16, #tpu.memory_space<vmem>>, vector<8x384xbf16>,
    %c16_i32_164 = arith.constant 16 : i32
    %241 = arith.muli %arg1, %c16_i32_164 : i32
    %c8_i32 = arith.constant 8 : i32
    %242 = arith.addi %241, %c8_i32 : i32
    %c1_i32_165 = arith.constant 1 : i32
    %243 = arith.subi %242, %c1_i32_165 : i32
    %c0_i32_166 = arith.constant 0 : i32
    %244 = arith.cmpi sge, %243, %c0_i32_166 : i32
    %c16_i32_167 = arith.constant 16 : i32
    %245 = arith.cmpi slt, %243, %c16_i32_167 : i32
    %246 = arith.andi %244, %245 : i1
    %c0_i32_168 = arith.constant 0 : i32
    %c15_i32_169 = arith.constant 15 : i32
    %247 = arith.maxsi %c0_i32_168, %243 : i32
    %248 = arith.minsi %c15_i32_169, %247 : i32
    %c0_170 = arith.constant 0 : index
    %249 = arith.index_cast %248 : i32 to index
    %c0_171 = arith.constant 0 : index
    %c0_172 = arith.constant 0 : index
    %250 = vector.load %arg2[%c0_170, %249, %c0_171, %c0_172] : memref<1x16x16x128xbf16, #tpu.memory_space<vmem>>, vector<1x1x16x128xbf16>
    %251 = vector.shape_cast %250 : vector<1x1x16x128xbf16> to vector<16x128xbf16>
    %252 = arith.extf %251 : vector<16x128xbf16> to vector<16x128xf32>
    %253 = vector.broadcast %0 : vector<1x128xf32> to vector<16x128xf32>
    %254 = arith.mulf %252, %253 : vector<16x128xf32>
    %255 = vector.broadcast %1 : vector<1x128xf32> to vector<16x128xf32>
    %256 = arith.addf %254, %255 : vector<16x128xf32>
    %cst_173 = arith.constant 0.000000e+00 : f32
    %257 = vector.broadcast %cst_173 : f32 to vector<16x128xf32>
    %258 = arith.maximumf %256, %257 : vector<16x128xf32>
    %259 = arith.extui %246 : i1 to i32
    %260 = arith.sitofp %259 : i32 to f32
    %261 = vector.broadcast %260 : f32 to vector<16x128xf32>
    %262 = arith.mulf %258, %261 : vector<16x128xf32>
    %c1_174 = arith.constant 1 : index
    %c0_175 = arith.constant 0 : index
    %263 = vector.load %arg14[%c1_174, %c0_175] : memref<18x128xf32, #tpu.memory_space<vmem>>, vector<16x128xf32>
    tpu.vector_store %arg14[%c1_174, %c0_175], %262 {strides = array<i32>} : memref<18x128xf32, #tpu.memory_space<vmem>>, vector<16x128xf32>,
    %c0_176 = arith.constant 0 : index
    %c0_177 = arith.constant 0 : index
    %264 = tpu.strided_load %arg14[%c0_176, %c0_177] {strides = array<i32: 2, 1>} : memref<18x128xf32, #tpu.memory_space<vmem>>, vector<8x128xf32>
    %c1_178 = arith.constant 1 : index
    %c0_179 = arith.constant 0 : index
    %265 = tpu.strided_load %arg14[%c1_178, %c0_179] {strides = array<i32: 2, 1>} : memref<18x128xf32, #tpu.memory_space<vmem>>, vector<8x128xf32>
    %c2_180 = arith.constant 2 : index
    %c0_181 = arith.constant 0 : index
    %266 = tpu.strided_load %arg14[%c2_180, %c0_181] {strides = array<i32: 2, 1>} : memref<18x128xf32, #tpu.memory_space<vmem>>, vector<8x128xf32>
    %267 = tpu.concatenate %264, %265, %266 in 1 : vector<8x128xf32>, vector<8x128xf32>, vector<8x128xf32> -> vector<8x384xf32>
    %268 = arith.truncf %267 : vector<8x384xf32> to vector<8x384xbf16>
    %c32 = arith.constant 32 : index
    %c0_182 = arith.constant 0 : index
    %269 = vector.load %arg13[%c32, %c0_182] : memref<64x1152xbf16, #tpu.memory_space<vmem>>, vector<8x384xbf16>
    tpu.vector_store %arg13[%c32, %c0_182], %268 {strides = array<i32>} : memref<64x1152xbf16, #tpu.memory_space<vmem>>, vector<8x384xbf16>,
    %c24_183 = arith.constant 24 : index
    %c768_184 = arith.constant 768 : index
    %270 = vector.load %arg13[%c24_183, %c768_184] : memref<64x1152xbf16, #tpu.memory_space<vmem>>, vector<8x384xbf16>
    tpu.vector_store %arg13[%c24_183, %c768_184], %268 {strides = array<i32>} : memref<64x1152xbf16, #tpu.memory_space<vmem>>, vector<8x384xbf16>,
    %c16_i32_185 = arith.constant 16 : i32
    %271 = arith.muli %arg1, %c16_i32_185 : i32
    %c9_i32 = arith.constant 9 : i32
    %272 = arith.addi %271, %c9_i32 : i32
    %c1_i32_186 = arith.constant 1 : i32
    %273 = arith.subi %272, %c1_i32_186 : i32
    %c0_i32_187 = arith.constant 0 : i32
    %274 = arith.cmpi sge, %273, %c0_i32_187 : i32
    %c16_i32_188 = arith.constant 16 : i32
    %275 = arith.cmpi slt, %273, %c16_i32_188 : i32
    %276 = arith.andi %274, %275 : i1
    %c0_i32_189 = arith.constant 0 : i32
    %c15_i32_190 = arith.constant 15 : i32
    %277 = arith.maxsi %c0_i32_189, %273 : i32
    %278 = arith.minsi %c15_i32_190, %277 : i32
    %c0_191 = arith.constant 0 : index
    %279 = arith.index_cast %278 : i32 to index
    %c0_192 = arith.constant 0 : index
    %c0_193 = arith.constant 0 : index
    %280 = vector.load %arg2[%c0_191, %279, %c0_192, %c0_193] : memref<1x16x16x128xbf16, #tpu.memory_space<vmem>>, vector<1x1x16x128xbf16>
    %281 = vector.shape_cast %280 : vector<1x1x16x128xbf16> to vector<16x128xbf16>
    %282 = arith.extf %281 : vector<16x128xbf16> to vector<16x128xf32>
    %283 = vector.broadcast %0 : vector<1x128xf32> to vector<16x128xf32>
    %284 = arith.mulf %282, %283 : vector<16x128xf32>
    %285 = vector.broadcast %1 : vector<1x128xf32> to vector<16x128xf32>
    %286 = arith.addf %284, %285 : vector<16x128xf32>
    %cst_194 = arith.constant 0.000000e+00 : f32
    %287 = vector.broadcast %cst_194 : f32 to vector<16x128xf32>
    %288 = arith.maximumf %286, %287 : vector<16x128xf32>
    %289 = arith.extui %276 : i1 to i32
    %290 = arith.sitofp %289 : i32 to f32
    %291 = vector.broadcast %290 : f32 to vector<16x128xf32>
    %292 = arith.mulf %288, %291 : vector<16x128xf32>
    %c1_195 = arith.constant 1 : index
    %c0_196 = arith.constant 0 : index
    %293 = vector.load %arg14[%c1_195, %c0_196] : memref<18x128xf32, #tpu.memory_space<vmem>>, vector<16x128xf32>
    tpu.vector_store %arg14[%c1_195, %c0_196], %292 {strides = array<i32>} : memref<18x128xf32, #tpu.memory_space<vmem>>, vector<16x128xf32>,
    %c0_197 = arith.constant 0 : index
    %c0_198 = arith.constant 0 : index
    %294 = tpu.strided_load %arg14[%c0_197, %c0_198] {strides = array<i32: 2, 1>} : memref<18x128xf32, #tpu.memory_space<vmem>>, vector<8x128xf32>
    %c1_199 = arith.constant 1 : index
    %c0_200 = arith.constant 0 : index
    %295 = tpu.strided_load %arg14[%c1_199, %c0_200] {strides = array<i32: 2, 1>} : memref<18x128xf32, #tpu.memory_space<vmem>>, vector<8x128xf32>
    %c2_201 = arith.constant 2 : index
    %c0_202 = arith.constant 0 : index
    %296 = tpu.strided_load %arg14[%c2_201, %c0_202] {strides = array<i32: 2, 1>} : memref<18x128xf32, #tpu.memory_space<vmem>>, vector<8x128xf32>
    %297 = tpu.concatenate %294, %295, %296 in 1 : vector<8x128xf32>, vector<8x128xf32>, vector<8x128xf32> -> vector<8x384xf32>
    %298 = arith.truncf %297 : vector<8x384xf32> to vector<8x384xbf16>
    %c32_203 = arith.constant 32 : index
    %c384_204 = arith.constant 384 : index
    %299 = vector.load %arg13[%c32_203, %c384_204] : memref<64x1152xbf16, #tpu.memory_space<vmem>>, vector<8x384xbf16>
    tpu.vector_store %arg13[%c32_203, %c384_204], %298 {strides = array<i32>} : memref<64x1152xbf16, #tpu.memory_space<vmem>>, vector<8x384xbf16>,
    %c16_i32_205 = arith.constant 16 : i32
    %300 = arith.muli %arg1, %c16_i32_205 : i32
    %c10_i32 = arith.constant 10 : i32
    %301 = arith.addi %300, %c10_i32 : i32
    %c1_i32_206 = arith.constant 1 : i32
    %302 = arith.subi %301, %c1_i32_206 : i32
    %c0_i32_207 = arith.constant 0 : i32
    %303 = arith.cmpi sge, %302, %c0_i32_207 : i32
    %c16_i32_208 = arith.constant 16 : i32
    %304 = arith.cmpi slt, %302, %c16_i32_208 : i32
    %305 = arith.andi %303, %304 : i1
    %c0_i32_209 = arith.constant 0 : i32
    %c15_i32_210 = arith.constant 15 : i32
    %306 = arith.maxsi %c0_i32_209, %302 : i32
    %307 = arith.minsi %c15_i32_210, %306 : i32
    %c0_211 = arith.constant 0 : index
    %308 = arith.index_cast %307 : i32 to index
    %c0_212 = arith.constant 0 : index
    %c0_213 = arith.constant 0 : index
    %309 = vector.load %arg2[%c0_211, %308, %c0_212, %c0_213] : memref<1x16x16x128xbf16, #tpu.memory_space<vmem>>, vector<1x1x16x128xbf16>
    %310 = vector.shape_cast %309 : vector<1x1x16x128xbf16> to vector<16x128xbf16>
    %311 = arith.extf %310 : vector<16x128xbf16> to vector<16x128xf32>
    %312 = vector.broadcast %0 : vector<1x128xf32> to vector<16x128xf32>
    %313 = arith.mulf %311, %312 : vector<16x128xf32>
    %314 = vector.broadcast %1 : vector<1x128xf32> to vector<16x128xf32>
    %315 = arith.addf %313, %314 : vector<16x128xf32>
    %cst_214 = arith.constant 0.000000e+00 : f32
    %316 = vector.broadcast %cst_214 : f32 to vector<16x128xf32>
    %317 = arith.maximumf %315, %316 : vector<16x128xf32>
    %318 = arith.extui %305 : i1 to i32
    %319 = arith.sitofp %318 : i32 to f32
    %320 = vector.broadcast %319 : f32 to vector<16x128xf32>
    %321 = arith.mulf %317, %320 : vector<16x128xf32>
    %c1_215 = arith.constant 1 : index
    %c0_216 = arith.constant 0 : index
    %322 = vector.load %arg14[%c1_215, %c0_216] : memref<18x128xf32, #tpu.memory_space<vmem>>, vector<16x128xf32>
    tpu.vector_store %arg14[%c1_215, %c0_216], %321 {strides = array<i32>} : memref<18x128xf32, #tpu.memory_space<vmem>>, vector<16x128xf32>,
    %c0_217 = arith.constant 0 : index
    %c0_218 = arith.constant 0 : index
    %323 = tpu.strided_load %arg14[%c0_217, %c0_218] {strides = array<i32: 2, 1>} : memref<18x128xf32, #tpu.memory_space<vmem>>, vector<8x128xf32>
    %c1_219 = arith.constant 1 : index
    %c0_220 = arith.constant 0 : index
    %324 = tpu.strided_load %arg14[%c1_219, %c0_220] {strides = array<i32: 2, 1>} : memref<18x128xf32, #tpu.memory_space<vmem>>, vector<8x128xf32>
    %c2_221 = arith.constant 2 : index
    %c0_222 = arith.constant 0 : index
    %325 = tpu.strided_load %arg14[%c2_221, %c0_222] {strides = array<i32: 2, 1>} : memref<18x128xf32, #tpu.memory_space<vmem>>, vector<8x128xf32>
    %326 = tpu.concatenate %323, %324, %325 in 1 : vector<8x128xf32>, vector<8x128xf32>, vector<8x128xf32> -> vector<8x384xf32>
    %327 = arith.truncf %326 : vector<8x384xf32> to vector<8x384xbf16>
    %c40 = arith.constant 40 : index
    %c0_223 = arith.constant 0 : index
    %328 = vector.load %arg13[%c40, %c0_223] : memref<64x1152xbf16, #tpu.memory_space<vmem>>, vector<8x384xbf16>
    tpu.vector_store %arg13[%c40, %c0_223], %327 {strides = array<i32>} : memref<64x1152xbf16, #tpu.memory_space<vmem>>, vector<8x384xbf16>,
    %c32_224 = arith.constant 32 : index
    %c768_225 = arith.constant 768 : index
    %329 = vector.load %arg13[%c32_224, %c768_225] : memref<64x1152xbf16, #tpu.memory_space<vmem>>, vector<8x384xbf16>
    tpu.vector_store %arg13[%c32_224, %c768_225], %327 {strides = array<i32>} : memref<64x1152xbf16, #tpu.memory_space<vmem>>, vector<8x384xbf16>,
    %c16_i32_226 = arith.constant 16 : i32
    %330 = arith.muli %arg1, %c16_i32_226 : i32
    %c11_i32 = arith.constant 11 : i32
    %331 = arith.addi %330, %c11_i32 : i32
    %c1_i32_227 = arith.constant 1 : i32
    %332 = arith.subi %331, %c1_i32_227 : i32
    %c0_i32_228 = arith.constant 0 : i32
    %333 = arith.cmpi sge, %332, %c0_i32_228 : i32
    %c16_i32_229 = arith.constant 16 : i32
    %334 = arith.cmpi slt, %332, %c16_i32_229 : i32
    %335 = arith.andi %333, %334 : i1
    %c0_i32_230 = arith.constant 0 : i32
    %c15_i32_231 = arith.constant 15 : i32
    %336 = arith.maxsi %c0_i32_230, %332 : i32
    %337 = arith.minsi %c15_i32_231, %336 : i32
    %c0_232 = arith.constant 0 : index
    %338 = arith.index_cast %337 : i32 to index
    %c0_233 = arith.constant 0 : index
    %c0_234 = arith.constant 0 : index
    %339 = vector.load %arg2[%c0_232, %338, %c0_233, %c0_234] : memref<1x16x16x128xbf16, #tpu.memory_space<vmem>>, vector<1x1x16x128xbf16>
    %340 = vector.shape_cast %339 : vector<1x1x16x128xbf16> to vector<16x128xbf16>
    %341 = arith.extf %340 : vector<16x128xbf16> to vector<16x128xf32>
    %342 = vector.broadcast %0 : vector<1x128xf32> to vector<16x128xf32>
    %343 = arith.mulf %341, %342 : vector<16x128xf32>
    %344 = vector.broadcast %1 : vector<1x128xf32> to vector<16x128xf32>
    %345 = arith.addf %343, %344 : vector<16x128xf32>
    %cst_235 = arith.constant 0.000000e+00 : f32
    %346 = vector.broadcast %cst_235 : f32 to vector<16x128xf32>
    %347 = arith.maximumf %345, %346 : vector<16x128xf32>
    %348 = arith.extui %335 : i1 to i32
    %349 = arith.sitofp %348 : i32 to f32
    %350 = vector.broadcast %349 : f32 to vector<16x128xf32>
    %351 = arith.mulf %347, %350 : vector<16x128xf32>
    %c1_236 = arith.constant 1 : index
    %c0_237 = arith.constant 0 : index
    %352 = vector.load %arg14[%c1_236, %c0_237] : memref<18x128xf32, #tpu.memory_space<vmem>>, vector<16x128xf32>
    tpu.vector_store %arg14[%c1_236, %c0_237], %351 {strides = array<i32>} : memref<18x128xf32, #tpu.memory_space<vmem>>, vector<16x128xf32>,
    %c0_238 = arith.constant 0 : index
    %c0_239 = arith.constant 0 : index
    %353 = tpu.strided_load %arg14[%c0_238, %c0_239] {strides = array<i32: 2, 1>} : memref<18x128xf32, #tpu.memory_space<vmem>>, vector<8x128xf32>
    %c1_240 = arith.constant 1 : index
    %c0_241 = arith.constant 0 : index
    %354 = tpu.strided_load %arg14[%c1_240, %c0_241] {strides = array<i32: 2, 1>} : memref<18x128xf32, #tpu.memory_space<vmem>>, vector<8x128xf32>
    %c2_242 = arith.constant 2 : index
    %c0_243 = arith.constant 0 : index
    %355 = tpu.strided_load %arg14[%c2_242, %c0_243] {strides = array<i32: 2, 1>} : memref<18x128xf32, #tpu.memory_space<vmem>>, vector<8x128xf32>
    %356 = tpu.concatenate %353, %354, %355 in 1 : vector<8x128xf32>, vector<8x128xf32>, vector<8x128xf32> -> vector<8x384xf32>
    %357 = arith.truncf %356 : vector<8x384xf32> to vector<8x384xbf16>
    %c40_244 = arith.constant 40 : index
    %c384_245 = arith.constant 384 : index
    %358 = vector.load %arg13[%c40_244, %c384_245] : memref<64x1152xbf16, #tpu.memory_space<vmem>>, vector<8x384xbf16>
    tpu.vector_store %arg13[%c40_244, %c384_245], %357 {strides = array<i32>} : memref<64x1152xbf16, #tpu.memory_space<vmem>>, vector<8x384xbf16>,
    %c16_i32_246 = arith.constant 16 : i32
    %359 = arith.muli %arg1, %c16_i32_246 : i32
    %c12_i32 = arith.constant 12 : i32
    %360 = arith.addi %359, %c12_i32 : i32
    %c1_i32_247 = arith.constant 1 : i32
    %361 = arith.subi %360, %c1_i32_247 : i32
    %c0_i32_248 = arith.constant 0 : i32
    %362 = arith.cmpi sge, %361, %c0_i32_248 : i32
    %c16_i32_249 = arith.constant 16 : i32
    %363 = arith.cmpi slt, %361, %c16_i32_249 : i32
    %364 = arith.andi %362, %363 : i1
    %c0_i32_250 = arith.constant 0 : i32
    %c15_i32_251 = arith.constant 15 : i32
    %365 = arith.maxsi %c0_i32_250, %361 : i32
    %366 = arith.minsi %c15_i32_251, %365 : i32
    %c0_252 = arith.constant 0 : index
    %367 = arith.index_cast %366 : i32 to index
    %c0_253 = arith.constant 0 : index
    %c0_254 = arith.constant 0 : index
    %368 = vector.load %arg2[%c0_252, %367, %c0_253, %c0_254] : memref<1x16x16x128xbf16, #tpu.memory_space<vmem>>, vector<1x1x16x128xbf16>
    %369 = vector.shape_cast %368 : vector<1x1x16x128xbf16> to vector<16x128xbf16>
    %370 = arith.extf %369 : vector<16x128xbf16> to vector<16x128xf32>
    %371 = vector.broadcast %0 : vector<1x128xf32> to vector<16x128xf32>
    %372 = arith.mulf %370, %371 : vector<16x128xf32>
    %373 = vector.broadcast %1 : vector<1x128xf32> to vector<16x128xf32>
    %374 = arith.addf %372, %373 : vector<16x128xf32>
    %cst_255 = arith.constant 0.000000e+00 : f32
    %375 = vector.broadcast %cst_255 : f32 to vector<16x128xf32>
    %376 = arith.maximumf %374, %375 : vector<16x128xf32>
    %377 = arith.extui %364 : i1 to i32
    %378 = arith.sitofp %377 : i32 to f32
    %379 = vector.broadcast %378 : f32 to vector<16x128xf32>
    %380 = arith.mulf %376, %379 : vector<16x128xf32>
    %c1_256 = arith.constant 1 : index
    %c0_257 = arith.constant 0 : index
    %381 = vector.load %arg14[%c1_256, %c0_257] : memref<18x128xf32, #tpu.memory_space<vmem>>, vector<16x128xf32>
    tpu.vector_store %arg14[%c1_256, %c0_257], %380 {strides = array<i32>} : memref<18x128xf32, #tpu.memory_space<vmem>>, vector<16x128xf32>,
    %c0_258 = arith.constant 0 : index
    %c0_259 = arith.constant 0 : index
    %382 = tpu.strided_load %arg14[%c0_258, %c0_259] {strides = array<i32: 2, 1>} : memref<18x128xf32, #tpu.memory_space<vmem>>, vector<8x128xf32>
    %c1_260 = arith.constant 1 : index
    %c0_261 = arith.constant 0 : index
    %383 = tpu.strided_load %arg14[%c1_260, %c0_261] {strides = array<i32: 2, 1>} : memref<18x128xf32, #tpu.memory_space<vmem>>, vector<8x128xf32>
    %c2_262 = arith.constant 2 : index
    %c0_263 = arith.constant 0 : index
    %384 = tpu.strided_load %arg14[%c2_262, %c0_263] {strides = array<i32: 2, 1>} : memref<18x128xf32, #tpu.memory_space<vmem>>, vector<8x128xf32>
    %385 = tpu.concatenate %382, %383, %384 in 1 : vector<8x128xf32>, vector<8x128xf32>, vector<8x128xf32> -> vector<8x384xf32>
    %386 = arith.truncf %385 : vector<8x384xf32> to vector<8x384xbf16>
    %c48 = arith.constant 48 : index
    %c0_264 = arith.constant 0 : index
    %387 = vector.load %arg13[%c48, %c0_264] : memref<64x1152xbf16, #tpu.memory_space<vmem>>, vector<8x384xbf16>
    tpu.vector_store %arg13[%c48, %c0_264], %386 {strides = array<i32>} : memref<64x1152xbf16, #tpu.memory_space<vmem>>, vector<8x384xbf16>,
    %c40_265 = arith.constant 40 : index
    %c768_266 = arith.constant 768 : index
    %388 = vector.load %arg13[%c40_265, %c768_266] : memref<64x1152xbf16, #tpu.memory_space<vmem>>, vector<8x384xbf16>
    tpu.vector_store %arg13[%c40_265, %c768_266], %386 {strides = array<i32>} : memref<64x1152xbf16, #tpu.memory_space<vmem>>, vector<8x384xbf16>,
    %c16_i32_267 = arith.constant 16 : i32
    %389 = arith.muli %arg1, %c16_i32_267 : i32
    %c13_i32 = arith.constant 13 : i32
    %390 = arith.addi %389, %c13_i32 : i32
    %c1_i32_268 = arith.constant 1 : i32
    %391 = arith.subi %390, %c1_i32_268 : i32
    %c0_i32_269 = arith.constant 0 : i32
    %392 = arith.cmpi sge, %391, %c0_i32_269 : i32
    %c16_i32_270 = arith.constant 16 : i32
    %393 = arith.cmpi slt, %391, %c16_i32_270 : i32
    %394 = arith.andi %392, %393 : i1
    %c0_i32_271 = arith.constant 0 : i32
    %c15_i32_272 = arith.constant 15 : i32
    %395 = arith.maxsi %c0_i32_271, %391 : i32
    %396 = arith.minsi %c15_i32_272, %395 : i32
    %c0_273 = arith.constant 0 : index
    %397 = arith.index_cast %396 : i32 to index
    %c0_274 = arith.constant 0 : index
    %c0_275 = arith.constant 0 : index
    %398 = vector.load %arg2[%c0_273, %397, %c0_274, %c0_275] : memref<1x16x16x128xbf16, #tpu.memory_space<vmem>>, vector<1x1x16x128xbf16>
    %399 = vector.shape_cast %398 : vector<1x1x16x128xbf16> to vector<16x128xbf16>
    %400 = arith.extf %399 : vector<16x128xbf16> to vector<16x128xf32>
    %401 = vector.broadcast %0 : vector<1x128xf32> to vector<16x128xf32>
    %402 = arith.mulf %400, %401 : vector<16x128xf32>
    %403 = vector.broadcast %1 : vector<1x128xf32> to vector<16x128xf32>
    %404 = arith.addf %402, %403 : vector<16x128xf32>
    %cst_276 = arith.constant 0.000000e+00 : f32
    %405 = vector.broadcast %cst_276 : f32 to vector<16x128xf32>
    %406 = arith.maximumf %404, %405 : vector<16x128xf32>
    %407 = arith.extui %394 : i1 to i32
    %408 = arith.sitofp %407 : i32 to f32
    %409 = vector.broadcast %408 : f32 to vector<16x128xf32>
    %410 = arith.mulf %406, %409 : vector<16x128xf32>
    %c1_277 = arith.constant 1 : index
    %c0_278 = arith.constant 0 : index
    %411 = vector.load %arg14[%c1_277, %c0_278] : memref<18x128xf32, #tpu.memory_space<vmem>>, vector<16x128xf32>
    tpu.vector_store %arg14[%c1_277, %c0_278], %410 {strides = array<i32>} : memref<18x128xf32, #tpu.memory_space<vmem>>, vector<16x128xf32>,
    %c0_279 = arith.constant 0 : index
    %c0_280 = arith.constant 0 : index
    %412 = tpu.strided_load %arg14[%c0_279, %c0_280] {strides = array<i32: 2, 1>} : memref<18x128xf32, #tpu.memory_space<vmem>>, vector<8x128xf32>
    %c1_281 = arith.constant 1 : index
    %c0_282 = arith.constant 0 : index
    %413 = tpu.strided_load %arg14[%c1_281, %c0_282] {strides = array<i32: 2, 1>} : memref<18x128xf32, #tpu.memory_space<vmem>>, vector<8x128xf32>
    %c2_283 = arith.constant 2 : index
    %c0_284 = arith.constant 0 : index
    %414 = tpu.strided_load %arg14[%c2_283, %c0_284] {strides = array<i32: 2, 1>} : memref<18x128xf32, #tpu.memory_space<vmem>>, vector<8x128xf32>
    %415 = tpu.concatenate %412, %413, %414 in 1 : vector<8x128xf32>, vector<8x128xf32>, vector<8x128xf32> -> vector<8x384xf32>
    %416 = arith.truncf %415 : vector<8x384xf32> to vector<8x384xbf16>
    %c48_285 = arith.constant 48 : index
    %c384_286 = arith.constant 384 : index
    %417 = vector.load %arg13[%c48_285, %c384_286] : memref<64x1152xbf16, #tpu.memory_space<vmem>>, vector<8x384xbf16>
    tpu.vector_store %arg13[%c48_285, %c384_286], %416 {strides = array<i32>} : memref<64x1152xbf16, #tpu.memory_space<vmem>>, vector<8x384xbf16>,
    %c16_i32_287 = arith.constant 16 : i32
    %418 = arith.muli %arg1, %c16_i32_287 : i32
    %c14_i32 = arith.constant 14 : i32
    %419 = arith.addi %418, %c14_i32 : i32
    %c1_i32_288 = arith.constant 1 : i32
    %420 = arith.subi %419, %c1_i32_288 : i32
    %c0_i32_289 = arith.constant 0 : i32
    %421 = arith.cmpi sge, %420, %c0_i32_289 : i32
    %c16_i32_290 = arith.constant 16 : i32
    %422 = arith.cmpi slt, %420, %c16_i32_290 : i32
    %423 = arith.andi %421, %422 : i1
    %c0_i32_291 = arith.constant 0 : i32
    %c15_i32_292 = arith.constant 15 : i32
    %424 = arith.maxsi %c0_i32_291, %420 : i32
    %425 = arith.minsi %c15_i32_292, %424 : i32
    %c0_293 = arith.constant 0 : index
    %426 = arith.index_cast %425 : i32 to index
    %c0_294 = arith.constant 0 : index
    %c0_295 = arith.constant 0 : index
    %427 = vector.load %arg2[%c0_293, %426, %c0_294, %c0_295] : memref<1x16x16x128xbf16, #tpu.memory_space<vmem>>, vector<1x1x16x128xbf16>
    %428 = vector.shape_cast %427 : vector<1x1x16x128xbf16> to vector<16x128xbf16>
    %429 = arith.extf %428 : vector<16x128xbf16> to vector<16x128xf32>
    %430 = vector.broadcast %0 : vector<1x128xf32> to vector<16x128xf32>
    %431 = arith.mulf %429, %430 : vector<16x128xf32>
    %432 = vector.broadcast %1 : vector<1x128xf32> to vector<16x128xf32>
    %433 = arith.addf %431, %432 : vector<16x128xf32>
    %cst_296 = arith.constant 0.000000e+00 : f32
    %434 = vector.broadcast %cst_296 : f32 to vector<16x128xf32>
    %435 = arith.maximumf %433, %434 : vector<16x128xf32>
    %436 = arith.extui %423 : i1 to i32
    %437 = arith.sitofp %436 : i32 to f32
    %438 = vector.broadcast %437 : f32 to vector<16x128xf32>
    %439 = arith.mulf %435, %438 : vector<16x128xf32>
    %c1_297 = arith.constant 1 : index
    %c0_298 = arith.constant 0 : index
    %440 = vector.load %arg14[%c1_297, %c0_298] : memref<18x128xf32, #tpu.memory_space<vmem>>, vector<16x128xf32>
    tpu.vector_store %arg14[%c1_297, %c0_298], %439 {strides = array<i32>} : memref<18x128xf32, #tpu.memory_space<vmem>>, vector<16x128xf32>,
    %c0_299 = arith.constant 0 : index
    %c0_300 = arith.constant 0 : index
    %441 = tpu.strided_load %arg14[%c0_299, %c0_300] {strides = array<i32: 2, 1>} : memref<18x128xf32, #tpu.memory_space<vmem>>, vector<8x128xf32>
    %c1_301 = arith.constant 1 : index
    %c0_302 = arith.constant 0 : index
    %442 = tpu.strided_load %arg14[%c1_301, %c0_302] {strides = array<i32: 2, 1>} : memref<18x128xf32, #tpu.memory_space<vmem>>, vector<8x128xf32>
    %c2_303 = arith.constant 2 : index
    %c0_304 = arith.constant 0 : index
    %443 = tpu.strided_load %arg14[%c2_303, %c0_304] {strides = array<i32: 2, 1>} : memref<18x128xf32, #tpu.memory_space<vmem>>, vector<8x128xf32>
    %444 = tpu.concatenate %441, %442, %443 in 1 : vector<8x128xf32>, vector<8x128xf32>, vector<8x128xf32> -> vector<8x384xf32>
    %445 = arith.truncf %444 : vector<8x384xf32> to vector<8x384xbf16>
    %c56 = arith.constant 56 : index
    %c0_305 = arith.constant 0 : index
    %446 = vector.load %arg13[%c56, %c0_305] : memref<64x1152xbf16, #tpu.memory_space<vmem>>, vector<8x384xbf16>
    tpu.vector_store %arg13[%c56, %c0_305], %445 {strides = array<i32>} : memref<64x1152xbf16, #tpu.memory_space<vmem>>, vector<8x384xbf16>,
    %c48_306 = arith.constant 48 : index
    %c768_307 = arith.constant 768 : index
    %447 = vector.load %arg13[%c48_306, %c768_307] : memref<64x1152xbf16, #tpu.memory_space<vmem>>, vector<8x384xbf16>
    tpu.vector_store %arg13[%c48_306, %c768_307], %445 {strides = array<i32>} : memref<64x1152xbf16, #tpu.memory_space<vmem>>, vector<8x384xbf16>,
    %c16_i32_308 = arith.constant 16 : i32
    %448 = arith.muli %arg1, %c16_i32_308 : i32
    %c15_i32_309 = arith.constant 15 : i32
    %449 = arith.addi %448, %c15_i32_309 : i32
    %c1_i32_310 = arith.constant 1 : i32
    %450 = arith.subi %449, %c1_i32_310 : i32
    %c0_i32_311 = arith.constant 0 : i32
    %451 = arith.cmpi sge, %450, %c0_i32_311 : i32
    %c16_i32_312 = arith.constant 16 : i32
    %452 = arith.cmpi slt, %450, %c16_i32_312 : i32
    %453 = arith.andi %451, %452 : i1
    %c0_i32_313 = arith.constant 0 : i32
    %c15_i32_314 = arith.constant 15 : i32
    %454 = arith.maxsi %c0_i32_313, %450 : i32
    %455 = arith.minsi %c15_i32_314, %454 : i32
    %c0_315 = arith.constant 0 : index
    %456 = arith.index_cast %455 : i32 to index
    %c0_316 = arith.constant 0 : index
    %c0_317 = arith.constant 0 : index
    %457 = vector.load %arg2[%c0_315, %456, %c0_316, %c0_317] : memref<1x16x16x128xbf16, #tpu.memory_space<vmem>>, vector<1x1x16x128xbf16>
    %458 = vector.shape_cast %457 : vector<1x1x16x128xbf16> to vector<16x128xbf16>
    %459 = arith.extf %458 : vector<16x128xbf16> to vector<16x128xf32>
    %460 = vector.broadcast %0 : vector<1x128xf32> to vector<16x128xf32>
    %461 = arith.mulf %459, %460 : vector<16x128xf32>
    %462 = vector.broadcast %1 : vector<1x128xf32> to vector<16x128xf32>
    %463 = arith.addf %461, %462 : vector<16x128xf32>
    %cst_318 = arith.constant 0.000000e+00 : f32
    %464 = vector.broadcast %cst_318 : f32 to vector<16x128xf32>
    %465 = arith.maximumf %463, %464 : vector<16x128xf32>
    %466 = arith.extui %453 : i1 to i32
    %467 = arith.sitofp %466 : i32 to f32
    %468 = vector.broadcast %467 : f32 to vector<16x128xf32>
    %469 = arith.mulf %465, %468 : vector<16x128xf32>
    %c1_319 = arith.constant 1 : index
    %c0_320 = arith.constant 0 : index
    %470 = vector.load %arg14[%c1_319, %c0_320] : memref<18x128xf32, #tpu.memory_space<vmem>>, vector<16x128xf32>
    tpu.vector_store %arg14[%c1_319, %c0_320], %469 {strides = array<i32>} : memref<18x128xf32, #tpu.memory_space<vmem>>, vector<16x128xf32>,
    %c0_321 = arith.constant 0 : index
    %c0_322 = arith.constant 0 : index
    %471 = tpu.strided_load %arg14[%c0_321, %c0_322] {strides = array<i32: 2, 1>} : memref<18x128xf32, #tpu.memory_space<vmem>>, vector<8x128xf32>
    %c1_323 = arith.constant 1 : index
    %c0_324 = arith.constant 0 : index
    %472 = tpu.strided_load %arg14[%c1_323, %c0_324] {strides = array<i32: 2, 1>} : memref<18x128xf32, #tpu.memory_space<vmem>>, vector<8x128xf32>
    %c2_325 = arith.constant 2 : index
    %c0_326 = arith.constant 0 : index
    %473 = tpu.strided_load %arg14[%c2_325, %c0_326] {strides = array<i32: 2, 1>} : memref<18x128xf32, #tpu.memory_space<vmem>>, vector<8x128xf32>
    %474 = tpu.concatenate %471, %472, %473 in 1 : vector<8x128xf32>, vector<8x128xf32>, vector<8x128xf32> -> vector<8x384xf32>
    %475 = arith.truncf %474 : vector<8x384xf32> to vector<8x384xbf16>
    %c56_327 = arith.constant 56 : index
    %c384_328 = arith.constant 384 : index
    %476 = vector.load %arg13[%c56_327, %c384_328] : memref<64x1152xbf16, #tpu.memory_space<vmem>>, vector<8x384xbf16>
    tpu.vector_store %arg13[%c56_327, %c384_328], %475 {strides = array<i32>} : memref<64x1152xbf16, #tpu.memory_space<vmem>>, vector<8x384xbf16>,
    %c16_i32_329 = arith.constant 16 : i32
    %477 = arith.muli %arg1, %c16_i32_329 : i32
    %c16_i32_330 = arith.constant 16 : i32
    %478 = arith.addi %477, %c16_i32_330 : i32
    %c1_i32_331 = arith.constant 1 : i32
    %479 = arith.subi %478, %c1_i32_331 : i32
    %c0_i32_332 = arith.constant 0 : i32
    %480 = arith.cmpi sge, %479, %c0_i32_332 : i32
    %c16_i32_333 = arith.constant 16 : i32
    %481 = arith.cmpi slt, %479, %c16_i32_333 : i32
    %482 = arith.andi %480, %481 : i1
    %c0_i32_334 = arith.constant 0 : i32
    %c15_i32_335 = arith.constant 15 : i32
    %483 = arith.maxsi %c0_i32_334, %479 : i32
    %484 = arith.minsi %c15_i32_335, %483 : i32
    %c0_336 = arith.constant 0 : index
    %485 = arith.index_cast %484 : i32 to index
    %c0_337 = arith.constant 0 : index
    %c0_338 = arith.constant 0 : index
    %486 = vector.load %arg2[%c0_336, %485, %c0_337, %c0_338] : memref<1x16x16x128xbf16, #tpu.memory_space<vmem>>, vector<1x1x16x128xbf16>
    %487 = vector.shape_cast %486 : vector<1x1x16x128xbf16> to vector<16x128xbf16>
    %488 = arith.extf %487 : vector<16x128xbf16> to vector<16x128xf32>
    %489 = vector.broadcast %0 : vector<1x128xf32> to vector<16x128xf32>
    %490 = arith.mulf %488, %489 : vector<16x128xf32>
    %491 = vector.broadcast %1 : vector<1x128xf32> to vector<16x128xf32>
    %492 = arith.addf %490, %491 : vector<16x128xf32>
    %cst_339 = arith.constant 0.000000e+00 : f32
    %493 = vector.broadcast %cst_339 : f32 to vector<16x128xf32>
    %494 = arith.maximumf %492, %493 : vector<16x128xf32>
    %495 = arith.extui %482 : i1 to i32
    %496 = arith.sitofp %495 : i32 to f32
    %497 = vector.broadcast %496 : f32 to vector<16x128xf32>
    %498 = arith.mulf %494, %497 : vector<16x128xf32>
    %c1_340 = arith.constant 1 : index
    %c0_341 = arith.constant 0 : index
    %499 = vector.load %arg14[%c1_340, %c0_341] : memref<18x128xf32, #tpu.memory_space<vmem>>, vector<16x128xf32>
    tpu.vector_store %arg14[%c1_340, %c0_341], %498 {strides = array<i32>} : memref<18x128xf32, #tpu.memory_space<vmem>>, vector<16x128xf32>,
    %c0_342 = arith.constant 0 : index
    %c0_343 = arith.constant 0 : index
    %500 = tpu.strided_load %arg14[%c0_342, %c0_343] {strides = array<i32: 2, 1>} : memref<18x128xf32, #tpu.memory_space<vmem>>, vector<8x128xf32>
    %c1_344 = arith.constant 1 : index
    %c0_345 = arith.constant 0 : index
    %501 = tpu.strided_load %arg14[%c1_344, %c0_345] {strides = array<i32: 2, 1>} : memref<18x128xf32, #tpu.memory_space<vmem>>, vector<8x128xf32>
    %c2_346 = arith.constant 2 : index
    %c0_347 = arith.constant 0 : index
    %502 = tpu.strided_load %arg14[%c2_346, %c0_347] {strides = array<i32: 2, 1>} : memref<18x128xf32, #tpu.memory_space<vmem>>, vector<8x128xf32>
    %503 = tpu.concatenate %500, %501, %502 in 1 : vector<8x128xf32>, vector<8x128xf32>, vector<8x128xf32> -> vector<8x384xf32>
    %504 = arith.truncf %503 : vector<8x384xf32> to vector<8x384xbf16>
    %c56_348 = arith.constant 56 : index
    %c768_349 = arith.constant 768 : index
    %505 = vector.load %arg13[%c56_348, %c768_349] : memref<64x1152xbf16, #tpu.memory_space<vmem>>, vector<8x384xbf16>
    tpu.vector_store %arg13[%c56_348, %c768_349], %504 {strides = array<i32>} : memref<64x1152xbf16, #tpu.memory_space<vmem>>, vector<8x384xbf16>,
    %c0_350 = arith.constant 0 : index
    %c0_351 = arith.constant 0 : index
    %506 = vector.load %arg13[%c0_350, %c0_351] : memref<64x1152xbf16, #tpu.memory_space<vmem>>, vector<64x1152xbf16>
    %c0_352 = arith.constant 0 : index
    %c0_353 = arith.constant 0 : index
    %507 = vector.load %arg5[%c0_352, %c0_353] : memref<1152x128xbf16, #tpu.memory_space<vmem>>, vector<1152x128xbf16>
    %cst_354 = arith.constant dense<0.000000e+00> : vector<64x128xf32>
    %508 = tpu.matmul %506, %507, %cst_354 {dimension_numbers = #tpu.dot_dimension_numbers<[1], [0], [0], [1], [0, 0, 1, 1], [], []>} : vector<64x1152xbf16>, vector<1152x128xbf16>, vector<64x128xf32> -> vector<64x128xf32>
    %509 = vector.shape_cast %508 : vector<64x128xf32> to vector<8x8x128xf32>
    %510 = arith.truncf %509 : vector<8x8x128xf32> to vector<8x8x128xbf16>
    %c0_355 = arith.constant 0 : index
    %c0_356 = arith.constant 0 : index
    %c0_357 = arith.constant 0 : index
    %c0_358 = arith.constant 0 : index
    %511 = vector.load %arg10[%c0_355, %c0_356, %c0_357, %c0_358] : memref<1x8x8x128xbf16, #tpu.memory_space<vmem>>, vector<1x8x8x128xbf16>
    %512 = vector.shape_cast %511 : vector<1x8x8x128xbf16> to vector<8x8x128xbf16>
    %513 = vector.shape_cast %510 : vector<8x8x128xbf16> to vector<1x8x8x128xbf16>
    tpu.vector_store %arg10[%c0_355, %c0_356, %c0_357, %c0_358], %513 {strides = array<i32>} : memref<1x8x8x128xbf16, #tpu.memory_space<vmem>>, vector<1x8x8x128xbf16>,
    %cst_359 = arith.constant dense<0.000000e+00> : vector<128xf32>
    %514 = vector.multi_reduction <add>, %508, %cst_359 [0] : vector<64x128xf32> to vector<128xf32>
    %515 = vector.shape_cast %514 : vector<128xf32> to vector<1x128xf32>
    %c0_360 = arith.constant 0 : index
    %c0_361 = arith.constant 0 : index
    %c0_362 = arith.constant 0 : index
    %c0_363 = arith.constant 0 : index
    %516 = vector.load %arg12[%c0_360, %c0_361, %c0_362, %c0_363] : memref<1x1x8x128xf32, #tpu.memory_space<vmem>>, vector<1x1x1x128xf32>
    %517 = vector.shape_cast %516 : vector<1x1x1x128xf32> to vector<1x128xf32>
    %518 = vector.shape_cast %515 : vector<1x128xf32> to vector<1x1x1x128xf32>
    tpu.vector_store %arg12[%c0_360, %c0_361, %c0_362, %c0_363], %518 {strides = array<i32>} : memref<1x1x8x128xf32, #tpu.memory_space<vmem>>, vector<1x1x1x128xf32>,
    %519 = arith.mulf %508, %508 : vector<64x128xf32>
    %cst_364 = arith.constant dense<0.000000e+00> : vector<128xf32>
    %520 = vector.multi_reduction <add>, %519, %cst_364 [0] : vector<64x128xf32> to vector<128xf32>
    %521 = vector.shape_cast %520 : vector<128xf32> to vector<1x128xf32>
    %c0_365 = arith.constant 0 : index
    %c0_366 = arith.constant 0 : index
    %c1_367 = arith.constant 1 : index
    %c0_368 = arith.constant 0 : index
    %522 = vector.load %arg12[%c0_365, %c0_366, %c1_367, %c0_368] : memref<1x1x8x128xf32, #tpu.memory_space<vmem>>, vector<1x1x1x128xf32>
    %523 = vector.shape_cast %522 : vector<1x1x1x128xf32> to vector<1x128xf32>
    %524 = vector.shape_cast %521 : vector<1x128xf32> to vector<1x1x1x128xf32>
    tpu.vector_store %arg12[%c0_365, %c0_366, %c1_367, %c0_368], %524 {strides = array<i32>} : memref<1x1x8x128xf32, #tpu.memory_space<vmem>>, vector<1x1x1x128xf32>,
    %cst_369 = arith.constant 0.000000e+00 : f32
    %525 = vector.broadcast %cst_369 : f32 to vector<6x128xf32>
    %c0_370 = arith.constant 0 : index
    %c0_371 = arith.constant 0 : index
    %c2_372 = arith.constant 2 : index
    %c0_373 = arith.constant 0 : index
    %526 = vector.load %arg12[%c0_370, %c0_371, %c2_372, %c0_373] : memref<1x1x8x128xf32, #tpu.memory_space<vmem>>, vector<1x1x6x128xf32>
    %527 = vector.shape_cast %526 : vector<1x1x6x128xf32> to vector<6x128xf32>
    %528 = vector.shape_cast %525 : vector<6x128xf32> to vector<1x1x6x128xf32>
    tpu.vector_store %arg12[%c0_370, %c0_371, %c2_372, %c0_373], %528 {strides = array<i32>} : memref<1x1x8x128xf32, #tpu.memory_space<vmem>>, vector<1x1x6x128xf32>,
    %c0_374 = arith.constant 0 : index
    %c0_375 = arith.constant 0 : index
    %529 = vector.load %arg7[%c0_374, %c0_375] : memref<1x128xf32, #tpu.memory_space<vmem>>, vector<1x128xf32>
    %c0_376 = arith.constant 0 : index
    %c0_377 = arith.constant 0 : index
    %530 = vector.load %arg8[%c0_376, %c0_377] : memref<1x128xf32, #tpu.memory_space<vmem>>, vector<1x128xf32>
    %c8_i32_378 = arith.constant 8 : i32
    %531 = arith.muli %arg1, %c8_i32_378 : i32
    %c0_i32_379 = arith.constant 0 : i32
    %532 = arith.addi %531, %c0_i32_379 : i32
    %c2_i32_380 = arith.constant 2 : i32
    %533 = arith.muli %532, %c2_i32_380 : i32
    %c0_381 = arith.constant 0 : index
    %534 = arith.index_cast %533 : i32 to index
    %c0_382 = arith.constant 0 : index
    %c0_383 = arith.constant 0 : index
    %535 = vector.load %arg6[%c0_381, %534, %c0_382, %c0_383] : memref<1x16x16x128xf32, #tpu.memory_space<vmem>>, vector<1x1x16x128xf32>
    %536 = vector.shape_cast %535 : vector<1x1x16x128xf32> to vector<16x128xf32>
    %537 = vector.broadcast %529 : vector<1x128xf32> to vector<16x128xf32>
    %538 = arith.mulf %536, %537 : vector<16x128xf32>
    %539 = vector.broadcast %530 : vector<1x128xf32> to vector<16x128xf32>
    %540 = arith.addf %538, %539 : vector<16x128xf32>
    %cst_384 = arith.constant 0.000000e+00 : f32
    %541 = vector.broadcast %cst_384 : f32 to vector<16x128xf32>
    %542 = arith.maximumf %540, %541 : vector<16x128xf32>
    %c0_385 = arith.constant 0 : index
    %c0_386 = arith.constant 0 : index
    %543 = vector.load %arg16[%c0_385, %c0_386] : memref<16x128xf32, #tpu.memory_space<vmem>>, vector<16x128xf32>
    tpu.vector_store %arg16[%c0_385, %c0_386], %542 {strides = array<i32>} : memref<16x128xf32, #tpu.memory_space<vmem>>, vector<16x128xf32>,
    %c0_387 = arith.constant 0 : index
    %c0_388 = arith.constant 0 : index
    %544 = tpu.strided_load %arg16[%c0_387, %c0_388] {strides = array<i32: 2, 1>} : memref<16x128xf32, #tpu.memory_space<vmem>>, vector<8x128xf32>
    %545 = arith.truncf %544 : vector<8x128xf32> to vector<8x128xbf16>
    %c0_389 = arith.constant 0 : index
    %c0_390 = arith.constant 0 : index
    %546 = vector.load %arg15[%c0_389, %c0_390] : memref<64x128xbf16, #tpu.memory_space<vmem>>, vector<8x128xbf16>
    tpu.vector_store %arg15[%c0_389, %c0_390], %545 {strides = array<i32>} : memref<64x128xbf16, #tpu.memory_space<vmem>>, vector<8x128xbf16>,
    %c8_i32_391 = arith.constant 8 : i32
    %547 = arith.muli %arg1, %c8_i32_391 : i32
    %c1_i32_392 = arith.constant 1 : i32
    %548 = arith.addi %547, %c1_i32_392 : i32
    %c2_i32_393 = arith.constant 2 : i32
    %549 = arith.muli %548, %c2_i32_393 : i32
    %c0_394 = arith.constant 0 : index
    %550 = arith.index_cast %549 : i32 to index
    %c0_395 = arith.constant 0 : index
    %c0_396 = arith.constant 0 : index
    %551 = vector.load %arg6[%c0_394, %550, %c0_395, %c0_396] : memref<1x16x16x128xf32, #tpu.memory_space<vmem>>, vector<1x1x16x128xf32>
    %552 = vector.shape_cast %551 : vector<1x1x16x128xf32> to vector<16x128xf32>
    %553 = vector.broadcast %529 : vector<1x128xf32> to vector<16x128xf32>
    %554 = arith.mulf %552, %553 : vector<16x128xf32>
    %555 = vector.broadcast %530 : vector<1x128xf32> to vector<16x128xf32>
    %556 = arith.addf %554, %555 : vector<16x128xf32>
    %cst_397 = arith.constant 0.000000e+00 : f32
    %557 = vector.broadcast %cst_397 : f32 to vector<16x128xf32>
    %558 = arith.maximumf %556, %557 : vector<16x128xf32>
    %c0_398 = arith.constant 0 : index
    %c0_399 = arith.constant 0 : index
    %559 = vector.load %arg16[%c0_398, %c0_399] : memref<16x128xf32, #tpu.memory_space<vmem>>, vector<16x128xf32>
    tpu.vector_store %arg16[%c0_398, %c0_399], %558 {strides = array<i32>} : memref<16x128xf32, #tpu.memory_space<vmem>>, vector<16x128xf32>,
    %c0_400 = arith.constant 0 : index
    %c0_401 = arith.constant 0 : index
    %560 = tpu.strided_load %arg16[%c0_400, %c0_401] {strides = array<i32: 2, 1>} : memref<16x128xf32, #tpu.memory_space<vmem>>, vector<8x128xf32>
    %561 = arith.truncf %560 : vector<8x128xf32> to vector<8x128xbf16>
    %c8_402 = arith.constant 8 : index
    %c0_403 = arith.constant 0 : index
    %562 = vector.load %arg15[%c8_402, %c0_403] : memref<64x128xbf16, #tpu.memory_space<vmem>>, vector<8x128xbf16>
    tpu.vector_store %arg15[%c8_402, %c0_403], %561 {strides = array<i32>} : memref<64x128xbf16, #tpu.memory_space<vmem>>, vector<8x128xbf16>,
    %c8_i32_404 = arith.constant 8 : i32
    %563 = arith.muli %arg1, %c8_i32_404 : i32
    %c2_i32_405 = arith.constant 2 : i32
    %564 = arith.addi %563, %c2_i32_405 : i32
    %c2_i32_406 = arith.constant 2 : i32
    %565 = arith.muli %564, %c2_i32_406 : i32
    %c0_407 = arith.constant 0 : index
    %566 = arith.index_cast %565 : i32 to index
    %c0_408 = arith.constant 0 : index
    %c0_409 = arith.constant 0 : index
    %567 = vector.load %arg6[%c0_407, %566, %c0_408, %c0_409] : memref<1x16x16x128xf32, #tpu.memory_space<vmem>>, vector<1x1x16x128xf32>
    %568 = vector.shape_cast %567 : vector<1x1x16x128xf32> to vector<16x128xf32>
    %569 = vector.broadcast %529 : vector<1x128xf32> to vector<16x128xf32>
    %570 = arith.mulf %568, %569 : vector<16x128xf32>
    %571 = vector.broadcast %530 : vector<1x128xf32> to vector<16x128xf32>
    %572 = arith.addf %570, %571 : vector<16x128xf32>
    %cst_410 = arith.constant 0.000000e+00 : f32
    %573 = vector.broadcast %cst_410 : f32 to vector<16x128xf32>
    %574 = arith.maximumf %572, %573 : vector<16x128xf32>
    %c0_411 = arith.constant 0 : index
    %c0_412 = arith.constant 0 : index
    %575 = vector.load %arg16[%c0_411, %c0_412] : memref<16x128xf32, #tpu.memory_space<vmem>>, vector<16x128xf32>
    tpu.vector_store %arg16[%c0_411, %c0_412], %574 {strides = array<i32>} : memref<16x128xf32, #tpu.memory_space<vmem>>, vector<16x128xf32>,
    %c0_413 = arith.constant 0 : index
    %c0_414 = arith.constant 0 : index
    %576 = tpu.strided_load %arg16[%c0_413, %c0_414] {strides = array<i32: 2, 1>} : memref<16x128xf32, #tpu.memory_space<vmem>>, vector<8x128xf32>
    %577 = arith.truncf %576 : vector<8x128xf32> to vector<8x128xbf16>
    %c16_415 = arith.constant 16 : index
    %c0_416 = arith.constant 0 : index
    %578 = vector.load %arg15[%c16_415, %c0_416] : memref<64x128xbf16, #tpu.memory_space<vmem>>, vector<8x128xbf16>
    tpu.vector_store %arg15[%c16_415, %c0_416], %577 {strides = array<i32>} : memref<64x128xbf16, #tpu.memory_space<vmem>>, vector<8x128xbf16>,
    %c8_i32_417 = arith.constant 8 : i32
    %579 = arith.muli %arg1, %c8_i32_417 : i32
    %c3_i32_418 = arith.constant 3 : i32
    %580 = arith.addi %579, %c3_i32_418 : i32
    %c2_i32_419 = arith.constant 2 : i32
    %581 = arith.muli %580, %c2_i32_419 : i32
    %c0_420 = arith.constant 0 : index
    %582 = arith.index_cast %581 : i32 to index
    %c0_421 = arith.constant 0 : index
    %c0_422 = arith.constant 0 : index
    %583 = vector.load %arg6[%c0_420, %582, %c0_421, %c0_422] : memref<1x16x16x128xf32, #tpu.memory_space<vmem>>, vector<1x1x16x128xf32>
    %584 = vector.shape_cast %583 : vector<1x1x16x128xf32> to vector<16x128xf32>
    %585 = vector.broadcast %529 : vector<1x128xf32> to vector<16x128xf32>
    %586 = arith.mulf %584, %585 : vector<16x128xf32>
    %587 = vector.broadcast %530 : vector<1x128xf32> to vector<16x128xf32>
    %588 = arith.addf %586, %587 : vector<16x128xf32>
    %cst_423 = arith.constant 0.000000e+00 : f32
    %589 = vector.broadcast %cst_423 : f32 to vector<16x128xf32>
    %590 = arith.maximumf %588, %589 : vector<16x128xf32>
    %c0_424 = arith.constant 0 : index
    %c0_425 = arith.constant 0 : index
    %591 = vector.load %arg16[%c0_424, %c0_425] : memref<16x128xf32, #tpu.memory_space<vmem>>, vector<16x128xf32>
    tpu.vector_store %arg16[%c0_424, %c0_425], %590 {strides = array<i32>} : memref<16x128xf32, #tpu.memory_space<vmem>>, vector<16x128xf32>,
    %c0_426 = arith.constant 0 : index
    %c0_427 = arith.constant 0 : index
    %592 = tpu.strided_load %arg16[%c0_426, %c0_427] {strides = array<i32: 2, 1>} : memref<16x128xf32, #tpu.memory_space<vmem>>, vector<8x128xf32>
    %593 = arith.truncf %592 : vector<8x128xf32> to vector<8x128xbf16>
    %c24_428 = arith.constant 24 : index
    %c0_429 = arith.constant 0 : index
    %594 = vector.load %arg15[%c24_428, %c0_429] : memref<64x128xbf16, #tpu.memory_space<vmem>>, vector<8x128xbf16>
    tpu.vector_store %arg15[%c24_428, %c0_429], %593 {strides = array<i32>} : memref<64x128xbf16, #tpu.memory_space<vmem>>, vector<8x128xbf16>,
    %c8_i32_430 = arith.constant 8 : i32
    %595 = arith.muli %arg1, %c8_i32_430 : i32
    %c4_i32_431 = arith.constant 4 : i32
    %596 = arith.addi %595, %c4_i32_431 : i32
    %c2_i32_432 = arith.constant 2 : i32
    %597 = arith.muli %596, %c2_i32_432 : i32
    %c0_433 = arith.constant 0 : index
    %598 = arith.index_cast %597 : i32 to index
    %c0_434 = arith.constant 0 : index
    %c0_435 = arith.constant 0 : index
    %599 = vector.load %arg6[%c0_433, %598, %c0_434, %c0_435] : memref<1x16x16x128xf32, #tpu.memory_space<vmem>>, vector<1x1x16x128xf32>
    %600 = vector.shape_cast %599 : vector<1x1x16x128xf32> to vector<16x128xf32>
    %601 = vector.broadcast %529 : vector<1x128xf32> to vector<16x128xf32>
    %602 = arith.mulf %600, %601 : vector<16x128xf32>
    %603 = vector.broadcast %530 : vector<1x128xf32> to vector<16x128xf32>
    %604 = arith.addf %602, %603 : vector<16x128xf32>
    %cst_436 = arith.constant 0.000000e+00 : f32
    %605 = vector.broadcast %cst_436 : f32 to vector<16x128xf32>
    %606 = arith.maximumf %604, %605 : vector<16x128xf32>
    %c0_437 = arith.constant 0 : index
    %c0_438 = arith.constant 0 : index
    %607 = vector.load %arg16[%c0_437, %c0_438] : memref<16x128xf32, #tpu.memory_space<vmem>>, vector<16x128xf32>
    tpu.vector_store %arg16[%c0_437, %c0_438], %606 {strides = array<i32>} : memref<16x128xf32, #tpu.memory_space<vmem>>, vector<16x128xf32>,
    %c0_439 = arith.constant 0 : index
    %c0_440 = arith.constant 0 : index
    %608 = tpu.strided_load %arg16[%c0_439, %c0_440] {strides = array<i32: 2, 1>} : memref<16x128xf32, #tpu.memory_space<vmem>>, vector<8x128xf32>
    %609 = arith.truncf %608 : vector<8x128xf32> to vector<8x128xbf16>
    %c32_441 = arith.constant 32 : index
    %c0_442 = arith.constant 0 : index
    %610 = vector.load %arg15[%c32_441, %c0_442] : memref<64x128xbf16, #tpu.memory_space<vmem>>, vector<8x128xbf16>
    tpu.vector_store %arg15[%c32_441, %c0_442], %609 {strides = array<i32>} : memref<64x128xbf16, #tpu.memory_space<vmem>>, vector<8x128xbf16>,
    %c8_i32_443 = arith.constant 8 : i32
    %611 = arith.muli %arg1, %c8_i32_443 : i32
    %c5_i32_444 = arith.constant 5 : i32
    %612 = arith.addi %611, %c5_i32_444 : i32
    %c2_i32_445 = arith.constant 2 : i32
    %613 = arith.muli %612, %c2_i32_445 : i32
    %c0_446 = arith.constant 0 : index
    %614 = arith.index_cast %613 : i32 to index
    %c0_447 = arith.constant 0 : index
    %c0_448 = arith.constant 0 : index
    %615 = vector.load %arg6[%c0_446, %614, %c0_447, %c0_448] : memref<1x16x16x128xf32, #tpu.memory_space<vmem>>, vector<1x1x16x128xf32>
    %616 = vector.shape_cast %615 : vector<1x1x16x128xf32> to vector<16x128xf32>
    %617 = vector.broadcast %529 : vector<1x128xf32> to vector<16x128xf32>
    %618 = arith.mulf %616, %617 : vector<16x128xf32>
    %619 = vector.broadcast %530 : vector<1x128xf32> to vector<16x128xf32>
    %620 = arith.addf %618, %619 : vector<16x128xf32>
    %cst_449 = arith.constant 0.000000e+00 : f32
    %621 = vector.broadcast %cst_449 : f32 to vector<16x128xf32>
    %622 = arith.maximumf %620, %621 : vector<16x128xf32>
    %c0_450 = arith.constant 0 : index
    %c0_451 = arith.constant 0 : index
    %623 = vector.load %arg16[%c0_450, %c0_451] : memref<16x128xf32, #tpu.memory_space<vmem>>, vector<16x128xf32>
    tpu.vector_store %arg16[%c0_450, %c0_451], %622 {strides = array<i32>} : memref<16x128xf32, #tpu.memory_space<vmem>>, vector<16x128xf32>,
    %c0_452 = arith.constant 0 : index
    %c0_453 = arith.constant 0 : index
    %624 = tpu.strided_load %arg16[%c0_452, %c0_453] {strides = array<i32: 2, 1>} : memref<16x128xf32, #tpu.memory_space<vmem>>, vector<8x128xf32>
    %625 = arith.truncf %624 : vector<8x128xf32> to vector<8x128xbf16>
    %c40_454 = arith.constant 40 : index
    %c0_455 = arith.constant 0 : index
    %626 = vector.load %arg15[%c40_454, %c0_455] : memref<64x128xbf16, #tpu.memory_space<vmem>>, vector<8x128xbf16>
    tpu.vector_store %arg15[%c40_454, %c0_455], %625 {strides = array<i32>} : memref<64x128xbf16, #tpu.memory_space<vmem>>, vector<8x128xbf16>,
    %c8_i32_456 = arith.constant 8 : i32
    %627 = arith.muli %arg1, %c8_i32_456 : i32
    %c6_i32_457 = arith.constant 6 : i32
    %628 = arith.addi %627, %c6_i32_457 : i32
    %c2_i32_458 = arith.constant 2 : i32
    %629 = arith.muli %628, %c2_i32_458 : i32
    %c0_459 = arith.constant 0 : index
    %630 = arith.index_cast %629 : i32 to index
    %c0_460 = arith.constant 0 : index
    %c0_461 = arith.constant 0 : index
    %631 = vector.load %arg6[%c0_459, %630, %c0_460, %c0_461] : memref<1x16x16x128xf32, #tpu.memory_space<vmem>>, vector<1x1x16x128xf32>
    %632 = vector.shape_cast %631 : vector<1x1x16x128xf32> to vector<16x128xf32>
    %633 = vector.broadcast %529 : vector<1x128xf32> to vector<16x128xf32>
    %634 = arith.mulf %632, %633 : vector<16x128xf32>
    %635 = vector.broadcast %530 : vector<1x128xf32> to vector<16x128xf32>
    %636 = arith.addf %634, %635 : vector<16x128xf32>
    %cst_462 = arith.constant 0.000000e+00 : f32
    %637 = vector.broadcast %cst_462 : f32 to vector<16x128xf32>
    %638 = arith.maximumf %636, %637 : vector<16x128xf32>
    %c0_463 = arith.constant 0 : index
    %c0_464 = arith.constant 0 : index
    %639 = vector.load %arg16[%c0_463, %c0_464] : memref<16x128xf32, #tpu.memory_space<vmem>>, vector<16x128xf32>
    tpu.vector_store %arg16[%c0_463, %c0_464], %638 {strides = array<i32>} : memref<16x128xf32, #tpu.memory_space<vmem>>, vector<16x128xf32>,
    %c0_465 = arith.constant 0 : index
    %c0_466 = arith.constant 0 : index
    %640 = tpu.strided_load %arg16[%c0_465, %c0_466] {strides = array<i32: 2, 1>} : memref<16x128xf32, #tpu.memory_space<vmem>>, vector<8x128xf32>
    %641 = arith.truncf %640 : vector<8x128xf32> to vector<8x128xbf16>
    %c48_467 = arith.constant 48 : index
    %c0_468 = arith.constant 0 : index
    %642 = vector.load %arg15[%c48_467, %c0_468] : memref<64x128xbf16, #tpu.memory_space<vmem>>, vector<8x128xbf16>
    tpu.vector_store %arg15[%c48_467, %c0_468], %641 {strides = array<i32>} : memref<64x128xbf16, #tpu.memory_space<vmem>>, vector<8x128xbf16>,
    %c8_i32_469 = arith.constant 8 : i32
    %643 = arith.muli %arg1, %c8_i32_469 : i32
    %c7_i32_470 = arith.constant 7 : i32
    %644 = arith.addi %643, %c7_i32_470 : i32
    %c2_i32_471 = arith.constant 2 : i32
    %645 = arith.muli %644, %c2_i32_471 : i32
    %c0_472 = arith.constant 0 : index
    %646 = arith.index_cast %645 : i32 to index
    %c0_473 = arith.constant 0 : index
    %c0_474 = arith.constant 0 : index
    %647 = vector.load %arg6[%c0_472, %646, %c0_473, %c0_474] : memref<1x16x16x128xf32, #tpu.memory_space<vmem>>, vector<1x1x16x128xf32>
    %648 = vector.shape_cast %647 : vector<1x1x16x128xf32> to vector<16x128xf32>
    %649 = vector.broadcast %529 : vector<1x128xf32> to vector<16x128xf32>
    %650 = arith.mulf %648, %649 : vector<16x128xf32>
    %651 = vector.broadcast %530 : vector<1x128xf32> to vector<16x128xf32>
    %652 = arith.addf %650, %651 : vector<16x128xf32>
    %cst_475 = arith.constant 0.000000e+00 : f32
    %653 = vector.broadcast %cst_475 : f32 to vector<16x128xf32>
    %654 = arith.maximumf %652, %653 : vector<16x128xf32>
    %c0_476 = arith.constant 0 : index
    %c0_477 = arith.constant 0 : index
    %655 = vector.load %arg16[%c0_476, %c0_477] : memref<16x128xf32, #tpu.memory_space<vmem>>, vector<16x128xf32>
    tpu.vector_store %arg16[%c0_476, %c0_477], %654 {strides = array<i32>} : memref<16x128xf32, #tpu.memory_space<vmem>>, vector<16x128xf32>,
    %c0_478 = arith.constant 0 : index
    %c0_479 = arith.constant 0 : index
    %656 = tpu.strided_load %arg16[%c0_478, %c0_479] {strides = array<i32: 2, 1>} : memref<16x128xf32, #tpu.memory_space<vmem>>, vector<8x128xf32>
    %657 = arith.truncf %656 : vector<8x128xf32> to vector<8x128xbf16>
    %c56_480 = arith.constant 56 : index
    %c0_481 = arith.constant 0 : index
    %658 = vector.load %arg15[%c56_480, %c0_481] : memref<64x128xbf16, #tpu.memory_space<vmem>>, vector<8x128xbf16>
    tpu.vector_store %arg15[%c56_480, %c0_481], %657 {strides = array<i32>} : memref<64x128xbf16, #tpu.memory_space<vmem>>, vector<8x128xbf16>,
    %c0_482 = arith.constant 0 : index
    %c0_483 = arith.constant 0 : index
    %659 = vector.load %arg15[%c0_482, %c0_483] : memref<64x128xbf16, #tpu.memory_space<vmem>>, vector<64x128xbf16>
    %c0_484 = arith.constant 0 : index
    %c0_485 = arith.constant 0 : index
    %660 = vector.load %arg9[%c0_484, %c0_485] : memref<128x128xbf16, #tpu.memory_space<vmem>>, vector<128x128xbf16>
    %cst_486 = arith.constant dense<0.000000e+00> : vector<64x128xf32>
    %661 = tpu.matmul %659, %660, %cst_486 {dimension_numbers = #tpu.dot_dimension_numbers<[1], [0], [0], [1], [0, 0, 1, 1], [], []>} : vector<64x128xbf16>, vector<128x128xbf16>, vector<64x128xf32> -> vector<64x128xf32>
    %662 = vector.shape_cast %661 : vector<64x128xf32> to vector<8x8x128xf32>
    %663 = arith.truncf %662 : vector<8x8x128xf32> to vector<8x8x128xbf16>
    %c0_487 = arith.constant 0 : index
    %c0_488 = arith.constant 0 : index
    %c0_489 = arith.constant 0 : index
    %c0_490 = arith.constant 0 : index
    %664 = vector.load %arg11[%c0_487, %c0_488, %c0_489, %c0_490] : memref<1x8x8x128xbf16, #tpu.memory_space<vmem>>, vector<1x8x8x128xbf16>
    %665 = vector.shape_cast %664 : vector<1x8x8x128xbf16> to vector<8x8x128xbf16>
    %666 = vector.shape_cast %663 : vector<8x8x128xbf16> to vector<1x8x8x128xbf16>
    tpu.vector_store %arg11[%c0_487, %c0_488, %c0_489, %c0_490], %666 {strides = array<i32>} : memref<1x8x8x128xbf16, #tpu.memory_space<vmem>>, vector<1x8x8x128xbf16>,
    return
  }
  func.func @transform_0(%arg0: i32, %arg1: i32) -> (i32, i32, i32, i32) {
    %c0_i32 = arith.constant 0 : i32
    %c0_i32_0 = arith.constant 0 : i32
    %c0_i32_1 = arith.constant 0 : i32
    %c0_i32_2 = arith.constant 0 : i32
    return %arg0, %c0_i32, %c0_i32_0, %c0_i32_1 : i32, i32, i32, i32
  }
  func.func @transform_1(%arg0: i32, %arg1: i32) -> (i32, i32) {
    %c0_i32 = arith.constant 0 : i32
    %c0_i32_0 = arith.constant 0 : i32
    %c0_i32_1 = arith.constant 0 : i32
    return %c0_i32, %c0_i32_0 : i32, i32
  }
  func.func @transform_2(%arg0: i32, %arg1: i32) -> (i32, i32) {
    %c0_i32 = arith.constant 0 : i32
    %c0_i32_0 = arith.constant 0 : i32
    %c0_i32_1 = arith.constant 0 : i32
    return %c0_i32, %c0_i32_0 : i32, i32
  }
  func.func @transform_3(%arg0: i32, %arg1: i32) -> (i32, i32) {
    %c0_i32 = arith.constant 0 : i32
    %c0_i32_0 = arith.constant 0 : i32
    %c0_i32_1 = arith.constant 0 : i32
    return %c0_i32, %c0_i32_0 : i32, i32
  }
  func.func @transform_4(%arg0: i32, %arg1: i32) -> (i32, i32, i32, i32) {
    %c0_i32 = arith.constant 0 : i32
    %c0_i32_0 = arith.constant 0 : i32
    %c0_i32_1 = arith.constant 0 : i32
    %c0_i32_2 = arith.constant 0 : i32
    return %arg0, %c0_i32, %c0_i32_0, %c0_i32_1 : i32, i32, i32, i32
  }
  func.func @transform_5(%arg0: i32, %arg1: i32) -> (i32, i32) {
    %c0_i32 = arith.constant 0 : i32
    %c0_i32_0 = arith.constant 0 : i32
    %c0_i32_1 = arith.constant 0 : i32
    return %c0_i32, %c0_i32_0 : i32, i32
  }
  func.func @transform_6(%arg0: i32, %arg1: i32) -> (i32, i32) {
    %c0_i32 = arith.constant 0 : i32
    %c0_i32_0 = arith.constant 0 : i32
    %c0_i32_1 = arith.constant 0 : i32
    return %c0_i32, %c0_i32_0 : i32, i32
  }
  func.func @transform_7(%arg0: i32, %arg1: i32) -> (i32, i32) {
    %c0_i32 = arith.constant 0 : i32
    %c0_i32_0 = arith.constant 0 : i32
    %c0_i32_1 = arith.constant 0 : i32
    return %c0_i32, %c0_i32_0 : i32, i32
  }
  func.func @transform_8(%arg0: i32, %arg1: i32) -> (i32, i32, i32, i32) {
    %c0_i32 = arith.constant 0 : i32
    %c0_i32_0 = arith.constant 0 : i32
    %c0_i32_1 = arith.constant 0 : i32
    return %arg0, %arg1, %c0_i32, %c0_i32_0 : i32, i32, i32, i32
  }
  func.func @transform_9(%arg0: i32, %arg1: i32) -> (i32, i32, i32, i32) {
    %c0_i32 = arith.constant 0 : i32
    %c0_i32_0 = arith.constant 0 : i32
    %c0_i32_1 = arith.constant 0 : i32
    return %arg0, %arg1, %c0_i32, %c0_i32_0 : i32, i32, i32, i32
  }
  func.func @transform_10(%arg0: i32, %arg1: i32) -> (i32, i32, i32, i32) {
    %c0_i32 = arith.constant 0 : i32
    %c0_i32_0 = arith.constant 0 : i32
    %c0_i32_1 = arith.constant 0 : i32
    return %arg0, %arg1, %c0_i32, %c0_i32_0 : i32, i32, i32, i32
  }
}

module attributes {stable_mosaic.version = 11 : i64} {
  func.func @_bn_conv3_kernel(%arg0: i32, %arg1: memref<128x128xbf16, #tpu.memory_space<vmem>>, %arg2: memref<1x128xf32, #tpu.memory_space<vmem>>, %arg3: memref<1x128xf32, #tpu.memory_space<vmem>>, %arg4: memref<128x128xbf16, #tpu.memory_space<vmem>>, %arg5: memref<128x128xbf16, #tpu.memory_space<vmem>>, %arg6: memref<128x128xf32, #tpu.memory_space<vmem>>) attributes {dimension_semantics = [#tpu.dimension_semantics<parallel>], iteration_bounds = array<i64: 1>, scalar_prefetch = 0 : i64, scratch_operands = 0 : i64, tpu.core_type = #tpu.core_type<tc>, window_params = [{transform_indices = @transform_0, window_bounds = array<i64: 128, 128>}, {pipeline_mode = #tpu.pipeline_mode<synchronous>, transform_indices = @transform_1, window_bounds = array<i64: 1, 128>}, {pipeline_mode = #tpu.pipeline_mode<synchronous>, transform_indices = @transform_2, window_bounds = array<i64: 1, 128>}, {pipeline_mode = #tpu.pipeline_mode<synchronous>, transform_indices = @transform_3, window_bounds = array<i64: 128, 128>}, {transform_indices = @transform_4, window_bounds = array<i64: 128, 128>}, {transform_indices = @transform_5, window_bounds = array<i64: 128, 128>}]} {
    %c0 = arith.constant 0 : index
    %c0_0 = arith.constant 0 : index
    %0 = vector.load %arg1[%c0, %c0_0] : memref<128x128xbf16, #tpu.memory_space<vmem>>, vector<128x128xbf16>
    %1 = arith.extf %0 : vector<128x128xbf16> to vector<128x128xf32>
    %c0_1 = arith.constant 0 : index
    %c0_2 = arith.constant 0 : index
    %2 = vector.load %arg2[%c0_1, %c0_2] : memref<1x128xf32, #tpu.memory_space<vmem>>, vector<1x128xf32>
    %3 = vector.broadcast %2 : vector<1x128xf32> to vector<128x128xf32>
    %4 = arith.mulf %1, %3 : vector<128x128xf32>
    %c0_3 = arith.constant 0 : index
    %c0_4 = arith.constant 0 : index
    %5 = vector.load %arg3[%c0_3, %c0_4] : memref<1x128xf32, #tpu.memory_space<vmem>>, vector<1x128xf32>
    %6 = vector.broadcast %5 : vector<1x128xf32> to vector<128x128xf32>
    %7 = arith.addf %4, %6 : vector<128x128xf32>
    %cst = arith.constant 0.000000e+00 : f32
    %8 = vector.broadcast %cst : f32 to vector<128x128xf32>
    %9 = arith.maximumf %7, %8 : vector<128x128xf32>
    %10 = arith.truncf %9 : vector<128x128xf32> to vector<128x128xbf16>
    %c0_5 = arith.constant 0 : index
    %c0_6 = arith.constant 0 : index
    %11 = vector.load %arg4[%c0_5, %c0_6] : memref<128x128xbf16, #tpu.memory_space<vmem>>, vector<128x128xbf16>
    %cst_7 = arith.constant dense<0.000000e+00> : vector<128x128xf32>
    %12 = tpu.matmul %10, %11, %cst_7 {dimension_numbers = #tpu.dot_dimension_numbers<[1], [0], [0], [1], [0, 0, 1, 1], [], []>} : vector<128x128xbf16>, vector<128x128xbf16>, vector<128x128xf32> -> vector<128x128xf32>
    %c0_8 = arith.constant 0 : index
    %c0_9 = arith.constant 0 : index
    %13 = vector.load %arg5[%c0_8, %c0_9] : memref<128x128xbf16, #tpu.memory_space<vmem>>, vector<128x128xbf16>
    %14 = arith.extf %13 : vector<128x128xbf16> to vector<128x128xf32>
    %15 = arith.addf %12, %14 : vector<128x128xf32>
    %c0_10 = arith.constant 0 : index
    %c0_11 = arith.constant 0 : index
    %16 = vector.load %arg6[%c0_10, %c0_11] : memref<128x128xf32, #tpu.memory_space<vmem>>, vector<128x128xf32>
    tpu.vector_store %arg6[%c0_10, %c0_11], %15 {strides = array<i32>} : memref<128x128xf32, #tpu.memory_space<vmem>>, vector<128x128xf32>,
    return
  }
  func.func @transform_0(%arg0: i32) -> (i32, i32) {
    %c0_i32 = arith.constant 0 : i32
    %c0_i32_0 = arith.constant 0 : i32
    return %arg0, %c0_i32 : i32, i32
  }
  func.func @transform_1(%arg0: i32) -> (i32, i32) {
    %c0_i32 = arith.constant 0 : i32
    %c0_i32_0 = arith.constant 0 : i32
    %c0_i32_1 = arith.constant 0 : i32
    return %c0_i32, %c0_i32_0 : i32, i32
  }
  func.func @transform_2(%arg0: i32) -> (i32, i32) {
    %c0_i32 = arith.constant 0 : i32
    %c0_i32_0 = arith.constant 0 : i32
    %c0_i32_1 = arith.constant 0 : i32
    return %c0_i32, %c0_i32_0 : i32, i32
  }
  func.func @transform_3(%arg0: i32) -> (i32, i32) {
    %c0_i32 = arith.constant 0 : i32
    %c0_i32_0 = arith.constant 0 : i32
    %c0_i32_1 = arith.constant 0 : i32
    return %c0_i32, %c0_i32_0 : i32, i32
  }
  func.func @transform_4(%arg0: i32) -> (i32, i32) {
    %c0_i32 = arith.constant 0 : i32
    %c0_i32_0 = arith.constant 0 : i32
    return %arg0, %c0_i32 : i32, i32
  }
  func.func @transform_5(%arg0: i32) -> (i32, i32) {
    %c0_i32 = arith.constant 0 : i32
    %c0_i32_0 = arith.constant 0 : i32
    return %arg0, %c0_i32 : i32, i32
  }
}

</mosaic_0001>

<bundles_post_ra>
// kernel: residual_block_forward.4
= control target key start
LH: loop header
LB: loop body
LE: loop exit
PB: predicated region body
PF: predicated region fallthrough
CT: control target
= control target key end

     0   :  { %v282_v50 = vmov 0.0   ;;  %s494_s0 = inlined_call_operand.vmem [shape: f32[512,128], index: 0, kind: input, shape index: {}]   ;;  %s495_s1 = inlined_call_operand.vmem [shape: f32[1,8,128], index: 1, kind: output, shape index: {}]  }
   0x1   :  { %v8_v0 = vld [vmem:[%s494_s0] sm:$0xff]  ;;  %v9_v1 = vld [vmem:[%s494_s0 + $0x8] sm:$0xff]  ;;  %v10_v2 = vld [vmem:[%s494_s0 + $0x10] sm:$0xff]  ;;  %276 = vst [vmem:[%s495_s1 + $0x2] sm:$0x3f] %v282_v50 }
   0x2   :  { %v11_v3 = vld [vmem:[%s494_s0 + $0x18] sm:$0xff]  ;;  %v72_v4 = vadd.f32 %v9_v1, %v8_v0  ;;  %v142_v5 = vmul.f32 %v8_v0, %v8_v0  ;;  %v143_v6 = vmul.f32 %v9_v1, %v9_v1  ;;  %v144_v7 = vmul.f32 %v10_v2, %v10_v2  ;;  %v12_v8 = vld [vmem:[%s494_s0 + $0x20] sm:$0xff]  ;;  %v13_v12 = vld [vmem:[%s494_s0 + $0x28] sm:$0xff] }
   0x3   :  { %v145_v10 = vmul.f32 %v11_v3, %v11_v3  ;;  %v146_v14 = vmul.f32 %v12_v8, %v12_v8  ;;  %v14_v16 = vld [vmem:[%s494_s0 + $0x30] sm:$0xff]  ;;  %v147_v18 = vmul.f32 %v13_v12, %v13_v12  ;;  %v15_v20 = vld [vmem:[%s494_s0 + $0x38] sm:$0xff]  ;;  %v16_v24 = vld [vmem:[%s494_s0 + $0x40] sm:$0xff] }
   0x4   :  { %v73_v9 = vadd.f32 %v72_v4, %v10_v2  ;;  %v206_v11 = vadd.f32 %v143_v6, %v142_v5  ;;  %v148_v22 = vmul.f32 %v14_v16, %v14_v16  ;;  %v149_v26 = vmul.f32 %v15_v20, %v15_v20  ;;  %v17_v28 = vld [vmem:[%s494_s0 + $0x48] sm:$0xff]  ;;  %v18_v32 = vld [vmem:[%s494_s0 + $0x50] sm:$0xff]  ;;  %v19_v36 = vld [vmem:[%s494_s0 + $0x58] sm:$0xff] }
   0x5   :  { %v150_v30 = vmul.f32 %v16_v24, %v16_v24  ;;  %v151_v34 = vmul.f32 %v17_v28, %v17_v28  ;;  %v152_v38 = vmul.f32 %v18_v32, %v18_v32  ;;  %v20_v40 = vld [vmem:[%s494_s0 + $0x60] sm:$0xff]  ;;  %v153_v42 = vmul.f32 %v19_v36, %v19_v36  ;;  %v21_v44 = vld [vmem:[%s494_s0 + $0x68] sm:$0xff]  ;;  %v22_v48 = vld [vmem:[%s494_s0 + $0x70] sm:$0xff] }
   0x6   :  { %v74_v13 = vadd.f32 %v73_v9, %v11_v3  ;;  %v207_v15 = vadd.f32 %v206_v11, %v144_v7  ;;  %v154_v46 = vmul.f32 %v20_v40, %v20_v40  ;;  %v155_v51 = vmul.f32 %v21_v44, %v21_v44  ;;  %v23_v53 = vld [vmem:[%s494_s0 + $0x78] sm:$0xff]  ;;  %v24_v57 = vld [vmem:[%s494_s0 + $0x80] sm:$0xff]  ;;  %v25_v61 = vld [vmem:[%s494_s0 + $0x88] sm:$0xff] }
   0x7   :  { %v156_v55 = vmul.f32 %v22_v48, %v22_v48  ;;  %v157_v59 = vmul.f32 %v23_v53, %v23_v53  ;;  %v158_v63 = vmul.f32 %v24_v57, %v24_v57  ;;  %v26_v1 = vld [vmem:[%s494_s0 + $0x90] sm:$0xff]  ;;  %v159_v3 = vmul.f32 %v25_v61, %v25_v61  ;;  %v27_v5 = vld [vmem:[%s494_s0 + $0x98] sm:$0xff]  ;;  %v28_v9 = vld [vmem:[%s494_s0 + $0xa0] sm:$0xff] }
   0x8   :  { %v75_v17 = vadd.f32 %v74_v13, %v12_v8  ;;  %v208_v19 = vadd.f32 %v207_v15, %v145_v10  ;;  %v160_v7 = vmul.f32 %v26_v1, %v26_v1  ;;  %v161_v11 = vmul.f32 %v27_v5, %v27_v5  ;;  %v29_v13 = vld [vmem:[%s494_s0 + $0xa8] sm:$0xff] }
   0x9   :  { %v162_v15 = vmul.f32 %v28_v9, %v28_v9 }
   0xa   :  { %v76_v21 = vadd.f32 %v75_v17, %v13_v12  ;;  %v209_v23 = vadd.f32 %v208_v19, %v146_v14  ;;  %v30_v17 = vld [vmem:[%s494_s0 + $0xb0] sm:$0xff]  ;;  %v163_v19 = vmul.f32 %v29_v13, %v29_v13 }
   0xc   :  { %v77_v25 = vadd.f32 %v76_v21, %v14_v16  ;;  %v210_v27 = vadd.f32 %v209_v23, %v147_v18  ;;  %v31_v21 = vld [vmem:[%s494_s0 + $0xb8] sm:$0xff]  ;;  %v164_v23 = vmul.f32 %v30_v17, %v30_v17 }
   0xe   :  { %v78_v29 = vadd.f32 %v77_v25, %v15_v20  ;;  %v211_v31 = vadd.f32 %v210_v27, %v148_v22  ;;  %v32_v25 = vld [vmem:[%s494_s0 + $0xc0] sm:$0xff]  ;;  %v165_v27 = vmul.f32 %v31_v21, %v31_v21 }
  0x10   :  { %v79_v33 = vadd.f32 %v78_v29, %v16_v24  ;;  %v212_v35 = vadd.f32 %v211_v31, %v149_v26  ;;  %v33_v29 = vld [vmem:[%s494_s0 + $0xc8] sm:$0xff]  ;;  %v166_v31 = vmul.f32 %v32_v25, %v32_v25 }
  0x12   :  { %v80_v37 = vadd.f32 %v79_v33, %v17_v28  ;;  %v213_v39 = vadd.f32 %v212_v35, %v150_v30  ;;  %v34_v33 = vld [vmem:[%s494_s0 + $0xd0] sm:$0xff]  ;;  %v167_v35 = vmul.f32 %v33_v29, %v33_v29 }
  0x14   :  { %v81_v41 = vadd.f32 %v80_v37, %v18_v32  ;;  %v214_v43 = vadd.f32 %v213_v39, %v151_v34  ;;  %v35_v37 = vld [vmem:[%s494_s0 + $0xd8] sm:$0xff]  ;;  %v168_v39 = vmul.f32 %v34_v33, %v34_v33 }
  0x16   :  { %v82_v45 = vadd.f32 %v81_v41, %v19_v36  ;;  %v215_v47 = vadd.f32 %v214_v43, %v152_v38  ;;  %v36_v41 = vld [vmem:[%s494_s0 + $0xe0] sm:$0xff]  ;;  %v169_v43 = vmul.f32 %v35_v37, %v35_v37 }
  0x18   :  { %v83_v49 = vadd.f32 %v82_v45, %v20_v40  ;;  %v216_v52 = vadd.f32 %v215_v47, %v153_v42  ;;  %v37_v45 = vld [vmem:[%s494_s0 + $0xe8] sm:$0xff]  ;;  %v170_v47 = vmul.f32 %v36_v41, %v36_v41 }
  0x1a   :  { %v84_v54 = vadd.f32 %v83_v49, %v21_v44  ;;  %v217_v56 = vadd.f32 %v216_v52, %v154_v46  ;;  %v38_v49 = vld [vmem:[%s494_s0 + $0xf0] sm:$0xff] }
  0x1c   :  { %v85_v58 = vadd.f32 %v84_v54, %v22_v48  ;;  %v218_v60 = vadd.f32 %v217_v56, %v155_v51  ;;  %v171_v51 = vmul.f32 %v37_v45, %v37_v45 }
  0x1e   :  { %v86_v62 = vadd.f32 %v85_v58, %v23_v53  ;;  %v219_v0 = vadd.f32 %v218_v60, %v156_v55  ;;  %v39_v53 = vld [vmem:[%s494_s0 + $0xf8] sm:$0xff]  ;;  %v172_v55 = vmul.f32 %v38_v49, %v38_v49 }
  0x20   :  { %v87_v2 = vadd.f32 %v86_v62, %v24_v57  ;;  %v220_v4 = vadd.f32 %v219_v0, %v157_v59  ;;  %v40_v57 = vld [vmem:[%s494_s0 + $0x100] sm:$0xff]  ;;  %v173_v59 = vmul.f32 %v39_v53, %v39_v53 }
  0x22   :  { %v88_v6 = vadd.f32 %v87_v2, %v25_v61  ;;  %v221_v8 = vadd.f32 %v220_v4, %v158_v63  ;;  %v41_v61 = vld [vmem:[%s494_s0 + $0x108] sm:$0xff]  ;;  %v174_v63 = vmul.f32 %v40_v57, %v40_v57 }
  0x24   :  { %v89_v10 = vadd.f32 %v88_v6, %v26_v1  ;;  %v222_v12 = vadd.f32 %v221_v8, %v159_v3  ;;  %v42_v1 = vld [vmem:[%s494_s0 + $0x110] sm:$0xff]  ;;  %v175_v3 = vmul.f32 %v41_v61, %v41_v61 }
  0x26   :  { %v90_v14 = vadd.f32 %v89_v10, %v27_v5  ;;  %v223_v16 = vadd.f32 %v222_v12, %v160_v7  ;;  %v43_v5 = vld [vmem:[%s494_s0 + $0x118] sm:$0xff]  ;;  %v176_v7 = vmul.f32 %v42_v1, %v42_v1 }
  0x28   :  { %v91_v18 = vadd.f32 %v90_v14, %v28_v9  ;;  %v224_v20 = vadd.f32 %v223_v16, %v161_v11  ;;  %v44_v9 = vld [vmem:[%s494_s0 + $0x120] sm:$0xff]  ;;  %v177_v11 = vmul.f32 %v43_v5, %v43_v5 }
  0x2a   :  { %v92_v22 = vadd.f32 %v91_v18, %v29_v13  ;;  %v225_v24 = vadd.f32 %v224_v20, %v162_v15  ;;  %v45_v13 = vld [vmem:[%s494_s0 + $0x128] sm:$0xff]  ;;  %v178_v15 = vmul.f32 %v44_v9, %v44_v9 }
  0x2c   :  { %v93_v26 = vadd.f32 %v92_v22, %v30_v17  ;;  %v226_v28 = vadd.f32 %v225_v24, %v163_v19  ;;  %v46_v17 = vld [vmem:[%s494_s0 + $0x130] sm:$0xff]  ;;  %v179_v19 = vmul.f32 %v45_v13, %v45_v13 }
  0x2e   :  { %v94_v30 = vadd.f32 %v93_v26, %v31_v21  ;;  %v227_v32 = vadd.f32 %v226_v28, %v164_v23  ;;  %v47_v21 = vld [vmem:[%s494_s0 + $0x138] sm:$0xff]  ;;  %v180_v23 = vmul.f32 %v46_v17, %v46_v17 }
  0x30   :  { %v95_v34 = vadd.f32 %v94_v30, %v32_v25  ;;  %v228_v36 = vadd.f32 %v227_v32, %v165_v27  ;;  %v48_v25 = vld [vmem:[%s494_s0 + $0x140] sm:$0xff]  ;;  %v181_v27 = vmul.f32 %v47_v21, %v47_v21 }
  0x32   :  { %v96_v38 = vadd.f32 %v95_v34, %v33_v29  ;;  %v229_v40 = vadd.f32 %v228_v36, %v166_v31  ;;  %v49_v29 = vld [vmem:[%s494_s0 + $0x148] sm:$0xff]  ;;  %v182_v31 = vmul.f32 %v48_v25, %v48_v25 }
  0x34   :  { %v97_v42 = vadd.f32 %v96_v38, %v34_v33  ;;  %v230_v44 = vadd.f32 %v229_v40, %v167_v35  ;;  %v50_v33 = vld [vmem:[%s494_s0 + $0x150] sm:$0xff]  ;;  %v183_v35 = vmul.f32 %v49_v29, %v49_v29 }
  0x36   :  { %v98_v46 = vadd.f32 %v97_v42, %v35_v37  ;;  %v231_v48 = vadd.f32 %v230_v44, %v168_v39  ;;  %v51_v37 = vld [vmem:[%s494_s0 + $0x158] sm:$0xff]  ;;  %v184_v39 = vmul.f32 %v50_v33, %v50_v33 }
  0x38   :  { %v99_v50 = vadd.f32 %v98_v46, %v36_v41  ;;  %v232_v52 = vadd.f32 %v231_v48, %v169_v43  ;;  %v52_v41 = vld [vmem:[%s494_s0 + $0x160] sm:$0xff]  ;;  %v185_v43 = vmul.f32 %v51_v37, %v51_v37 }
  0x3a   :  { %v100_v54 = vadd.f32 %v99_v50, %v37_v45  ;;  %v233_v56 = vadd.f32 %v232_v52, %v170_v47  ;;  %v53_v45 = vld [vmem:[%s494_s0 + $0x168] sm:$0xff]  ;;  %v186_v47 = vmul.f32 %v52_v41, %v52_v41 }
  0x3c   :  { %v101_v58 = vadd.f32 %v100_v54, %v38_v49  ;;  %v234_v60 = vadd.f32 %v233_v56, %v171_v51  ;;  %v54_v49 = vld [vmem:[%s494_s0 + $0x170] sm:$0xff]  ;;  %v187_v51 = vmul.f32 %v53_v45, %v53_v45 }
  0x3e   :  { %v102_v62 = vadd.f32 %v101_v58, %v39_v53  ;;  %v235_v0 = vadd.f32 %v234_v60, %v172_v55  ;;  %v55_v53 = vld [vmem:[%s494_s0 + $0x178] sm:$0xff]  ;;  %v188_v55 = vmul.f32 %v54_v49, %v54_v49 }
  0x40   :  { %v103_v2 = vadd.f32 %v102_v62, %v40_v57  ;;  %v236_v4 = vadd.f32 %v235_v0, %v173_v59  ;;  %v56_v57 = vld [vmem:[%s494_s0 + $0x180] sm:$0xff]  ;;  %v189_v59 = vmul.f32 %v55_v53, %v55_v53 }
  0x42   :  { %v104_v6 = vadd.f32 %v103_v2, %v41_v61  ;;  %v237_v8 = vadd.f32 %v236_v4, %v174_v63  ;;  %v57_v61 = vld [vmem:[%s494_s0 + $0x188] sm:$0xff]  ;;  %v190_v63 = vmul.f32 %v56_v57, %v56_v57 }
  0x44   :  { %v105_v10 = vadd.f32 %v104_v6, %v42_v1  ;;  %v238_v12 = vadd.f32 %v237_v8, %v175_v3  ;;  %v58_v1 = vld [vmem:[%s494_s0 + $0x190] sm:$0xff]  ;;  %v191_v3 = vmul.f32 %v57_v61, %v57_v61 }
  0x46   :  { %v106_v14 = vadd.f32 %v105_v10, %v43_v5  ;;  %v239_v16 = vadd.f32 %v238_v12, %v176_v7  ;;  %v59_v5 = vld [vmem:[%s494_s0 + $0x198] sm:$0xff]  ;;  %v192_v7 = vmul.f32 %v58_v1, %v58_v1 }
  0x48   :  { %v107_v18 = vadd.f32 %v106_v14, %v44_v9  ;;  %v240_v20 = vadd.f32 %v239_v16, %v177_v11  ;;  %v60_v9 = vld [vmem:[%s494_s0 + $0x1a0] sm:$0xff]  ;;  %v193_v11 = vmul.f32 %v59_v5, %v59_v5 }
  0x4a   :  { %v108_v22 = vadd.f32 %v107_v18, %v45_v13  ;;  %v241_v24 = vadd.f32 %v240_v20, %v178_v15  ;;  %v61_v13 = vld [vmem:[%s494_s0 + $0x1a8] sm:$0xff]  ;;  %v194_v15 = vmul.f32 %v60_v9, %v60_v9 }
  0x4c   :  { %v109_v26 = vadd.f32 %v108_v22, %v46_v17  ;;  %v242_v28 = vadd.f32 %v241_v24, %v179_v19  ;;  %v62_v17 = vld [vmem:[%s494_s0 + $0x1b0] sm:$0xff]  ;;  %v195_v19 = vmul.f32 %v61_v13, %v61_v13 }
  0x4e   :  { %v110_v30 = vadd.f32 %v109_v26, %v47_v21  ;;  %v243_v32 = vadd.f32 %v242_v28, %v180_v23  ;;  %v63_v21 = vld [vmem:[%s494_s0 + $0x1b8] sm:$0xff]  ;;  %v196_v23 = vmul.f32 %v62_v17, %v62_v17 }
  0x50   :  { %v111_v34 = vadd.f32 %v110_v30, %v48_v25  ;;  %v244_v36 = vadd.f32 %v243_v32, %v181_v27  ;;  %v64_v25 = vld [vmem:[%s494_s0 + $0x1c0] sm:$0xff]  ;;  %v197_v27 = vmul.f32 %v63_v21, %v63_v21 }
  0x52   :  { %v112_v38 = vadd.f32 %v111_v34, %v49_v29  ;;  %v245_v40 = vadd.f32 %v244_v36, %v182_v31  ;;  %v65_v29 = vld [vmem:[%s494_s0 + $0x1c8] sm:$0xff]  ;;  %v198_v31 = vmul.f32 %v64_v25, %v64_v25 }
  0x54   :  { %v113_v42 = vadd.f32 %v112_v38, %v50_v33  ;;  %v246_v44 = vadd.f32 %v245_v40, %v183_v35  ;;  %v66_v33 = vld [vmem:[%s494_s0 + $0x1d0] sm:$0xff]  ;;  %v199_v35 = vmul.f32 %v65_v29, %v65_v29 }
  0x56   :  { %v114_v46 = vadd.f32 %v113_v42, %v51_v37  ;;  %v247_v48 = vadd.f32 %v246_v44, %v184_v39  ;;  %v67_v37 = vld [vmem:[%s494_s0 + $0x1d8] sm:$0xff]  ;;  %v200_v39 = vmul.f32 %v66_v33, %v66_v33 }
  0x58   :  { %v115_v50 = vadd.f32 %v114_v46, %v52_v41  ;;  %v248_v52 = vadd.f32 %v247_v48, %v185_v43  ;;  %v68_v41 = vld [vmem:[%s494_s0 + $0x1e0] sm:$0xff]  ;;  %v201_v43 = vmul.f32 %v67_v37, %v67_v37 }
  0x5a   :  { %v116_v54 = vadd.f32 %v115_v50, %v53_v45  ;;  %v249_v56 = vadd.f32 %v248_v52, %v186_v47  ;;  %v69_v45 = vld [vmem:[%s494_s0 + $0x1e8] sm:$0xff]  ;;  %v202_v47 = vmul.f32 %v68_v41, %v68_v41 }
  0x5c   :  { %v117_v58 = vadd.f32 %v116_v54, %v54_v49  ;;  %v250_v60 = vadd.f32 %v249_v56, %v187_v51  ;;  %v70_v49 = vld [vmem:[%s494_s0 + $0x1f0] sm:$0xff]  ;;  %v203_v51 = vmul.f32 %v69_v45, %v69_v45 }
  0x5e   :  { %v118_v62 = vadd.f32 %v117_v58, %v55_v53  ;;  %v251_v0 = vadd.f32 %v250_v60, %v188_v55  ;;  %v71_v53 = vld [vmem:[%s494_s0 + $0x1f8] sm:$0xff]  ;;  %v204_v55 = vmul.f32 %v70_v49, %v70_v49 }
  0x5f   :  { %v205_v58 = vmul.f32 %v71_v53, %v71_v53 }
  0x60   :  { %v119_v2 = vadd.f32 %v118_v62, %v56_v57  ;;  %v252_v4 = vadd.f32 %v251_v0, %v189_v59 }
  0x62   :  { %v120_v6 = vadd.f32 %v119_v2, %v57_v61  ;;  %v253_v8 = vadd.f32 %v252_v4, %v190_v63 }
  0x64   :  { %v121_v10 = vadd.f32 %v120_v6, %v58_v1  ;;  %v254_v12 = vadd.f32 %v253_v8, %v191_v3 }
  0x66   :  { %v122_v14 = vadd.f32 %v121_v10, %v59_v5  ;;  %v255_v16 = vadd.f32 %v254_v12, %v192_v7 }
  0x68   :  { %v123_v18 = vadd.f32 %v122_v14, %v60_v9  ;;  %v256_v20 = vadd.f32 %v255_v16, %v193_v11 }
  0x6a   :  { %v124_v22 = vadd.f32 %v123_v18, %v61_v13  ;;  %v257_v24 = vadd.f32 %v256_v20, %v194_v15 }
  0x6c   :  { %v125_v26 = vadd.f32 %v124_v22, %v62_v17  ;;  %v258_v28 = vadd.f32 %v257_v24, %v195_v19 }
  0x6e   :  { %v126_v30 = vadd.f32 %v125_v26, %v63_v21  ;;  %v259_v32 = vadd.f32 %v258_v28, %v196_v23 }
  0x70   :  { %v127_v34 = vadd.f32 %v126_v30, %v64_v25  ;;  %v260_v36 = vadd.f32 %v259_v32, %v197_v27 }
  0x72   :  { %v128_v38 = vadd.f32 %v127_v34, %v65_v29  ;;  %v261_v40 = vadd.f32 %v260_v36, %v198_v31 }
  0x74   :  { %v129_v42 = vadd.f32 %v128_v38, %v66_v33  ;;  %v262_v44 = vadd.f32 %v261_v40, %v199_v35 }
  0x76   :  { %v130_v46 = vadd.f32 %v129_v42, %v67_v37  ;;  %v263_v48 = vadd.f32 %v262_v44, %v200_v39 }
  0x78   :  { %v131_v50 = vadd.f32 %v130_v46, %v68_v41  ;;  %v264_v52 = vadd.f32 %v263_v48, %v201_v43 }
  0x7a   :  { %v132_v54 = vadd.f32 %v131_v50, %v69_v45  ;;  %v265_v56 = vadd.f32 %v264_v52, %v202_v47 }
  0x7c   :  { %v133_v57 = vadd.f32 %v132_v54, %v70_v49  ;;  %v266_v59 = vadd.f32 %v265_v56, %v203_v51 }
  0x7e   :  { %v134_v60 = vadd.f32 %v133_v57, %v71_v53  ;;  %v267_v61 = vadd.f32 %v266_v59, %v204_v55 }
  0x80   :  { %v135_v62 = vrot.slane %v134_v60, 4  ;;  %v268_v63 = vadd.f32 %v267_v61, %v205_v58 }
  0x82   :  { %v136_v0 = vadd.f32 %v135_v62, %v134_v60  ;;  %v269_v1 = vrot.slane %v268_v63, 4 }
  0x84   :  { %v137_v2 = vrot.slane %v136_v0, 2  ;;  %v270_v3 = vadd.f32 %v269_v1, %v268_v63 }
  0x86   :  { %v138_v4 = vadd.f32 %v137_v2, %v136_v0  ;;  %v271_v5 = vrot.slane %v270_v3, 2 }
  0x88   :  { %v139_v6 = vrot.slane %v138_v4, 1  ;;  %v272_v7 = vadd.f32 %v271_v5, %v270_v3 }
  0x8a   :  { %v140_v8 = vadd.f32 %v139_v6, %v138_v4  ;;  %v273_v9 = vrot.slane %v272_v7, 1 }
  0x8c   :  { %141 = vst [vmem:[%s495_s1] sm:$0x1] %v140_v8  ;;  %v274_v10 = vadd.f32 %v273_v9, %v272_v7 }
  0x8e   :  { %275 = vst [vmem:[%s495_s1 + $0x1] sm:$0x1] %v274_v10 }

// kernel: residual_block_forward.5
= control target key start
LH: loop header
LB: loop body
LE: loop exit
PB: predicated region body
PF: predicated region fallthrough
CT: control target
= control target key end

     0   :  { %s2467_s3 = inlined_call_operand.vmem [shape: bf16[128,128], index: 3, kind: input, shape index: {}]   ;;  %s2468_s0 = inlined_call_operand.vmem [shape: f32[512,128], index: 0, kind: input, shape index: {}]   ;;  %s2469_s1 = inlined_call_operand.vmem [shape: f32[1,128], index: 1, kind: input, shape index: {}]   ;;  %s2470_s2 = inlined_call_operand.vmem [shape: f32[1,128], index: 2, kind: input, shape index: {}]   ;;  %s2471_s4 = inlined_call_operand.vmem [shape: bf16[512,128], index: 4, kind: output, shape index: {0}]   ;;  %s2472_s5 = inlined_call_operand.vmem [shape: f32[1,8,128], index: 5, kind: output, shape index: {1}]  }
   0x1   :  { %v1674_v0 = vld [vmem:[%s2467_s3] sm:$0xff]   ;;  %v1675_v1 = vld [vmem:[%s2467_s3 + $0x8] sm:$0xff]   ;;  %v1676_v2 = vld [vmem:[%s2467_s3 + $0x10] sm:$0xff]  }
   0x2   :  { %1577 = vmatprep.subr.bf16.mxu0 %v1674_v0  ;;  %1657 = vmatprep.subr.bf16.mxu1 %v1674_v0  ;;  %v1677_v3 = vld [vmem:[%s2467_s3 + $0x18] sm:$0xff]   ;;  %v20_v4 = vld [vmem:[%s2468_s0] sm:$0xff]  ;;  %v21_v5 = vld [vmem:[%s2468_s0 + $0x8] sm:$0xff] }
   0x3   :  { %1578 = vmatpush3.bf16.msra.mxu0 %v1674_v0  ;;  %1665 = vmatpush3.bf16.msra.mxu1 %v1674_v0  ;;  %v1734_v6 = vld [vmem:[%s2469_s1] ss:$0 sm:$0xff]  ;;  %v22_v10 = vld [vmem:[%s2468_s0 + $0x10] sm:$0xff]  ;;  %v23_v14 = vld [vmem:[%s2468_s0 + $0x18] sm:$0xff] }
   0x4   :  { %1579 = vmatprep.subr.bf16.mxu0 %v1675_v1  ;;  %1658 = vmatprep.subr.bf16.mxu1 %v1675_v1  ;;  %v91_v7 = vmul.f32 %v1734_v6, %v20_v4  ;;  %v92_v8 = vmul.f32 %v1734_v6, %v21_v5  ;;  %v1741_v9 = vld [vmem:[%s2470_s2] ss:$0 sm:$0xff]  ;;  %v25_v16 = vld [vmem:[%s2468_s0 + $0x28] sm:$0xff]  ;;  %v26_v17 = vld [vmem:[%s2468_s0 + $0x30] sm:$0xff]  ;;  %v93_v21 = vmul.f32 %v1734_v6, %v22_v10 }
   0x5   :  { %v1749_v11 = vld [vmem:[%s2467_s3 + $0x20] sm:$0xff]   ;;  %v27_v18 = vld [vmem:[%s2468_s0 + $0x38] sm:$0xff]  ;;  %v29_v23 = vld [vmem:[%s2468_s0 + $0x48] sm:$0xff]  ;;  %v94_v24 = vmul.f32 %v1734_v6, %v23_v14  ;;  %v96_v29 = vmul.f32 %v1734_v6, %v25_v16  ;;  %v97_v30 = vmul.f32 %v1734_v6, %v26_v17 }
   0x6   :  { %v162_v12 = vadd.f32 %v1741_v9, %v91_v7  ;;  %v163_v13 = vadd.f32 %v1741_v9, %v92_v8  ;;  %v24_v15 = vld [vmem:[%s2468_s0 + $0x20] sm:$0xff]  ;;  %v30_v26 = vld [vmem:[%s2468_s0 + $0x50] sm:$0xff]  ;;  %v31_v27 = vld [vmem:[%s2468_s0 + $0x58] sm:$0xff]  ;;  %v98_v31 = vmul.f32 %v1734_v6, %v27_v18  ;;  %v100_v36 = vmul.f32 %v1734_v6, %v29_v23 }
   0x7   :  { %1580 = vmatpush3.bf16.msra.mxu0 %v1675_v1  ;;  %1666 = vmatpush3.bf16.msra.mxu1 %v1675_v1  ;;  %v28_v22 = vld [vmem:[%s2468_s0 + $0x40] sm:$0xff]  ;;  %v95_v25 = vmul.f32 %v1734_v6, %v24_v15  ;;  %v33_v33 = vld [vmem:[%s2468_s0 + $0x68] sm:$0xff]  ;;  %v164_v37 = vadd.f32 %v1741_v9, %v93_v21  ;;  %v101_v38 = vmul.f32 %v1734_v6, %v30_v26  ;;  %v34_v44 = vld [vmem:[%s2468_s0 + $0x70] sm:$0xff] }
   0x8   :  { %1581 = vmatprep.subr.bf16.mxu0 %v1676_v2  ;;  %1659 = vmatprep.subr.bf16.mxu1 %v1676_v2  ;;  %v226_v19 = vmax.f32 %v162_v12, 0.0  ;;  %v227_v20 = vmax.f32 %v163_v13, 0.0  ;;  %v32_v32 = vld [vmem:[%s2468_s0 + $0x60] sm:$0xff]  ;;  %v1679_v34 = vld [vmem:[%s2467_s3 + $0x28] sm:$0xff]   ;;  %v99_v35 = vmul.f32 %v1734_v6, %v28_v22  ;;  %v102_v39 = vmul.f32 %v1734_v6, %v31_v27  ;;  %v35_v48 = vld [vmem:[%s2468_s0 + $0x78] sm:$0xff] }
   0x9   :  { %v165_v40 = vadd.f32 %v1741_v9, %v94_v24  ;;  %v166_v41 = vadd.f32 %v1741_v9, %v95_v25  ;;  %v103_v42 = vmul.f32 %v1734_v6, %v32_v32  ;;  %v104_v43 = vmul.f32 %v1734_v6, %v33_v33  ;;  %v36_v49 = vld [vmem:[%s2468_s0 + $0x80] sm:$0xff]  ;;  %v1822_v50 = vld [vmem:[%s2467_s3 + $0x30] sm:$0xff]   ;;  %v37_v55 = vld [vmem:[%s2468_s0 + $0x88] sm:$0xff] }
   0xa   :  { %v290_v28 = vpack.c.bf16 %v227_v20, %v226_v19  ;;  %v167_v45 = vadd.f32 %v1741_v9, %v96_v29  ;;  %v168_v46 = vadd.f32 %v1741_v9, %v97_v30  ;;  %v169_v47 = vadd.f32 %v1741_v9, %v98_v31  ;;  %v38_v0 = vld [vmem:[%s2468_s0 + $0x90] sm:$0xff]  ;;  %v39_v5 = vld [vmem:[%s2468_s0 + $0x98] sm:$0xff]  ;;  %v40_v13 = vld [vmem:[%s2468_s0 + $0xa0] sm:$0xff] }
   0xb   :  { %1582 = vmatpush3.bf16.msra.mxu0 %v1676_v2  ;;  %1667 = vmatpush3.bf16.msra.mxu1 %v1676_v2  ;;  %v170_v51 = vadd.f32 %v1741_v9, %v99_v35  ;;  %v171_v52 = vadd.f32 %v1741_v9, %v100_v36  ;;  %v172_v53 = vadd.f32 %v1741_v9, %v101_v38  ;;  %v228_v56 = vmax.f32 %v164_v37, 0.0  ;;  %v1681_v7 = vld [vmem:[%s2467_s3 + $0x38] sm:$0xff]   ;;  %v41_v18 = vld [vmem:[%s2468_s0 + $0xa8] sm:$0xff]  ;;  %v42_v25 = vld [vmem:[%s2468_s0 + $0xb0] sm:$0xff] }
   0xc   :  { %1583 = vmatprep.subr.bf16.mxu0 %v1677_v3  ;;  %1660 = vmatprep.subr.bf16.mxu1 %v1677_v3  ;;  %v173_v54 = vadd.f32 %v1741_v9, %v102_v39  ;;  %v174_v57 = vadd.f32 %v1741_v9, %v103_v42  ;;  %v175_v58 = vadd.f32 %v1741_v9, %v104_v43  ;;  %v229_v60 = vmax.f32 %v165_v40, 0.0  ;;  %v46_v30 = vld [vmem:[%s2468_s0 + $0xd0] sm:$0xff]  ;;  %v47_v31 = vld [vmem:[%s2468_s0 + $0xd8] sm:$0xff]  ;;  %v48_v37 = vld [vmem:[%s2468_s0 + $0xe0] sm:$0xff] }
   0xd   :  { %1593 = vmatprep.mubr.bf16.mxu0 %v290_v28  ;;  %v105_v59 = vmul.f32 %v1734_v6, %v34_v44  ;;  %v230_v61 = vmax.f32 %v166_v41, 0.0  ;;  %v106_v62 = vmul.f32 %v1734_v6, %v35_v48  ;;  %v107_v63 = vmul.f32 %v1734_v6, %v36_v49  ;;  %v43_v36 = vld [vmem:[%s2468_s0 + $0xb8] sm:$0xff]  ;;  %v49_v38 = vld [vmem:[%s2468_s0 + $0xe8] sm:$0xff]  ;;  %v50_v43 = vld [vmem:[%s2468_s0 + $0xf0] sm:$0xff] }
   0xe   :  { %v231_v1 = vmax.f32 %v167_v45, 0.0  ;;  %v232_v2 = vmax.f32 %v168_v46, 0.0  ;;  %v108_v4 = vmul.f32 %v1734_v6, %v37_v55  ;;  %v234_v8 = vmax.f32 %v170_v51, 0.0  ;;  %v51_v48 = vld [vmem:[%s2468_s0 + $0xf8] sm:$0xff] }
   0xf   :  { %1584 = vmatpush3.bf16.msra.mxu0 %v1677_v3  ;;  %1668 = vmatpush3.bf16.msra.mxu1 %v1677_v3  ;;  %v233_v3 = vmax.f32 %v169_v47, 0.0  ;;  %v235_v10 = vmax.f32 %v171_v52, 0.0  ;;  %v237_v12 = vmax.f32 %v173_v54, 0.0  ;;  %v238_v14 = vmax.f32 %v174_v57, 0.0 }
  0x10   :  { %1585 = vmatprep.subr.bf16.mxu0 %v1749_v11  ;;  %1661 = vmatprep.subr.bf16.mxu1 %v1749_v11  ;;  %v239_v15 = vmax.f32 %v175_v58, 0.0  ;;  %v1852_v16 = vadd.f32 %v1741_v9, %v105_v59  ;;  %v109_v17 = vmul.f32 %v1734_v6, %v38_v0  ;;  %v1859_v19 = vadd.f32 %v1741_v9, %v106_v62  ;;  %v53_v62 = vld [vmem:[%s2468_s0 + $0x108] sm:$0xff] }
  0x11   :  { %v1862_v20 = vadd.f32 %v1741_v9, %v107_v63  ;;  %v110_v21 = vmul.f32 %v1734_v6, %v39_v5  ;;  %v291_v22 = vpack.c.bf16 %v229_v60, %v228_v56  ;;  %v1867_v23 = vadd.f32 %v1741_v9, %v108_v4  ;;  %v55_v4 = vld [vmem:[%s2468_s0 + $0x118] sm:$0xff] }
  0x12   :  { %v111_v24 = vmul.f32 %v1734_v6, %v40_v13  ;;  %v292_v26 = vpack.c.bf16 %v231_v1, %v230_v61  ;;  %v1874_v27 = vpack.c.bf16 %v233_v3, %v232_v2  ;;  %v1876_v28 = vpack.c.bf16 %v235_v10, %v234_v8  ;;  %v54_v3 = vld [vmem:[%s2468_s0 + $0x110] sm:$0xff] }
  0x13   :  { %1586 = vmatpush3.bf16.msra.mxu0 %v1749_v11  ;;  %1669 = vmatpush3.bf16.msra.mxu1 %v1749_v11  ;;  %v236_v11 = vmax.f32 %v172_v53, 0.0  ;;  %v112_v29 = vmul.f32 %v1734_v6, %v41_v18  ;;  %v1887_v33 = vpack.c.bf16 %v239_v15, %v238_v14  ;;  %v1891_v35 = vadd.f32 %v1741_v9, %v109_v17  ;;  %v52_v53 = vld [vmem:[%s2468_s0 + $0x100] sm:$0xff]  ;;  %v58_v18 = vld [vmem:[%s2468_s0 + $0x130] sm:$0xff] }
  0x14   :  { %1587 = vmatprep.subr.bf16.mxu0 %v1679_v34  ;;  %1662 = vmatprep.subr.bf16.mxu1 %v1679_v34  ;;  %v241_v39 = vmax.f32 %v1859_v19, 0.0  ;;  %v242_v40 = vmax.f32 %v1862_v20, 0.0  ;;  %v1905_v41 = vadd.f32 %v1741_v9, %v110_v21  ;;  %v113_v42 = vmul.f32 %v1734_v6, %v42_v25 }
  0x15   :  { %v1885_v32 = vpack.c.bf16 %v237_v12, %v236_v11  ;;  %v243_v44 = vmax.f32 %v1867_v23, 0.0  ;;  %v1914_v45 = vadd.f32 %v1741_v9, %v111_v24  ;;  %v117_v46 = vmul.f32 %v1734_v6, %v46_v30  ;;  %v56_v11 = vld [vmem:[%s2468_s0 + $0x120] sm:$0xff]  ;;  %v57_v12 = vld [vmem:[%s2468_s0 + $0x128] sm:$0xff] }
  0x16   :  { %v118_v47 = vmul.f32 %v1734_v6, %v47_v31  ;;  %v1922_v49 = vadd.f32 %v1741_v9, %v112_v29  ;;  %v119_v51 = vmul.f32 %v1734_v6, %v48_v37  ;;  %v120_v52 = vmul.f32 %v1734_v6, %v49_v38  ;;  %v60_v37 = vld [vmem:[%s2468_s0 + $0x140] sm:$0xff] }
  0x17   :  { %1588 = vmatpush3.bf16.msra.mxu0 %v1679_v34  ;;  %1670 = vmatpush3.bf16.msra.mxu1 %v1679_v34  ;;  %v240_v34 = vmax.f32 %v1852_v16, 0.0  ;;  %v244_v54 = vmax.f32 %v1891_v35, 0.0  ;;  %v188_v55 = vadd.f32 %v1741_v9, %v117_v46  ;;  %v121_v57 = vmul.f32 %v1734_v6, %v50_v43  ;;  %v75_v16 = vld [vmem:[%s2468_s0 + $0x1b8] sm:$0xff]  ;;  %v70_v35 = vld [vmem:[%s2468_s0 + $0x190] sm:$0xff] }
  0x18   :  { %1589 = vmatprep.subr.bf16.mxu0 %v1822_v50  ;;  %1663 = vmatprep.subr.bf16.mxu1 %v1822_v50  ;;  %v189_v56 = vadd.f32 %v1741_v9, %v118_v47  ;;  %v245_v58 = vmax.f32 %v1905_v41, 0.0  ;;  %v190_v59 = vadd.f32 %v1741_v9, %v119_v51  ;;  %v191_v60 = vadd.f32 %v1741_v9, %v120_v52  ;;  %v44_v47 = vld [vmem:[%s2468_s0 + $0xc0] sm:$0xff] }
  0x19   :  { %v122_v61 = vmul.f32 %v1734_v6, %v51_v48  ;;  %v252_v63 = vmax.f32 %v188_v55, 0.0  ;;  %v192_v1 = vadd.f32 %v1741_v9, %v121_v57  ;;  %v123_v2 = vmul.f32 %v1734_v6, %v52_v53  ;;  %v61_v55 = vld [vmem:[%s2468_s0 + $0x148] sm:$0xff] }
  0x1a   :  { %v253_v0 = vmax.f32 %v189_v56, 0.0  ;;  %v1952_v5 = vadd.f32 %v1741_v9, %v113_v42  ;;  %v255_v8 = vmax.f32 %v191_v60, 0.0  ;;  %v124_v15 = vmul.f32 %v1734_v6, %v53_v62  ;;  %v63_v62 = vld [vmem:[%s2468_s0 + $0x158] sm:$0xff] }
  0x1b   :  { %1590 = vmatpush3.bf16.msra.mxu0 %v1822_v50  ;;  %1671 = vmatpush3.bf16.msra.mxu1 %v1822_v50  ;;  %v1925_v50 = vmul.f32 %v1734_v6, %v43_v36  ;;  %v193_v10 = vadd.f32 %v1741_v9, %v122_v61  ;;  %v256_v14 = vmax.f32 %v192_v1, 0.0  ;;  %v194_v17 = vadd.f32 %v1741_v9, %v123_v2  ;;  %v62_v61 = vld [vmem:[%s2468_s0 + $0x150] sm:$0xff]  ;;  %v64_v2 = vld [vmem:[%s2468_s0 + $0x160] sm:$0xff] }
  0x1c   :  { %1591 = vmatprep.subr.bf16.mxu0 %v1681_v7  ;;  %1664 = vmatprep.subr.bf16.mxu1 %v1681_v7  ;;  %v1961_v13 = vpack.c.bf16 %v253_v0, %v252_v63  ;;  %v125_v24 = vmul.f32 %v1734_v6, %v54_v3  ;;  %v126_v25 = vmul.f32 %v1734_v6, %v55_v4  ;;  %v65_v3 = vld [vmem:[%s2468_s0 + $0x168] sm:$0xff]  ;;  %v248_v19 = vmax.f32 %v1952_v5, 0.0 }
  0x1d   :  { %v195_v29 = vadd.f32 %v1741_v9, %v124_v15  ;;  %v258_v30 = vmax.f32 %v194_v17, 0.0  ;;  %v127_v31 = vmul.f32 %v1734_v6, %v56_v11  ;;  %v128_v36 = vmul.f32 %v1734_v6, %v57_v12  ;;  %v67_v17 = vld [vmem:[%s2468_s0 + $0x178] sm:$0xff] }
  0x1e   :  { %v196_v42 = vadd.f32 %v1741_v9, %v125_v24  ;;  %v197_v43 = vadd.f32 %v1741_v9, %v126_v25  ;;  %v129_v46 = vmul.f32 %v1734_v6, %v58_v18  ;;  %v131_v60 = vmul.f32 %v1734_v6, %v60_v37 }
  0x1f   :  { %1592 = vmatpush3.bf16.msra.mxu0 %v1681_v7  ;;  %1672 = vmatpush3.bf16.msra.mxu1 %v1681_v7  ;;  %v254_v7 = vmax.f32 %v190_v59, 0.0  ;;  %v259_v48 = vmax.f32 %v195_v29, 0.0  ;;  %v198_v51 = vadd.f32 %v1741_v9, %v127_v31  ;;  %v199_v52 = vadd.f32 %v1741_v9, %v128_v36  ;;  %v45_v29 = vld [vmem:[%s2468_s0 + $0xc8] sm:$0xff] }
  0x20   :  { %v260_v56 = vmax.f32 %v196_v42, 0.0  ;;  %v261_v57 = vmax.f32 %v197_v43, 0.0  ;;  %v200_v59 = vadd.f32 %v1741_v9, %v129_v46  ;;  %v115_v4 = vmul.f32 %v1734_v6, %v44_v47 }
  0x21   :  { %v1968_v21 = vpack.c.bf16 %v255_v8, %v254_v7  ;;  %v306_v63 = vpack.c.bf16 %v259_v48, %v258_v30  ;;  %v262_v0 = vmax.f32 %v198_v51, 0.0  ;;  %v263_v1 = vmax.f32 %v199_v52, 0.0 }
  0x22   :  { %1594 = vmatmul.mubr.bf16.vlgmr.msra.gmra.mrb[0].mxu0 %v291_v22  ;;  %v257_v22 = vmax.f32 %v193_v10, 0.0  ;;  %v307_v7 = vpack.c.bf16 %v261_v57, %v260_v56  ;;  %v132_v8 = vmul.f32 %v1734_v6, %v61_v55  ;;  %v66_v10 = vld [vmem:[%s2468_s0 + $0x170] sm:$0xff]  ;;  %v264_v12 = vmax.f32 %v200_v59, 0.0 }
  0x23   :  { %1597 = vmatprep.mubr.bf16.mxu0 %v292_v26  ;;  %v59_v26 = vld [vmem:[%s2468_s0 + $0x138] sm:$0xff]  ;;  %1625 = vmatprep.mubr.bf16.mxu1 %v306_v63  ;;  %v308_v11 = vpack.c.bf16 %v263_v1, %v262_v0  ;;  %v134_v15 = vmul.f32 %v1734_v6, %v63_v62  ;;  %v135_v24 = vmul.f32 %v1734_v6, %v64_v2  ;;  %v246_v48 = vmax.f32 %v1914_v45, 0.0 }
  0x24   :  { %v1981_v38 = vpack.c.bf16 %v257_v22, %v256_v14  ;;  %v130_v53 = vmul.f32 %v1734_v6, %v59_v26  ;;  %v133_v14 = vmul.f32 %v1734_v6, %v62_v61  ;;  %1626 = vmatmul.mubr.bf16.vlgmr.msra.gmra.mrb[0].mxu1 %v307_v7  ;;  %v203_v22 = vadd.f32 %v1741_v9, %v132_v8  ;;  %v68_v26 = vld [vmem:[%s2468_s0 + $0x180] sm:$0xff]  ;;  %v77_v7 = vld [vmem:[%s2468_s0 + $0x1c8] sm:$0xff] }
  0x25   :  { %v136_v25 = vmul.f32 %v1734_v6, %v65_v3  ;;  %1629 = vmatprep.mubr.bf16.mxu1 %v308_v11  ;;  %v205_v36 = vadd.f32 %v1741_v9, %v134_v15  ;;  %v137_v37 = vmul.f32 %v1734_v6, %v66_v10  ;;  %v206_v43 = vadd.f32 %v1741_v9, %v135_v24  ;;  %v72_v3 = vld [vmem:[%s2468_s0 + $0x1a0] sm:$0xff]  ;;  %v73_v10 = vld [vmem:[%s2468_s0 + $0x1a8] sm:$0xff]  ;;  %v79_v15 = vld [vmem:[%s2468_s0 + $0x1d8] sm:$0xff] }
  0x26   :  { %v204_v31 = vadd.f32 %v1741_v9, %v133_v14  ;;  %v267_v42 = vmax.f32 %v203_v22, 0.0  ;;  %v138_v47 = vmul.f32 %v1734_v6, %v67_v17  ;;  %v247_v51 = vmax.f32 %v1922_v49, 0.0  ;;  %v78_v14 = vld [vmem:[%s2468_s0 + $0x1d0] sm:$0xff] }
  0x27   :  { %v207_v46 = vadd.f32 %v1741_v9, %v136_v25  ;;  %v2042_v52 = vadd.f32 %v1741_v9, %v1925_v50  ;;  %v116_v55 = vmul.f32 %v1734_v6, %v45_v29  ;;  %v269_v59 = vmax.f32 %v205_v36, 0.0  ;;  %v80_v25 = vld [vmem:[%s2468_s0 + $0x1e0] sm:$0xff] }
  0x28   :  { %v268_v57 = vmax.f32 %v204_v31, 0.0  ;;  %v270_v49 = vmax.f32 %v206_v43, 0.0  ;;  %v2052_v50 = vadd.f32 %v1741_v9, %v137_v37  ;;  %v297_v62 = vpack.c.bf16 %v241_v39, %v240_v34  ;;  %v76_v39 = vld [vmem:[%s2468_s0 + $0x1c0] sm:$0xff]  ;;  %v82_v37 = vld [vmem:[%s2468_s0 + $0x1f0] sm:$0xff] }
  0x29   :  { %v271_v61 = vmax.f32 %v207_v46, 0.0  ;;  %v2069_v63 = vpack.c.bf16 %v245_v58, %v244_v54  ;;  %v2072_v0 = vadd.f32 %v1741_v9, %v138_v47  ;;  %v2079_v20 = vadd.f32 %v1741_v9, %v115_v4  ;;  %v71_v54 = vld [vmem:[%s2468_s0 + $0x198] sm:$0xff] }
  0x2a   :  { %1598 = vmatmul.mubr.bf16.gmra.mrb[4].mxu0 %v1874_v27  ;;  %v201_v27 = vadd.f32 %v1741_v9, %v130_v53  ;;  %v139_v53 = vmul.f32 %v1734_v6, %v68_v26  ;;  %v249_v41 = vmax.f32 %v2042_v52, 0.0  ;;  %v311_v1 = vpack.c.bf16 %v269_v59, %v268_v57  ;;  %v81_v26 = vld [vmem:[%s2468_s0 + $0x1e8] sm:$0xff] }
  0x2b   :  { %1601 = vmatprep.mubr.bf16.mxu0 %v1876_v28  ;;  %v202_v28 = vadd.f32 %v1741_v9, %v131_v60  ;;  %v69_v60 = vld [vmem:[%s2468_s0 + $0x188] sm:$0xff]  ;;  %v272_v2 = vmax.f32 %v2052_v50, 0.0  ;;  %v146_v4 = vmul.f32 %v1734_v6, %v75_v16  ;;  %v273_v8 = vmax.f32 %v2072_v0, 0.0 }
  0x2c   :  { %v265_v18 = vmax.f32 %v201_v27, 0.0  ;;  %v140_v23 = vmul.f32 %v1734_v6, %v69_v60  ;;  %v2083_v34 = vadd.f32 %v1741_v9, %v139_v53  ;;  %v312_v27 = vpack.c.bf16 %v271_v61, %v270_v49 }
  0x2d   :  { %v266_v30 = vmax.f32 %v202_v28, 0.0  ;;  %v141_v28 = vmul.f32 %v1734_v6, %v70_v35  ;;  %v142_v22 = vmul.f32 %v1734_v6, %v71_v54  ;;  %v217_v24 = vadd.f32 %v1741_v9, %v146_v4 }
  0x2e   :  { %v309_v56 = vpack.c.bf16 %v265_v18, %v264_v12  ;;  %v147_v12 = vmul.f32 %v1734_v6, %v76_v39  ;;  %v211_v17 = vadd.f32 %v1741_v9, %v140_v23  ;;  %v274_v18 = vmax.f32 %v2083_v34, 0.0 }
  0x2f   :  { %v310_v45 = vpack.c.bf16 %v267_v42, %v266_v30  ;;  %v143_v29 = vmul.f32 %v1734_v6, %v72_v3  ;;  %v148_v31 = vmul.f32 %v1734_v6, %v77_v7  ;;  %v144_v42 = vmul.f32 %v1734_v6, %v73_v10 }
  0x30   :  { %1630 = vmatmul.mubr.bf16.gmra.mrb[4].mxu1 %v309_v56  ;;  %v218_v36 = vadd.f32 %v1741_v9, %v147_v12  ;;  %v281_v43 = vmax.f32 %v217_v24, 0.0  ;;  %v149_v46 = vmul.f32 %v1734_v6, %v78_v14  ;;  %v150_v47 = vmul.f32 %v1734_v6, %v79_v15 }
  0x31   :  { %1633 = vmatprep.mubr.bf16.mxu1 %v310_v45  ;;  %v152_v56 = vmul.f32 %v1734_v6, %v81_v26  ;;  %v153_v45 = vmul.f32 %v1734_v6, %v82_v37  ;;  %v250_v54 = vmax.f32 %v2079_v20, 0.0  ;;  %v214_v12 = vadd.f32 %v1741_v9, %v143_v29 }
  0x32   :  { %1602 = vmatmul.mubr.bf16.gmra.mrb[8].mxu0 %v1885_v32  ;;  %v74_v32 = vld [vmem:[%s2468_s0 + $0x1b0] sm:$0xff]  ;;  %v282_v53 = vmax.f32 %v218_v36, 0.0  ;;  %v220_v59 = vadd.f32 %v1741_v9, %v149_v46  ;;  %v221_v60 = vadd.f32 %v1741_v9, %v150_v47  ;;  %v215_v20 = vadd.f32 %v1741_v9, %v144_v42 }
  0x33   :  { %1605 = vmatprep.mubr.bf16.mxu0 %v1887_v33  ;;  %v298_v33 = vpack.c.bf16 %v243_v44, %v242_v40  ;;  %v2091_v40 = vpack.c.bf16 %v247_v51, %v246_v48  ;;  %v2095_v44 = vadd.f32 %v1741_v9, %v116_v55  ;;  %v145_v58 = vmul.f32 %v1734_v6, %v74_v32  ;;  %v83_v48 = vld [vmem:[%s2468_s0 + $0x1f8] sm:$0xff] }
  0x34   :  { %v219_v51 = vadd.f32 %v1741_v9, %v148_v31  ;;  %v151_v55 = vmul.f32 %v1734_v6, %v80_v25  ;;  %v223_v50 = vadd.f32 %v1741_v9, %v152_v56  ;;  %v154_v32 = vmul.f32 %v1734_v6, %v83_v48 }
  0x35   :  { %v216_v11 = vadd.f32 %v1741_v9, %v145_v58  ;;  %v285_v0 = vmax.f32 %v221_v60, 0.0  ;;  %v224_v16 = vadd.f32 %v1741_v9, %v153_v45  ;;  %v313_v58 = vpack.c.bf16 %v273_v8, %v272_v2 }
  0x36   :  { %v283_v49 = vmax.f32 %v219_v51, 0.0  ;;  %v222_v61 = vadd.f32 %v1741_v9, %v151_v55  ;;  %v287_v35 = vmax.f32 %v223_v50, 0.0  ;;  %v225_v39 = vadd.f32 %v1741_v9, %v154_v32 }
  0x37   :  { %v280_v30 = vmax.f32 %v216_v11, 0.0  ;;  %v288_v3 = vmax.f32 %v224_v16, 0.0  ;;  %v212_v6 = vadd.f32 %v1741_v9, %v141_v28  ;;  %v251_v10 = vmax.f32 %v2095_v44, 0.0 }
  0x38   :  { %1634 = vmatmul.mubr.bf16.gmra.mrb[8].mxu1 %v311_v1  ;;  %v318_v23 = vpack.c.bf16 %v283_v49, %v282_v53  ;;  %v286_v34 = vmax.f32 %v222_v61, 0.0  ;;  %v289_v7 = vmax.f32 %v225_v39, 0.0  ;;  %v278_v15 = vmax.f32 %v214_v12, 0.0 }
  0x39   :  { %v317_v57 = vpack.c.bf16 %v281_v43, %v280_v30  ;;  %1637 = vmatprep.mubr.bf16.mxu1 %v312_v27  ;;  %v213_v27 = vadd.f32 %v1741_v9, %v142_v22  ;;  %v276_v8 = vmax.f32 %v212_v6, 0.0  ;;  %v302_v14 = vpack.c.bf16 %v251_v10, %v250_v54 }
  0x3a   :  { %1606 = vmatmul.mubr.bf16.gmra.mrb[12].mxu0 %v297_v62  ;;  %v275_v62 = vmax.f32 %v211_v17, 0.0  ;;  %v320_v4 = vpack.c.bf16 %v287_v35, %v286_v34  ;;  %v321_v2 = vpack.c.bf16 %v289_v7, %v288_v3  ;;  %v1682_v34 = vmov 0.0  }
  0x3b   :  { %1609 = vmatprep.mubr.bf16.mxu0 %v298_v33  ;;  %v284_v33 = vmax.f32 %v220_v59, 0.0  ;;  %v277_v28 = vmax.f32 %v213_v27, 0.0  ;;  %1199 = vst [vmem:[%s2472_s5 + $0x2] sm:$0x3f] %v1682_v34 }
  0x3c   :  { %v314_v11 = vpack.c.bf16 %v275_v62, %v274_v18 }
  0x3d   :  { %v319_v1 = vpack.c.bf16 %v285_v0, %v284_v33  ;;  %v315_v44 = vpack.c.bf16 %v277_v28, %v276_v8 }
  0x40   :  { %1638 = vmatmul.mubr.bf16.gmra.mrb[12].mxu1 %v313_v58 }
  0x41   :  { %1641 = vmatprep.mubr.bf16.mxu1 %v314_v11 }
  0x42   :  { %1610 = vmatmul.mubr.bf16.gmra.mrb[16].mxu0 %v2069_v63  ;;  %v301_v63 = vpack.c.bf16 %v249_v41, %v248_v19 }
  0x43   :  { %1613 = vmatprep.mubr.bf16.mxu0 %v2091_v40  ;;  %v279_v40 = vmax.f32 %v215_v20, 0.0 }
  0x45   :  { %v316_v17 = vpack.c.bf16 %v279_v40, %v278_v15 }
  0x48   :  { %1642 = vmatmul.mubr.bf16.gmra.mrb[16].mxu1 %v315_v44 }
  0x49   :  { %1645 = vmatprep.mubr.bf16.mxu1 %v316_v17 }
  0x4a   :  { %1614 = vmatmul.mubr.bf16.gmra.mrb[20].mxu0 %v301_v63 }
  0x4b   :  { %1617 = vmatprep.mubr.bf16.mxu0 %v302_v14 }
  0x50   :  { %1646 = vmatmul.mubr.bf16.gmra.mrb[20].mxu1 %v317_v57 }
  0x51   :  { %1649 = vmatprep.mubr.bf16.mxu1 %v318_v23 }
  0x52   :  { %1618 = vmatmul.mubr.bf16.gmra.mrb[24].mxu0 %v1961_v13 }
  0x53   :  { %1621 = vmatprep.mubr.bf16.mxu0 %v1968_v21 }
  0x58   :  { %1650 = vmatmul.mubr.bf16.gmra.mrb[24].mxu1 %v319_v1 }
  0x59   :  { %1653 = vmatprep.mubr.bf16.mxu1 %v320_v4 }
  0x5a   :  { %1622 = vmatmul.mubr.bf16.gmra.mrb[28].mxu0 %v1981_v38 }
  0x60   :  { %1654 = vmatmul.mubr.bf16.gmra.mrb[28].mxu1 %v321_v2 }
  0xf5   :  { %v1595_v9 = vpop.f32.mrb[0].mxu0 }
  0xf6   :  { %v420_v5 = vpop.f32.mrb[1].mxu0  ;;  %v1067_v13 = vmul.f32 %v1595_v9, %v1595_v9 }
  0xf7   :  { %v1596_v52 = vpop.f32.mrb[2].mxu0  ;;  %v1065_v18 = vmul.f32 %v420_v5, %v420_v5  ;;  %v2176_v57 = vpop.f32.mrb[0].mxu1 }
  0xf8   :  { %v1354_v19 = vpack.c.bf16 %v1596_v52, %v1595_v9  ;;  %v423_v41 = vpop.f32.mrb[3].mxu0  ;;  %v1068_v26 = vmul.f32 %v1596_v52, %v1596_v52  ;;  %v2181_v59 = vpop.f32.mrb[1].mxu1 }
  0xf9   :  { %v1349_v22 = vpack.c.bf16 %v423_v41, %v420_v5  ;;  %v995_v24 = vadd.f32 %v423_v41, %v420_v5  ;;  %v1066_v25 = vmul.f32 %v423_v41, %v423_v41  ;;  %v2186_v61 = vpop.f32.mrb[2].mxu1 }
  0xfa   :  { %1506 = vst [vmem:[%s2471_s4 + $0x8] sm:$0xff] %v1354_v19   ;;  %v1434_v50 = vpack.c.bf16 %v2186_v61, %v2176_v57  ;;  %v2190_v32 = vpop.f32.mrb[3].mxu1 }
  0xfb   :  { %1350 = vst [vmem:[%s2471_s4] sm:$0xff] %v1349_v22   ;;  %v996_v21 = vadd.f32 %v1595_v9, %v995_v24  ;;  %v1129_v38 = vadd.f32 %v1066_v25, %v1065_v18  ;;  %v1429_v23 = vpack.c.bf16 %v2190_v32, %v2181_v59 }
  0xfc   :  { %1522 = vst [vmem:[%s2471_s4 + $0x88] sm:$0xff] %v1434_v50  }
  0xfd   :  { %v1130_v29 = vadd.f32 %v1129_v38, %v1067_v13  ;;  %v1599_v30 = vpop.f32.mrb[4].mxu0  ;;  %v997_v31 = vadd.f32 %v1596_v52, %v996_v21  ;;  %1521 = vst [vmem:[%s2471_s4 + $0x80] sm:$0xff] %v1429_v23  }
  0xfe   :  { %v436_v36 = vpop.f32.mrb[5].mxu0  ;;  %v1071_v60 = vmul.f32 %v1599_v30, %v1599_v30 }
  0xff   :  { %v998_v37 = vadd.f32 %v997_v31, %v436_v36  ;;  %v1069_v42 = vmul.f32 %v436_v36, %v436_v36  ;;  %v1131_v43 = vadd.f32 %v1130_v29, %v1068_v26  ;;  %v1600_v46 = vpop.f32.mrb[6].mxu0 }
 0x100   :  { %v1364_v47 = vpack.c.bf16 %v1600_v46, %v1599_v30  ;;  %v439_v48 = vpop.f32.mrb[7].mxu0  ;;  %v1072_v62 = vmul.f32 %v1600_v46, %v1600_v46 }
 0x101   :  { %v1132_v51 = vadd.f32 %v1131_v43, %v1069_v42  ;;  %v1359_v53 = vpack.c.bf16 %v439_v48, %v436_v36  ;;  %v999_v55 = vadd.f32 %v998_v37, %v439_v48  ;;  %v1070_v56 = vmul.f32 %v439_v48, %v439_v48 }
 0x102   :  { %1508 = vst [vmem:[%s2471_s4 + $0x18] sm:$0xff] %v1364_v47  }
 0x103   :  { %1507 = vst [vmem:[%s2471_s4 + $0x10] sm:$0xff] %v1359_v53   ;;  %v1000_v45 = vadd.f32 %v1599_v30, %v999_v55  ;;  %v1133_v49 = vadd.f32 %v1132_v51, %v1070_v56  ;;  %v2203_v11 = vpop.f32.mrb[4].mxu1 }
 0x104   :  { %v2208_v12 = vpop.f32.mrb[5].mxu1 }
 0x105   :  { %v1134_v33 = vadd.f32 %v1133_v49, %v1071_v60  ;;  %v1603_v0 = vpop.f32.mrb[8].mxu0  ;;  %v1001_v16 = vadd.f32 %v1600_v46, %v1000_v45  ;;  %v2213_v8 = vpop.f32.mrb[6].mxu1 }
 0x106   :  { %v452_v35 = vpop.f32.mrb[9].mxu0  ;;  %v1075_v20 = vmul.f32 %v1603_v0, %v1603_v0  ;;  %v1444_v28 = vpack.c.bf16 %v2213_v8, %v2203_v11  ;;  %v2217_v14 = vpop.f32.mrb[7].mxu1 }
 0x107   :  { %v1002_v39 = vadd.f32 %v1001_v16, %v452_v35  ;;  %v1073_v54 = vmul.f32 %v452_v35, %v452_v35  ;;  %v1135_v58 = vadd.f32 %v1134_v33, %v1072_v62  ;;  %v1604_v1 = vpop.f32.mrb[10].mxu0  ;;  %v1439_v9 = vpack.c.bf16 %v2217_v14, %v2208_v12 }
 0x108   :  { %v1374_v3 = vpack.c.bf16 %v1604_v1, %v1603_v0  ;;  %v455_v6 = vpop.f32.mrb[11].mxu0  ;;  %v1076_v15 = vmul.f32 %v1604_v1, %v1604_v1  ;;  %1524 = vst [vmem:[%s2471_s4 + $0x98] sm:$0xff] %v1444_v28  }
 0x109   :  { %v1136_v27 = vadd.f32 %v1135_v58, %v1073_v54  ;;  %v1369_v4 = vpack.c.bf16 %v455_v6, %v452_v35  ;;  %v1003_v7 = vadd.f32 %v1002_v39, %v455_v6  ;;  %v1074_v10 = vmul.f32 %v455_v6, %v455_v6  ;;  %1523 = vst [vmem:[%s2471_s4 + $0x90] sm:$0xff] %v1439_v9  }
 0x10a   :  { %1510 = vst [vmem:[%s2471_s4 + $0x28] sm:$0xff] %v1374_v3  }
 0x10b   :  { %1509 = vst [vmem:[%s2471_s4 + $0x20] sm:$0xff] %v1369_v4   ;;  %v1004_v2 = vadd.f32 %v1603_v0, %v1003_v7  ;;  %v1137_v63 = vadd.f32 %v1136_v27, %v1074_v10  ;;  %v2227_v26 = vpop.f32.mrb[8].mxu1 }
 0x10c   :  { %v2232_v29 = vpop.f32.mrb[9].mxu1 }
 0x10d   :  { %v1138_v40 = vadd.f32 %v1137_v63, %v1075_v20  ;;  %v1607_v44 = vpop.f32.mrb[12].mxu0  ;;  %v1005_v17 = vadd.f32 %v1604_v1, %v1004_v2  ;;  %v2237_v37 = vpop.f32.mrb[10].mxu1 }
 0x10e   :  { %v468_v5 = vpop.f32.mrb[13].mxu0  ;;  %v1079_v30 = vmul.f32 %v1607_v44, %v1607_v44  ;;  %v1454_v42 = vpack.c.bf16 %v2237_v37, %v2227_v26  ;;  %v2241_v43 = vpop.f32.mrb[11].mxu1 }
 0x10f   :  { %v1006_v52 = vadd.f32 %v1005_v17, %v468_v5  ;;  %v1077_v19 = vmul.f32 %v468_v5, %v468_v5  ;;  %v1139_v41 = vadd.f32 %v1138_v40, %v1076_v15  ;;  %v1608_v18 = vpop.f32.mrb[14].mxu0  ;;  %v1449_v53 = vpack.c.bf16 %v2241_v43, %v2232_v29 }
 0x110   :  { %v1384_v22 = vpack.c.bf16 %v1608_v18, %v1607_v44  ;;  %v471_v24 = vpop.f32.mrb[15].mxu0  ;;  %v1080_v46 = vmul.f32 %v1608_v18, %v1608_v18  ;;  %1526 = vst [vmem:[%s2471_s4 + $0xa8] sm:$0xff] %v1454_v42  }
 0x111   :  { %v1140_v25 = vadd.f32 %v1139_v41, %v1077_v19  ;;  %v1379_v13 = vpack.c.bf16 %v471_v24, %v468_v5  ;;  %v1007_v21 = vadd.f32 %v1006_v52, %v471_v24  ;;  %v1078_v38 = vmul.f32 %v471_v24, %v471_v24  ;;  %1525 = vst [vmem:[%s2471_s4 + $0xa0] sm:$0xff] %v1449_v53  }
 0x112   :  { %1512 = vst [vmem:[%s2471_s4 + $0x38] sm:$0xff] %v1384_v22  }
 0x113   :  { %1511 = vst [vmem:[%s2471_s4 + $0x30] sm:$0xff] %v1379_v13   ;;  %v1008_v31 = vadd.f32 %v1607_v44, %v1007_v21  ;;  %v1141_v36 = vadd.f32 %v1140_v25, %v1078_v38  ;;  %v2251_v34 = vpop.f32.mrb[12].mxu1 }
 0x114   :  { %v2256_v35 = vpop.f32.mrb[13].mxu1 }
 0x115   :  { %v1142_v47 = vadd.f32 %v1141_v36, %v1079_v30  ;;  %v1611_v48 = vpop.f32.mrb[16].mxu0  ;;  %v1009_v51 = vadd.f32 %v1608_v18, %v1008_v31  ;;  %v2261_v1 = vpop.f32.mrb[14].mxu1 }
 0x116   :  { %v484_v55 = vpop.f32.mrb[17].mxu0  ;;  %v1083_v39 = vmul.f32 %v1611_v48, %v1611_v48  ;;  %v1464_v3 = vpack.c.bf16 %v2261_v1, %v2251_v34  ;;  %v2265_v6 = vpop.f32.mrb[15].mxu1 }
 0x117   :  { %v1010_v56 = vadd.f32 %v1009_v51, %v484_v55  ;;  %v1081_v60 = vmul.f32 %v484_v55, %v484_v55  ;;  %v1143_v45 = vadd.f32 %v1142_v47, %v1080_v46  ;;  %v1612_v49 = vpop.f32.mrb[18].mxu0  ;;  %v1459_v20 = vpack.c.bf16 %v2265_v6, %v2256_v35 }
 0x118   :  { %v1394_v50 = vpack.c.bf16 %v1612_v49, %v1611_v48  ;;  %v487_v62 = vpop.f32.mrb[19].mxu0  ;;  %v1084_v27 = vmul.f32 %v1612_v49, %v1612_v49  ;;  %1528 = vst [vmem:[%s2471_s4 + $0xb8] sm:$0xff] %v1464_v3  }
 0x119   :  { %v1144_v33 = vadd.f32 %v1143_v45, %v1081_v60  ;;  %v1389_v0 = vpack.c.bf16 %v487_v62, %v484_v55  ;;  %v1011_v16 = vadd.f32 %v1010_v56, %v487_v62  ;;  %v1082_v23 = vmul.f32 %v487_v62, %v487_v62  ;;  %1527 = vst [vmem:[%s2471_s4 + $0xb0] sm:$0xff] %v1459_v20  }
 0x11a   :  { %1514 = vst [vmem:[%s2471_s4 + $0x48] sm:$0xff] %v1394_v50  }
 0x11b   :  { %1513 = vst [vmem:[%s2471_s4 + $0x40] sm:$0xff] %v1389_v0   ;;  %v1012_v54 = vadd.f32 %v1611_v48, %v1011_v16  ;;  %v1145_v58 = vadd.f32 %v1144_v33, %v1082_v23  ;;  %v2275_v41 = vpop.f32.mrb[16].mxu1 }
 0x11c   :  { %v2280_v18 = vpop.f32.mrb[17].mxu1 }
 0x11d   :  { %v1146_v4 = vadd.f32 %v1145_v58, %v1083_v39  ;;  %v1615_v7 = vpop.f32.mrb[20].mxu0  ;;  %v1013_v10 = vadd.f32 %v1612_v49, %v1012_v54  ;;  %v2285_v13 = vpop.f32.mrb[18].mxu1 }
 0x11e   :  { %v500_v2 = vpop.f32.mrb[21].mxu0  ;;  %v1087_v22 = vmul.f32 %v1615_v7, %v1615_v7  ;;  %v1474_v21 = vpack.c.bf16 %v2285_v13, %v2275_v41  ;;  %v2289_v38 = vpop.f32.mrb[19].mxu1 }
 0x11f   :  { %v1014_v63 = vadd.f32 %v1013_v10, %v500_v2  ;;  %v1085_v28 = vmul.f32 %v500_v2, %v500_v2  ;;  %v1147_v15 = vadd.f32 %v1146_v4, %v1084_v27  ;;  %v1616_v40 = vpop.f32.mrb[22].mxu0  ;;  %v1469_v46 = vpack.c.bf16 %v2289_v38, %v2280_v18 }
 0x120   :  { %v1404_v44 = vpack.c.bf16 %v1616_v40, %v1615_v7  ;;  %v503_v17 = vpop.f32.mrb[23].mxu0  ;;  %v1088_v30 = vmul.f32 %v1616_v40, %v1616_v40  ;;  %1530 = vst [vmem:[%s2471_s4 + $0xc8] sm:$0xff] %v1474_v21  }
 0x121   :  { %v1148_v9 = vadd.f32 %v1147_v15, %v1085_v28  ;;  %v1399_v5 = vpack.c.bf16 %v503_v17, %v500_v2  ;;  %v1015_v52 = vadd.f32 %v1014_v63, %v503_v17  ;;  %v1086_v19 = vmul.f32 %v503_v17, %v503_v17  ;;  %1529 = vst [vmem:[%s2471_s4 + $0xc0] sm:$0xff] %v1469_v46  }
 0x122   :  { %1516 = vst [vmem:[%s2471_s4 + $0x58] sm:$0xff] %v1404_v44  }
 0x123   :  { %1515 = vst [vmem:[%s2471_s4 + $0x50] sm:$0xff] %v1399_v5   ;;  %v1016_v24 = vadd.f32 %v1615_v7, %v1015_v52  ;;  %v1149_v25 = vadd.f32 %v1148_v9, %v1086_v19  ;;  %v2299_v33 = vpop.f32.mrb[20].mxu1 }
 0x124   :  { %v2304_v0 = vpop.f32.mrb[21].mxu1 }
 0x125   :  { %v1150_v31 = vadd.f32 %v1149_v25, %v1087_v22  ;;  %v1619_v36 = vpop.f32.mrb[24].mxu0  ;;  %v1017_v42 = vadd.f32 %v1616_v40, %v1016_v24  ;;  %v2309_v54 = vpop.f32.mrb[22].mxu1 }
 0x126   :  { %v516_v47 = vpop.f32.mrb[25].mxu0  ;;  %v1091_v16 = vmul.f32 %v1619_v36, %v1619_v36  ;;  %v1484_v58 = vpack.c.bf16 %v2309_v54, %v2299_v33  ;;  %v2313_v3 = vpop.f32.mrb[23].mxu1 }
 0x127   :  { %v1018_v48 = vadd.f32 %v1017_v42, %v516_v47  ;;  %v1089_v51 = vmul.f32 %v516_v47, %v516_v47  ;;  %v1151_v53 = vadd.f32 %v1150_v31, %v1088_v30  ;;  %v1620_v55 = vpop.f32.mrb[26].mxu0  ;;  %v1479_v20 = vpack.c.bf16 %v2313_v3, %v2304_v0 }
 0x128   :  { %v1414_v56 = vpack.c.bf16 %v1620_v55, %v1619_v36  ;;  %v519_v60 = vpop.f32.mrb[27].mxu0  ;;  %v1092_v27 = vmul.f32 %v1620_v55, %v1620_v55  ;;  %1532 = vst [vmem:[%s2471_s4 + $0xd8] sm:$0xff] %v1484_v58   ;;  %v1100_v58 = vmul.f32 %v2186_v61, %v2186_v61 }
 0x129   :  { %v1152_v45 = vadd.f32 %v1151_v53, %v1089_v51  ;;  %v1409_v49 = vpack.c.bf16 %v519_v60, %v516_v47  ;;  %v1019_v50 = vadd.f32 %v1018_v48, %v519_v60  ;;  %v1090_v62 = vmul.f32 %v519_v60, %v519_v60  ;;  %1531 = vst [vmem:[%s2471_s4 + $0xd0] sm:$0xff] %v1479_v20  }
 0x12a   :  { %1518 = vst [vmem:[%s2471_s4 + $0x68] sm:$0xff] %v1414_v56  }
 0x12b   :  { %1517 = vst [vmem:[%s2471_s4 + $0x60] sm:$0xff] %v1409_v49   ;;  %v1020_v23 = vadd.f32 %v1619_v36, %v1019_v50  ;;  %v1153_v39 = vadd.f32 %v1152_v45, %v1090_v62  ;;  %v2323_v22 = vpop.f32.mrb[24].mxu1  ;;  %v1097_v36 = vmul.f32 %v2181_v59, %v2181_v59  ;;  %v1098_v49 = vmul.f32 %v2190_v32, %v2190_v32 }
 0x12c   :  { %v2328_v24 = vpop.f32.mrb[25].mxu1 }
 0x12d   :  { %v1154_v4 = vadd.f32 %v1153_v39, %v1091_v16  ;;  %v1623_v7 = vpop.f32.mrb[28].mxu0  ;;  %v1021_v10 = vadd.f32 %v1620_v55, %v1020_v23  ;;  %v2333_v31 = vpop.f32.mrb[26].mxu1  ;;  %v1099_v16 = vmul.f32 %v2176_v57, %v2176_v57 }
 0x12e   :  { %v532_v2 = vpop.f32.mrb[29].mxu0  ;;  %v1095_v25 = vmul.f32 %v1623_v7, %v1623_v7  ;;  %v1494_v42 = vpack.c.bf16 %v2333_v31, %v2323_v22  ;;  %v2339_v46 = vpop.f32.mrb[27].mxu1 }
 0x12f   :  { %v1022_v63 = vadd.f32 %v1021_v10, %v532_v2  ;;  %v1093_v28 = vmul.f32 %v532_v2, %v532_v2  ;;  %v1155_v15 = vadd.f32 %v1154_v4, %v1092_v27  ;;  %v1624_v40 = vpop.f32.mrb[30].mxu0  ;;  %v1489_v53 = vpack.c.bf16 %v2339_v46, %v2328_v24 }
 0x130   :  { %v1424_v44 = vpack.c.bf16 %v1624_v40, %v1623_v7  ;;  %v535_v17 = vpop.f32.mrb[31].mxu0  ;;  %v1096_v47 = vmul.f32 %v1624_v40, %v1624_v40  ;;  %1534 = vst [vmem:[%s2471_s4 + $0xe8] sm:$0xff] %v1494_v42   ;;  %v1101_v10 = vmul.f32 %v2208_v12, %v2208_v12 }
 0x131   :  { %v1156_v9 = vadd.f32 %v1155_v15, %v1093_v28  ;;  %v1419_v5 = vpack.c.bf16 %v535_v17, %v532_v2  ;;  %v1023_v52 = vadd.f32 %v1022_v63, %v535_v17  ;;  %v1094_v19 = vmul.f32 %v535_v17, %v535_v17  ;;  %1533 = vst [vmem:[%s2471_s4 + $0xe0] sm:$0xff] %v1489_v53  }
 0x132   :  { %1520 = vst [vmem:[%s2471_s4 + $0x78] sm:$0xff] %v1424_v44   ;;  %v1102_v28 = vmul.f32 %v2217_v14, %v2217_v14  ;;  %v1103_v15 = vmul.f32 %v2203_v11, %v2203_v11 }
 0x133   :  { %1519 = vst [vmem:[%s2471_s4 + $0x70] sm:$0xff] %v1419_v5   ;;  %v1024_v21 = vadd.f32 %v1623_v7, %v1023_v52  ;;  %v1157_v30 = vadd.f32 %v1156_v9, %v1094_v19  ;;  %v2353_v50 = vpop.f32.mrb[28].mxu1  ;;  %v1105_v5 = vmul.f32 %v2232_v29, %v2232_v29 }
 0x134   :  { %v2355_v62 = vpop.f32.mrb[29].mxu1 }
 0x135   :  { %v1158_v48 = vadd.f32 %v1157_v30, %v1095_v25  ;;  %v1025_v51 = vadd.f32 %v1624_v40, %v1024_v21  ;;  %v2360_v39 = vpop.f32.mrb[30].mxu1  ;;  %v1106_v21 = vmul.f32 %v2241_v43, %v2241_v43 }
 0x136   :  { %v1504_v27 = vpack.c.bf16 %v2360_v39, %v2353_v50  ;;  %v2366_v4 = vpop.f32.mrb[31].mxu1 }
 0x137   :  { %v1026_v55 = vadd.f32 %v1025_v51, %v2181_v59  ;;  %v1159_v56 = vadd.f32 %v1158_v48, %v1096_v47 }
 0x138   :  { %1536 = vst [vmem:[%s2471_s4 + $0xf8] sm:$0xff] %v1504_v27  }
 0x139   :  { %v1160_v60 = vadd.f32 %v1159_v56, %v1097_v36  ;;  %v1027_v45 = vadd.f32 %v1026_v55, %v2190_v32  ;;  %v1110_v55 = vmul.f32 %v2265_v6, %v2265_v6 }
 0x13b   :  { %v1028_v59 = vadd.f32 %v2176_v57, %v1027_v45  ;;  %v1161_v23 = vadd.f32 %v1160_v60, %v1098_v49  ;;  %v1499_v57 = vpack.c.bf16 %v2366_v4, %v2355_v62 }
 0x13d   :  { %v1162_v32 = vadd.f32 %v1161_v23, %v1099_v16  ;;  %v1029_v7 = vadd.f32 %v2186_v61, %v1028_v59  ;;  %1535 = vst [vmem:[%s2471_s4 + $0xf0] sm:$0xff] %v1499_v57  }
 0x13f   :  { %v1030_v20 = vadd.f32 %v1029_v7, %v2208_v12  ;;  %v1163_v2 = vadd.f32 %v1162_v32, %v1100_v58  ;;  %v1104_v12 = vmul.f32 %v2213_v8, %v2213_v8  ;;  %v1114_v58 = vmul.f32 %v2289_v38, %v2289_v38 }
 0x141   :  { %v1164_v63 = vadd.f32 %v1163_v2, %v1101_v10  ;;  %v1031_v61 = vadd.f32 %v1030_v20, %v2217_v14 }
 0x143   :  { %v1032_v40 = vadd.f32 %v2203_v11, %v1031_v61  ;;  %v1165_v44 = vadd.f32 %v1164_v63, %v1102_v28  ;;  %v1107_v11 = vmul.f32 %v2227_v26, %v2227_v26  ;;  %v1118_v63 = vmul.f32 %v2313_v3, %v2313_v3 }
 0x145   :  { %v1166_v17 = vadd.f32 %v1165_v44, %v1103_v15  ;;  %v1033_v9 = vadd.f32 %v2213_v8, %v1032_v40  ;;  %v1108_v8 = vmul.f32 %v2237_v37, %v2237_v37 }
 0x147   :  { %v1034_v52 = vadd.f32 %v1033_v9, %v2232_v29  ;;  %v1167_v19 = vadd.f32 %v1166_v17, %v1104_v12  ;;  %v1109_v29 = vmul.f32 %v2256_v35, %v2256_v35  ;;  %v1122_v9 = vmul.f32 %v2339_v46, %v2339_v46 }
 0x149   :  { %v1168_v25 = vadd.f32 %v1167_v19, %v1105_v5  ;;  %v1035_v14 = vadd.f32 %v1034_v52, %v2241_v43 }
 0x14b   :  { %v1036_v30 = vadd.f32 %v2227_v26, %v1035_v14  ;;  %v1169_v36 = vadd.f32 %v1168_v25, %v1106_v21  ;;  %v1111_v26 = vmul.f32 %v2251_v34, %v2251_v34 }
 0x14d   :  { %v1170_v42 = vadd.f32 %v1169_v36, %v1107_v11  ;;  %v1037_v47 = vadd.f32 %v2237_v37, %v1036_v30  ;;  %v1112_v37 = vmul.f32 %v2261_v1, %v2261_v1  ;;  %v1126_v30 = vmul.f32 %v2366_v4, %v2366_v4 }
 0x14f   :  { %v1038_v48 = vadd.f32 %v1037_v47, %v2256_v35  ;;  %v1171_v51 = vadd.f32 %v1170_v42, %v1108_v8  ;;  %v1113_v35 = vmul.f32 %v2280_v18, %v2280_v18 }
 0x151   :  { %v1172_v53 = vadd.f32 %v1171_v51, %v1109_v29  ;;  %v1039_v43 = vadd.f32 %v1038_v48, %v2265_v6 }
 0x153   :  { %v1040_v56 = vadd.f32 %v2251_v34, %v1039_v43  ;;  %v1173_v60 = vadd.f32 %v1172_v53, %v1110_v55  ;;  %v1115_v34 = vmul.f32 %v2275_v41, %v2275_v41 }
 0x155   :  { %v1174_v45 = vadd.f32 %v1173_v60, %v1111_v26  ;;  %v1041_v49 = vadd.f32 %v2261_v1, %v1040_v56  ;;  %v1116_v1 = vmul.f32 %v2285_v13, %v2285_v13 }
 0x157   :  { %v1042_v16 = vadd.f32 %v1041_v49, %v2280_v18  ;;  %v1175_v59 = vadd.f32 %v1174_v45, %v1112_v37  ;;  %v1117_v18 = vmul.f32 %v2304_v0, %v2304_v0 }
 0x159   :  { %v1176_v23 = vadd.f32 %v1175_v59, %v1113_v35  ;;  %v1043_v6 = vadd.f32 %v1042_v16, %v2289_v38 }
 0x15b   :  { %v1044_v27 = vadd.f32 %v2275_v41, %v1043_v6  ;;  %v1177_v32 = vadd.f32 %v1176_v23, %v1114_v58  ;;  %v1119_v41 = vmul.f32 %v2299_v33, %v2299_v33 }
 0x15d   :  { %v1178_v7 = vadd.f32 %v1177_v32, %v1115_v34  ;;  %v1045_v10 = vadd.f32 %v2285_v13, %v1044_v27  ;;  %v1120_v13 = vmul.f32 %v2309_v54, %v2309_v54 }
 0x15f   :  { %v1046_v57 = vadd.f32 %v1045_v10, %v2304_v0  ;;  %v1179_v20 = vadd.f32 %v1178_v7, %v1116_v1  ;;  %v1121_v0 = vmul.f32 %v2328_v24, %v2328_v24 }
 0x161   :  { %v1180_v2 = vadd.f32 %v1179_v20, %v1117_v18  ;;  %v1047_v38 = vadd.f32 %v1046_v57, %v2313_v3 }
 0x163   :  { %v1048_v61 = vadd.f32 %v2299_v33, %v1047_v38  ;;  %v1181_v28 = vadd.f32 %v1180_v2, %v1118_v63  ;;  %v1123_v33 = vmul.f32 %v2323_v22, %v2323_v22 }
 0x165   :  { %v1182_v15 = vadd.f32 %v1181_v28, %v1119_v41  ;;  %v1049_v40 = vadd.f32 %v2309_v54, %v1048_v61  ;;  %v1124_v54 = vmul.f32 %v2333_v31, %v2333_v31 }
 0x167   :  { %v1050_v44 = vadd.f32 %v1049_v40, %v2328_v24  ;;  %v1183_v12 = vadd.f32 %v1182_v15, %v1120_v13  ;;  %v1125_v24 = vmul.f32 %v2355_v62, %v2355_v62 }
 0x169   :  { %v1184_v17 = vadd.f32 %v1183_v12, %v1121_v0  ;;  %v1051_v3 = vadd.f32 %v1050_v44, %v2339_v46 }
 0x16b   :  { %v1052_v5 = vadd.f32 %v2323_v22, %v1051_v3  ;;  %v1185_v52 = vadd.f32 %v1184_v17, %v1122_v9  ;;  %v1127_v22 = vmul.f32 %v2353_v50, %v2353_v50 }
 0x16d   :  { %v1186_v19 = vadd.f32 %v1185_v52, %v1123_v33  ;;  %v1053_v25 = vadd.f32 %v2333_v31, %v1052_v5  ;;  %v1128_v31 = vmul.f32 %v2360_v39, %v2360_v39 }
 0x16f   :  { %v1054_v14 = vadd.f32 %v1053_v25, %v2355_v62  ;;  %v1187_v21 = vadd.f32 %v1186_v19, %v1124_v54 }
 0x171   :  { %v1188_v11 = vadd.f32 %v1187_v21, %v1125_v24  ;;  %v1055_v46 = vadd.f32 %v1054_v14, %v2366_v4 }
 0x173   :  { %v1056_v36 = vadd.f32 %v2353_v50, %v1055_v46  ;;  %v1189_v8 = vadd.f32 %v1188_v11, %v1126_v30 }
 0x175   :  { %v1057_v42 = vadd.f32 %v2360_v39, %v1056_v36  ;;  %v1190_v47 = vadd.f32 %v1189_v8, %v1127_v22 }
 0x177   :  { %v1058_v62 = vrot.slane %v1057_v42, 4  ;;  %v1191_v29 = vadd.f32 %v1190_v47, %v1128_v31 }
 0x179   :  { %v1059_v48 = vadd.f32 %v1058_v62, %v1057_v42  ;;  %v1192_v51 = vrot.slane %v1191_v29, 4 }
 0x17b   :  { %v1060_v53 = vrot.slane %v1059_v48, 2  ;;  %v1193_v43 = vadd.f32 %v1192_v51, %v1191_v29 }
 0x17d   :  { %v1061_v55 = vadd.f32 %v1060_v53, %v1059_v48  ;;  %v1194_v4 = vrot.slane %v1193_v43, 2 }
 0x17f   :  { %v1062_v26 = vrot.slane %v1061_v55, 1  ;;  %v1195_v56 = vadd.f32 %v1194_v4, %v1193_v43 }
 0x181   :  { %v1063_v60 = vadd.f32 %v1062_v26, %v1061_v55  ;;  %v1196_v37 = vrot.slane %v1195_v56, 1 }
 0x183   :  { %1064 = vst [vmem:[%s2472_s5] sm:$0x1] %v1063_v60  ;;  %v1197_v50 = vadd.f32 %v1196_v37, %v1195_v56 }
 0x185   :  { %1198 = vst [vmem:[%s2472_s5 + $0x1] sm:$0x1] %v1197_v50 }

// kernel: residual_block_forward.7
= control target key start
LH: loop header
LB: loop body
LE: loop exit
PB: predicated region body
PF: predicated region fallthrough
CT: control target
= control target key end

     0   :  { %s695_s0 = inlined_call_operand.vmem [shape: bf16[128,128], index: 0, kind: input, shape index: {}]   ;;  %s696_s1 = inlined_call_operand.vmem [shape: f32[1,128], index: 1, kind: input, shape index: {}]   ;;  %s697_s2 = inlined_call_operand.vmem [shape: f32[1,128], index: 2, kind: input, shape index: {}]   ;;  %s698_s3 = inlined_call_operand.vmem [shape: bf16[128,128], index: 3, kind: input, shape index: {}]   ;;  %s699_s4 = inlined_call_operand.vmem [shape: bf16[128,128], index: 4, kind: input, shape index: {}]   ;;  %s700_s5 = inlined_call_operand.hbm [shape: f32[128,128], index: 5, kind: output, shape index: {}]  }
   0x1   :  { %v504_v0 = vld [vmem:[%s698_s3] sm:$0xff]   ;;  %v505_v1 = vld [vmem:[%s698_s3 + $0x8] sm:$0xff]   ;;  %v506_v2 = vld [vmem:[%s698_s3 + $0x10] sm:$0xff]  }
   0x2   :  { %453 = vmatprep.subr.bf16.mxu0 %v504_v0  ;;  %485 = vmatprep.subr.bf16.mxu1 %v504_v0  ;;  %v507_v3 = vld [vmem:[%s698_s3 + $0x18] sm:$0xff]   ;;  %v360_v4 = vld [vmem:[%s695_s0] sm:$0xff]   ;;  %v423_v9 = vld [vmem:[%s695_s0 + $0x8] sm:$0xff]  }
   0x3   :  { %454 = vmatpush3.bf16.msra.mxu0 %v504_v0  ;;  %493 = vmatpush3.bf16.msra.mxu1 %v504_v0  ;;  %v587_v5 = vld [vmem:[%s696_s1] ss:$0 sm:$0xff]  ;;  %v361_v6 = vunpack.c.l.bf16 %v360_v4  ;;  %v362_v7 = vunpack.c.h.bf16 %v360_v4  ;;  %v427_v13 = vld [vmem:[%s695_s0 + $0x28] sm:$0xff]   ;;  %v424_v16 = vld [vmem:[%s695_s0 + $0x10] sm:$0xff]  }
   0x4   :  { %455 = vmatprep.subr.bf16.mxu0 %v505_v1  ;;  %486 = vmatprep.subr.bf16.mxu1 %v505_v1  ;;  %v426_v8 = vld [vmem:[%s695_s0 + $0x20] sm:$0xff]  }
   0x5   :  { %v598_v10 = vld [vmem:[%s697_s2] ss:$0 sm:$0xff]  ;;  %v377_v11 = vunpack.c.l.bf16 %v426_v8  ;;  %v378_v12 = vunpack.c.h.bf16 %v426_v8  ;;  %v61_v14 = vmul.f32 %v361_v6, %v587_v5  ;;  %v62_v15 = vmul.f32 %v362_v7, %v587_v5 }
   0x7   :  { %456 = vmatpush3.bf16.msra.mxu0 %v505_v1  ;;  %494 = vmatpush3.bf16.msra.mxu1 %v505_v1 }
   0x8   :  { %457 = vmatprep.subr.bf16.mxu0 %v506_v2  ;;  %487 = vmatprep.subr.bf16.mxu1 %v506_v2 }
   0xb   :  { %458 = vmatpush3.bf16.msra.mxu0 %v506_v2  ;;  %495 = vmatpush3.bf16.msra.mxu1 %v506_v2 }
   0xc   :  { %10 = vsyncpa [#allocation3], 0  ;;  %459 = vmatprep.subr.bf16.mxu0 %v507_v3  ;;  %488 = vmatprep.subr.bf16.mxu1 %v507_v3  ;;  %v508_v17 = vld [vmem:[%s698_s3 + $0x20] sm:$0xff]   ;;  %v69_v18 = vmul.f32 %v377_v11, %v587_v5  ;;  %v70_v19 = vmul.f32 %v378_v12, %v587_v5  ;;  %v365_v20 = vunpack.c.l.bf16 %v423_v9  ;;  %v366_v21 = vunpack.c.h.bf16 %v423_v9  ;;  %v428_v31 = vld [vmem:[%s695_s0 + $0x30] sm:$0xff]   ;;  %s536_s14 = smov [#allocation2]  }
   0xd   :  { %v84_v22 = vadd.f32 %v598_v10, %v61_v14  ;;  %v85_v23 = vadd.f32 %v598_v10, %v62_v15  ;;  %v381_v24 = vunpack.c.l.bf16 %v427_v13  ;;  %v382_v25 = vunpack.c.h.bf16 %v427_v13  ;;  %v509_v32 = vld [vmem:[%s698_s3 + $0x28] sm:$0xff]   ;;  %v425_v44 = vld [vmem:[%s695_s0 + $0x18] sm:$0xff]   ;;  %v510_v48 = vld [vmem:[%s698_s3 + $0x30] sm:$0xff]  }
   0xe   :  { %v92_v26 = vadd.f32 %v598_v10, %v69_v18  ;;  %v93_v27 = vadd.f32 %v598_v10, %v70_v19  ;;  %v369_v28 = vunpack.c.l.bf16 %v424_v16  ;;  %v63_v35 = vmul.f32 %v365_v20, %v587_v5  ;;  %v429_v47 = vld [vmem:[%s695_s0 + $0x38] sm:$0xff]  }
   0xf   :  { %460 = vmatpush3.bf16.msra.mxu0 %v507_v3  ;;  %496 = vmatpush3.bf16.msra.mxu1 %v507_v3  ;;  %v100_v29 = vmax.f32 %v84_v22, 0.0  ;;  %v101_v30 = vmax.f32 %v85_v23, 0.0  ;;  %v64_v36 = vmul.f32 %v366_v21, %v587_v5  ;;  %v71_v38 = vmul.f32 %v381_v24, %v587_v5  ;;  %v511_v63 = vld [vmem:[%s698_s3 + $0x38] sm:$0xff]  }
  0x10   :  { %461 = vmatprep.subr.bf16.mxu0 %v508_v17  ;;  %489 = vmatprep.subr.bf16.mxu1 %v508_v17  ;;  %v108_v33 = vmax.f32 %v92_v26, 0.0  ;;  %v109_v34 = vmax.f32 %v93_v27, 0.0  ;;  %v72_v39 = vmul.f32 %v382_v25, %v587_v5  ;;  %v370_v40 = vunpack.c.h.bf16 %v424_v16  ;;  %v434_v27 = vld [vmem:[%s699_s4 + $0x28] sm:$0xff]  }
  0x11   :  { %v116_v37 = vpack.c.bf16 %v101_v30, %v100_v29  ;;  %v65_v42 = vmul.f32 %v369_v28, %v587_v5  ;;  %v385_v43 = vunpack.c.l.bf16 %v428_v31  ;;  %v386_v46 = vunpack.c.h.bf16 %v428_v31  ;;  %v392_v28 = vld [vmem:[%s699_s4] sm:$0xff]  }
  0x12   :  { %v120_v41 = vpack.c.bf16 %v109_v34, %v108_v33  ;;  %v66_v45 = vmul.f32 %v370_v40, %v587_v5  ;;  %v86_v49 = vadd.f32 %v598_v10, %v63_v35  ;;  %v87_v50 = vadd.f32 %v598_v10, %v64_v36  ;;  %v433_v29 = vld [vmem:[%s699_s4 + $0x20] sm:$0xff]  }
  0x13   :  { %462 = vmatpush3.bf16.msra.mxu0 %v508_v17  ;;  %497 = vmatpush3.bf16.msra.mxu1 %v508_v17  ;;  %v73_v51 = vmul.f32 %v385_v43, %v587_v5  ;;  %v94_v52 = vadd.f32 %v598_v10, %v71_v38  ;;  %v95_v53 = vadd.f32 %v598_v10, %v72_v39  ;;  %v373_v55 = vunpack.c.l.bf16 %v425_v44 }
  0x14   :  { %463 = vmatprep.subr.bf16.mxu0 %v509_v32  ;;  %490 = vmatprep.subr.bf16.mxu1 %v509_v32  ;;  %v74_v54 = vmul.f32 %v386_v46, %v587_v5  ;;  %v88_v56 = vadd.f32 %v598_v10, %v65_v42  ;;  %v374_v57 = vunpack.c.h.bf16 %v425_v44  ;;  %v389_v58 = vunpack.c.l.bf16 %v429_v47 }
  0x15   :  { %469 = vmatprep.mubr.bf16.mxu0 %v116_v37  ;;  %477 = vmatprep.mubr.bf16.mxu1 %v120_v41  ;;  %v390_v59 = vunpack.c.h.bf16 %v429_v47  ;;  %v89_v60 = vadd.f32 %v598_v10, %v66_v45  ;;  %v96_v61 = vadd.f32 %v598_v10, %v73_v51  ;;  %v102_v0 = vmax.f32 %v86_v49, 0.0  ;;  %v436_v49 = vld [vmem:[%s699_s4 + $0x38] sm:$0xff]  }
  0x16   :  { %v97_v62 = vadd.f32 %v598_v10, %v74_v54  ;;  %v103_v1 = vmax.f32 %v87_v50, 0.0  ;;  %v110_v2 = vmax.f32 %v94_v52, 0.0  ;;  %v111_v3 = vmax.f32 %v95_v53, 0.0  ;;  %v431_v54 = vld [vmem:[%s699_s4 + $0x10] sm:$0xff]  }
  0x17   :  { %464 = vmatpush3.bf16.msra.mxu0 %v509_v32  ;;  %498 = vmatpush3.bf16.msra.mxu1 %v509_v32  ;;  %v67_v4 = vmul.f32 %v373_v55, %v587_v5  ;;  %v68_v6 = vmul.f32 %v374_v57, %v587_v5  ;;  %v75_v7 = vmul.f32 %v389_v58, %v587_v5  ;;  %v104_v9 = vmax.f32 %v88_v56, 0.0  ;;  %v435_v55 = vld [vmem:[%s699_s4 + $0x30] sm:$0xff]  }
  0x18   :  { %465 = vmatprep.subr.bf16.mxu0 %v510_v48  ;;  %491 = vmatprep.subr.bf16.mxu1 %v510_v48  ;;  %v76_v8 = vmul.f32 %v390_v59, %v587_v5  ;;  %v105_v11 = vmax.f32 %v89_v60, 0.0  ;;  %v112_v12 = vmax.f32 %v96_v61, 0.0  ;;  %v113_v13 = vmax.f32 %v97_v62, 0.0 }
  0x19   :  { %v117_v14 = vpack.c.bf16 %v103_v1, %v102_v0  ;;  %v121_v15 = vpack.c.bf16 %v111_v3, %v110_v2  ;;  %v90_v16 = vadd.f32 %v598_v10, %v67_v4  ;;  %v91_v17 = vadd.f32 %v598_v10, %v68_v6 }
  0x1a   :  { %v98_v18 = vadd.f32 %v598_v10, %v75_v7  ;;  %v99_v19 = vadd.f32 %v598_v10, %v76_v8  ;;  %v118_v5 = vpack.c.bf16 %v105_v11, %v104_v9  ;;  %v122_v20 = vpack.c.bf16 %v113_v13, %v112_v12  ;;  %v430_v10 = vld [vmem:[%s699_s4 + $0x8] sm:$0xff]  }
  0x1b   :  { %466 = vmatpush3.bf16.msra.mxu0 %v510_v48  ;;  %499 = vmatpush3.bf16.msra.mxu1 %v510_v48  ;;  %v106_v21 = vmax.f32 %v90_v16, 0.0  ;;  %v107_v22 = vmax.f32 %v91_v17, 0.0  ;;  %v397_v30 = vunpack.c.l.bf16 %v430_v10  ;;  %v413_v31 = vunpack.c.l.bf16 %v434_v27  ;;  %v432_v48 = vld [vmem:[%s699_s4 + $0x18] sm:$0xff]   ;;  %s338_s4 = sshll.u32 %s536_s14, 4  ;;  %s339_s4 = int_to_ptr.vmem [resolvable:$true] %s338_s4 }
  0x1c   :  { %467 = vmatprep.subr.bf16.mxu0 %v511_v63  ;;  %492 = vmatprep.subr.bf16.mxu1 %v511_v63  ;;  %v114_v23 = vmax.f32 %v98_v18, 0.0  ;;  %v115_v24 = vmax.f32 %v99_v19, 0.0  ;;  %v393_v32 = vunpack.c.l.bf16 %v392_v28  ;;  %v409_v33 = vunpack.c.l.bf16 %v433_v29  ;;  %s512_s15 = scalar_lea.vmem %s339_s4, 2048  ;;  %p517_p1 = scmp.lt.s32.totalorder %s339_s4, %s339_s4 }
  0x1d   :  { %v119_v25 = vpack.c.bf16 %v107_v22, %v106_v21  ;;  %v398_v34 = vunpack.c.h.bf16 %v430_v10  ;;  %v414_v35 = vunpack.c.h.bf16 %v434_v27  ;;  %v394_v38 = vunpack.c.h.bf16 %v392_v28  ;;  %p513_p0 = scmp.ne.s32.totalorder %s339_s4, %s512_s15  ;;  %p518_p2 = scmp.lt.s32.totalorder %s512_s15, %s512_s15 }
  0x1e   :  { %v123_v26 = vpack.c.bf16 %v115_v24, %v114_v23  ;;  %v410_v39 = vunpack.c.h.bf16 %v433_v29  ;;  %v405_v58 = vunpack.c.l.bf16 %v432_v48  ;;  %v421_v59 = vunpack.c.l.bf16 %v436_v49 }
  0x1f   :  { %468 = vmatpush3.bf16.msra.mxu0 %v511_v63  ;;  %500 = vmatpush3.bf16.msra.mxu1 %v511_v63  ;;  %v401_v60 = vunpack.c.l.bf16 %v431_v54  ;;  %v417_v61 = vunpack.c.l.bf16 %v435_v55  ;;  %v406_v62 = vunpack.c.h.bf16 %v432_v48  ;;  %v422_v63 = vunpack.c.h.bf16 %v436_v49  ;;  %p519_p3 = por %p518_p2, %p517_p1 }
  0x20   :  { %v402_v2 = vunpack.c.h.bf16 %v431_v54  ;;  %v418_v3 = vunpack.c.h.bf16 %v435_v55 }
  0x21   :  { %p520_p4 = pnand %p519_p3, %p513_p0 }
  0x22   :  { %470 = vmatmul.mubr.bf16.vlgmr.msra.gmra.mrb[0].mxu0 %v117_v14  ;;  %478 = vmatmul.mubr.bf16.vlgmr.msra.gmra.mrb[0].mxu1 %v121_v15 }
  0x23   :  { %473 = vmatprep.mubr.bf16.mxu0 %v118_v5  ;;  %481 = vmatprep.mubr.bf16.mxu1 %v122_v20 }
  0x2a   :  { %474 = vmatmul.mubr.bf16.gmra.mrb[4].mxu0 %v119_v25  ;;  %482 = vmatmul.mubr.bf16.gmra.mrb[4].mxu1 %v123_v26 }
  0xf5   :  { %v471_v36 = vpop.f32.mrb[0].mxu0  ;;  %v479_v37 = vpop.f32.mrb[0].mxu1 }
  0xf6   :  { %v263_v40 = vadd.f32 %v471_v36, %v397_v30  ;;  %v295_v41 = vadd.f32 %v479_v37, %v413_v31  ;;  %v254_v42 = vpop.f32.mrb[1].mxu0  ;;  %v286_v43 = vpop.f32.mrb[1].mxu1 }
  0xf7   :  { %v255_v44 = vadd.f32 %v393_v32, %v254_v42  ;;  %v287_v45 = vadd.f32 %v409_v33, %v286_v43  ;;  %v472_v46 = vpop.f32.mrb[2].mxu0  ;;  %v480_v47 = vpop.f32.mrb[2].mxu1 }
  0xf8   :  { %319 = vst [vmem:[#allocation2 + $0x10] sm:$0xff] %v263_v40  ;;  %327 = vst [vmem:[#allocation2 + $0x50] sm:$0xff] %v295_v41  ;;  %v266_v50 = vadd.f32 %v472_v46, %v398_v34  ;;  %v298_v51 = vadd.f32 %v480_v47, %v414_v35  ;;  %v257_v52 = vpop.f32.mrb[3].mxu0  ;;  %v289_v53 = vpop.f32.mrb[3].mxu1 }
  0xf9   :  { %317 = vst [vmem:[#allocation2] sm:$0xff] %v255_v44  ;;  %325 = vst [vmem:[#allocation2 + $0x40] sm:$0xff] %v287_v45  ;;  %v258_v56 = vadd.f32 %v394_v38, %v257_v52  ;;  %v290_v57 = vadd.f32 %v410_v39, %v289_v53 }
  0xfa   :  { %320 = vst [vmem:[#allocation2 + $0x18] sm:$0xff] %v266_v50  ;;  %328 = vst [vmem:[#allocation2 + $0x58] sm:$0xff] %v298_v51 }
  0xfb   :  { %318 = vst [vmem:[#allocation2 + $0x8] sm:$0xff] %v258_v56  ;;  %326 = vst [vmem:[#allocation2 + $0x48] sm:$0xff] %v290_v57 }
  0xfd   :  { %v475_v0 = vpop.f32.mrb[4].mxu0  ;;  %v483_v1 = vpop.f32.mrb[4].mxu1 }
  0xfe   :  { %v279_v4 = vadd.f32 %v475_v0, %v405_v58  ;;  %v311_v6 = vadd.f32 %v483_v1, %v421_v59  ;;  %v270_v7 = vpop.f32.mrb[5].mxu0  ;;  %v302_v8 = vpop.f32.mrb[5].mxu1 }
  0xff   :  { %v271_v9 = vadd.f32 %v401_v60, %v270_v7  ;;  %v303_v11 = vadd.f32 %v417_v61, %v302_v8  ;;  %v476_v12 = vpop.f32.mrb[6].mxu0  ;;  %v484_v13 = vpop.f32.mrb[6].mxu1 }
 0x100   :  { %323 = vst [vmem:[#allocation2 + $0x30] sm:$0xff] %v279_v4  ;;  %331 = vst [vmem:[#allocation2 + $0x70] sm:$0xff] %v311_v6  ;;  %v282_v14 = vadd.f32 %v476_v12, %v406_v62  ;;  %v314_v15 = vadd.f32 %v484_v13, %v422_v63  ;;  %v273_v16 = vpop.f32.mrb[7].mxu0  ;;  %v305_v17 = vpop.f32.mrb[7].mxu1 }
 0x101   :  { %321 = vst [vmem:[#allocation2 + $0x20] sm:$0xff] %v271_v9  ;;  %329 = vst [vmem:[#allocation2 + $0x60] sm:$0xff] %v303_v11  ;;  %v274_v18 = vadd.f32 %v402_v2, %v273_v16  ;;  %v306_v19 = vadd.f32 %v418_v3, %v305_v17 }
 0x102   :  { %324 = vst [vmem:[#allocation2 + $0x38] sm:$0xff] %v282_v14  ;;  %332 = vst [vmem:[#allocation2 + $0x78] sm:$0xff] %v314_v15 }
 0x103   :  { %322 = vst [vmem:[#allocation2 + $0x28] sm:$0xff] %v274_v18  ;;  %330 = vst [vmem:[#allocation2 + $0x68] sm:$0xff] %v306_v19 }
 0x104   :  { %523 = shalt.err (!%p520_p4)
}
 0x105   :  { %s524_s18 = scalar_lea.hbm %s700_s5, 2048 }
 0x106   :  { %p525_p5 = scmp.ne.s32.totalorder %s700_s5, %s524_s18  ;;  %p528_p6 = scmp.lt.u32.totalorder %s524_s18, %s700_s5 }
 0x108   :  { %p530_p7 = pnand %p528_p6, %p525_p5 }
 0x10a   :  { %533 = shalt.err (!%p530_p7)
}
 0x10b   :  { %s537_s23 = smov 128   ;;  %s538_s24 = smov 8  }
 0x10c   :  { %344 = dma.vmem_to_hbm [thread:$0]  %s339_s4, 2048, %s700_s5, [#allocation3], %s537_s23, %s537_s23, %s538_s24  }
 0x10d   :  { %534 = dma.done.wait [#allocation3], 2048  }
 0x10e   :  { %535 = vsyncadd [#allocation3], 4294965248 }
 0x10f   :  { %348 = vsyncpa [#allocation3], 1 }

// kernel: residual_block_forward.6
= control target key start
LH: loop header
LB: loop body
LE: loop exit
PB: predicated region body
PF: predicated region fallthrough
CT: control target
= control target key end

     0   :  { %s3481_s13 = smov 0   ;;  %s3483_s14 = smov 0   ;;  %s4007_s0 = inlined_call_operand.vmem [shape: bf16[2,16,16,128], index: 0, kind: input, shape index: {}]   ;;  %s4008_s1 = inlined_call_operand.vmem [shape: f32[1,128], index: 1, kind: input, shape index: {}]   ;;  %s4009_s2 = inlined_call_operand.vmem [shape: f32[1,128], index: 2, kind: input, shape index: {}]   ;;  %s4010_s3 = inlined_call_operand.vmem [shape: bf16[1152,128], index: 3, kind: input, shape index: {}]   ;;  %s4011_s4 = inlined_call_operand.vmem [shape: f32[2,16,16,128], index: 4, kind: input, shape index: {}]   ;;  %s4012_s5 = inlined_call_operand.vmem [shape: f32[1,128], index: 5, kind: input, shape index: {}]   ;;  %s4013_s6 = inlined_call_operand.vmem [shape: f32[1,128], index: 6, kind: input, shape index: {}]   ;;  %s4014_s7 = inlined_call_operand.vmem [shape: bf16[128,128], index: 7, kind: input, shape index: {}]   ;;  %s4015_s8 = inlined_call_operand.vmem [shape: bf16[2,8,8,128], index: 8, kind: output, shape index: {0}]   ;;  %s4016_s9 = inlined_call_operand.vmem [shape: bf16[2,8,8,128], index: 9, kind: output, shape index: {1}]   ;;  %s4017_s10 = inlined_call_operand.vmem [shape: f32[2,1,8,128], index: 10, kind: output, shape index: {2}]  }
   0x1   :  { %s3485_s15 = smov 0  }
   0x2 LB: > { %s33_s16 = sadd.s32 1, %s3419_s14  ;;  %p2791_p0 = scmp.ge.s32.totalorder %s3423_s15, 1  ;;  %s3423_s15 = sphi %s3485_s15, %s21_s15   ;;  %s3419_s14 = sphi %s3483_s14, %s4019_s14   ;;  %s3415_s13 = sphi %s3481_s13, %s4018_s13  }
   0x3   : > { %p35_p1 = scmp.ge.s32.totalorder %s33_s16, 2  ;;  %p345_p2 = scmp.lt.s32.totalorder %s3423_s15, 3 }
   0x5   : > { %s4021_s16 = smov (%p35_p1, %s33_s16), 0  ;;  %p346_p3 = pnand %p2791_p0, %p345_p2 }
   0x6   : > { %v3321_v0 = vld [vmem:[%s4010_s3 + $0x40] sm:$0xff] (!%p346_p3)   ;;  %v3425_v3 = vmov (!%p346_p3), 0.0   ;;  %v3325_v5 = vld [vmem:[%s4010_s3 + $0x48] sm:$0xff] (!%p346_p3)   ;;  %v3329_v9 = vld [vmem:[%s4010_s3 + $0x50] sm:$0xff] (!%p346_p3)   ;;  %p408_p4 = scmp.lt.s32.totalorder (!%p346_p3), %s3415_s13, 1 }
   0x7   : > { %349 = sbr.rel (%p346_p3) target bundleno = 461 (0x1cd), region = 52  ;;  %v3322_v1 = vld [vmem:[%s4010_s3 + $0xc0] sm:$0xff] (!%p346_p3)   ;;  %3064 = vmatprep.subr.bf16.mxu0 (!%p346_p3), %v3321_v0  ;;  %448 = vst [vmem:[#allocation3] sm:$0x1] (!%p346_p3), %v3425_v3  ;;  %v3326_v6 = vld [vmem:[%s4010_s3 + $0xc8] sm:$0xff] (!%p346_p3)   ;;  %v3330_v10 = vld [vmem:[%s4010_s3 + $0xd0] sm:$0xff] (!%p346_p3)  }
   0x8   : > { %v3323_v2 = vld [vmem:[%s4010_s3] sm:$0xff] (!%p346_p3)   ;;  %3104 = vmatprep.subr.bf16.mxu1 (!%p346_p3), %v3322_v1  ;;  %v3327_v7 = vld [vmem:[%s4010_s3 + $0x8] sm:$0xff] (!%p346_p3)   ;;  %v3331_v11 = vld [vmem:[%s4010_s3 + $0x10] sm:$0xff] (!%p346_p3)  }
   0x9   : > { %v3324_v4 = vld [vmem:[%s4010_s3 + $0x80] sm:$0xff] (!%p346_p3)   ;;  %3065 = vmatpush3.bf16.msra.mxu0 (!%p346_p3), %v3323_v2  ;;  %v3328_v8 = vld [vmem:[%s4010_s3 + $0x88] sm:$0xff] (!%p346_p3)   ;;  %v3332_v12 = vld [vmem:[%s4010_s3 + $0x90] sm:$0xff] (!%p346_p3)  }
   0xa   : > { %3105 = vmatpush3.bf16.msra.mxu1 (!%p346_p3), %v3324_v4  ;;  %3066 = vmatprep.subr.bf16.mxu0 (!%p346_p3), %v3325_v5  ;;  %v3333_v13 = vld [vmem:[%s4010_s3 + $0x58] sm:$0xff] (!%p346_p3)   ;;  %v3337_v17 = vld [vmem:[%s4010_s3 + $0x60] sm:$0xff] (!%p346_p3)   ;;  %v3341_v21 = vld [vmem:[%s4010_s3 + $0x68] sm:$0xff] (!%p346_p3)  }
   0xb   : > { %3106 = vmatprep.subr.bf16.mxu1 (!%p346_p3), %v3326_v6  ;;  %v3334_v14 = vld [vmem:[%s4010_s3 + $0xd8] sm:$0xff] (!%p346_p3)   ;;  %v3338_v18 = vld [vmem:[%s4010_s3 + $0xe0] sm:$0xff] (!%p346_p3)   ;;  %v3342_v22 = vld [vmem:[%s4010_s3 + $0xe8] sm:$0xff] (!%p346_p3)  }
   0xc   : > { %v3335_v15 = vld [vmem:[%s4010_s3 + $0x18] sm:$0xff] (!%p346_p3)   ;;  %v3339_v19 = vld [vmem:[%s4010_s3 + $0x20] sm:$0xff] (!%p346_p3)   ;;  %v3343_v23 = vld [vmem:[%s4010_s3 + $0x28] sm:$0xff] (!%p346_p3)  }
   0xd   : > { %3067 = vmatpush3.bf16.msra.mxu0 (!%p346_p3), %v3327_v7  ;;  %v3336_v16 = vld [vmem:[%s4010_s3 + $0x98] sm:$0xff] (!%p346_p3)   ;;  %v3340_v20 = vld [vmem:[%s4010_s3 + $0xa0] sm:$0xff] (!%p346_p3)   ;;  %v3344_v24 = vld [vmem:[%s4010_s3 + $0xa8] sm:$0xff] (!%p346_p3)  }
   0xe   : > { %3107 = vmatpush3.bf16.msra.mxu1 %v3328_v8  ;;  %3068 = vmatprep.subr.bf16.mxu0 %v3329_v9  ;;  %s4023_s13 = smov (!%p408_p4, %s3415_s13), 1  ;;  %v3345_v25 = vld [vmem:[%s4010_s3 + $0x70] sm:$0xff]   ;;  %v3349_v29 = vld [vmem:[%s4010_s3 + $0x78] sm:$0xff]   ;;  %v3611_v33 = vld [vmem:[%s4008_s1] ss:$0 sm:$0xff] }
   0xf   : > { %3108 = vmatprep.subr.bf16.mxu1 %v3330_v10  ;;  %v3346_v26 = vld [vmem:[%s4010_s3 + $0xf0] sm:$0xff]   ;;  %s2931_s23 = sshll.u32 %s4023_s13, 7  ;;  %v3350_v30 = vld [vmem:[%s4010_s3 + $0xf8] sm:$0xff]   ;;  %v3620_v40 = vld [vmem:[%s4009_s2] ss:$0 sm:$0xff]  ;;  %s2932_s29 = sshll.u32 %s4023_s13, 8 }
  0x10   : > { %v3347_v27 = vld [vmem:[%s4010_s3 + $0x30] sm:$0xff]   ;;  %s3600_s12 = scalar_lea.vmem %s4007_s0, %s2931_s23  ;;  %v3351_v31 = vld [vmem:[%s4010_s3 + $0x38] sm:$0xff]   ;;  %v3353_v56 = vld [vmem:[%s4010_s3 + $0x140] sm:$0xff]   ;;  %s3807_s24 = scalar_lea.vmem %s4011_s4, %s2932_s29 }
  0x11   : > { %3069 = vmatpush3.bf16.msra.mxu0 %v3331_v11  ;;  %v3348_v28 = vld [vmem:[%s4010_s3 + $0xb0] sm:$0xff]   ;;  %v3352_v32 = vld [vmem:[%s4010_s3 + $0xb8] sm:$0xff]   ;;  %v2936_v34 = vld [vmem:[%s3600_s12] sm:$0xff]   ;;  %s2800_s19 = sshll.u32 %s4023_s13, 3 }
  0x12   : > { %3109 = vmatpush3.bf16.msra.mxu1 %v3332_v12  ;;  %3070 = vmatprep.subr.bf16.mxu0 %v3333_v13  ;;  %v2937_v35 = vunpack.c.l.bf16 %v2936_v34  ;;  %v2938_v36 = vunpack.c.h.bf16 %v2936_v34  ;;  %v3043_v37 = vld [vmem:[%s3600_s12 + $0x8] sm:$0xff]   ;;  %v3049_v38 = vld [vmem:[%s3600_s12 + $0x38] sm:$0xff]   ;;  %v3050_v39 = vld [vmem:[%s3600_s12 + $0x40] sm:$0xff]  }
  0x13   : > { %3110 = vmatprep.subr.bf16.mxu1 %v3334_v14  ;;  %v2945_v41 = vunpack.c.l.bf16 %v3043_v37  ;;  %v2969_v42 = vunpack.c.l.bf16 %v3049_v38  ;;  %v2970_v43 = vunpack.c.h.bf16 %v3049_v38  ;;  %v2973_v46 = vunpack.c.l.bf16 %v3050_v39  ;;  %v3051_v63 = vld [vmem:[%s3600_s12 + $0x48] sm:$0xff]   ;;  %v3052_v0 = vld [vmem:[%s3600_s12 + $0x50] sm:$0xff]   ;;  %v3053_v1 = vld [vmem:[%s3600_s12 + $0x58] sm:$0xff]  }
  0x14   : > { %v473_v44 = vmul.f32 %v2937_v35, %v3611_v33  ;;  %v474_v45 = vmul.f32 %v2938_v36, %v3611_v33  ;;  %v2974_v47 = vunpack.c.h.bf16 %v3050_v39  ;;  %v2946_v48 = vunpack.c.h.bf16 %v3043_v37  ;;  %v3054_v2 = vld [vmem:[%s3600_s12 + $0x60] sm:$0xff]   ;;  %v3056_v35 = vld [vmem:[%s3600_s12 + $0x70] sm:$0xff]   ;;  %v3057_v36 = vld [vmem:[%s3600_s12 + $0x78] sm:$0xff]  }
  0x15   : > { %3071 = vmatpush3.bf16.msra.mxu0 %v3335_v15  ;;  %v556_v49 = vmul.f32 %v2945_v41, %v3611_v33  ;;  %v838_v50 = vmul.f32 %v2969_v42, %v3611_v33  ;;  %v839_v51 = vmul.f32 %v2970_v43, %v3611_v33  ;;  %v888_v54 = vmul.f32 %v2973_v46, %v3611_v33  ;;  %v3044_v37 = vld [vmem:[%s3600_s12 + $0x10] sm:$0xff]  }
  0x16   : > { %3111 = vmatpush3.bf16.msra.mxu1 %v3336_v16  ;;  %3072 = vmatprep.subr.bf16.mxu0 %v3337_v17  ;;  %v481_v52 = vadd.f32 %v3620_v40, %v473_v44  ;;  %v482_v53 = vadd.f32 %v3620_v40, %v474_v45  ;;  %v889_v55 = vmul.f32 %v2974_v47, %v3611_v33  ;;  %v2977_v8 = vunpack.c.l.bf16 %v3051_v63 }
  0x17   : > { %3112 = vmatprep.subr.bf16.mxu1 %v3338_v18  ;;  %v3635_v57 = vadd.f32 %v3620_v40, %v838_v50  ;;  %v3638_v58 = vadd.f32 %v3620_v40, %v839_v51  ;;  %v3641_v61 = vadd.f32 %v3620_v40, %v888_v54  ;;  %v557_v6 = vmul.f32 %v2946_v48, %v3611_v33 }
  0x18   : > { %v483_v59 = vmax.f32 %v481_v52, 0.0  ;;  %v484_v60 = vmax.f32 %v482_v53, 0.0  ;;  %v3644_v62 = vadd.f32 %v3620_v40, %v889_v55  ;;  %v3652_v7 = vadd.f32 %v3620_v40, %v556_v49 }
  0x19   : > { %3073 = vmatpush3.bf16.msra.mxu0 %v3339_v19  ;;  %v2978_v9 = vunpack.c.h.bf16 %v3051_v63  ;;  %v2981_v10 = vunpack.c.l.bf16 %v3052_v0  ;;  %v2982_v11 = vunpack.c.h.bf16 %v3052_v0  ;;  %v2985_v12 = vunpack.c.l.bf16 %v3053_v1 }
  0x1a   : > { %3113 = vmatpush3.bf16.msra.mxu1 %v3340_v20  ;;  %3074 = vmatprep.subr.bf16.mxu0 %v3341_v21  ;;  %v488_v4 = vmul.f32 0.0, %v483_v59  ;;  %v489_v5 = vmul.f32 0.0, %v484_v60  ;;  %v2986_v13 = vunpack.c.h.bf16 %v3053_v1  ;;  %v2989_v14 = vunpack.c.l.bf16 %v3054_v2 }
  0x1b   : > { %3114 = vmatprep.subr.bf16.mxu1 %v3342_v22  ;;  %v2990_v15 = vunpack.c.h.bf16 %v3054_v2  ;;  %v926_v16 = vmul.f32 %v2977_v8, %v3611_v33  ;;  %v927_v17 = vmul.f32 %v2978_v9, %v3611_v33  ;;  %v976_v18 = vmul.f32 %v2981_v10, %v3611_v33  ;;  %v3045_v9 = vld [vmem:[%s3600_s12 + $0x18] sm:$0xff]  }
  0x1c   : > { %490 = vst [vmem:[#allocation3 + $0x1] sm:$0xff] %v488_v4  ;;  %491 = vst [vmem:[#allocation3 + $0x9] sm:$0xff] %v489_v5  ;;  %v977_v19 = vmul.f32 %v2982_v11, %v3611_v33  ;;  %v1023_v20 = vmul.f32 %v2985_v12, %v3611_v33  ;;  %v1024_v21 = vmul.f32 %v2986_v13, %v3611_v33  ;;  %v560_v39 = vmax.f32 %v3652_v7, 0.0 }
  0x1d   : > { %3075 = vmatpush3.bf16.msra.mxu0 %v3343_v23  ;;  %v1073_v22 = vmul.f32 %v2989_v14, %v3611_v33  ;;  %v1074_v23 = vmul.f32 %v2990_v15, %v3611_v33  ;;  %v559_v38 = vadd.f32 %v3620_v40, %v557_v6  ;;  %v2997_v46 = vunpack.c.l.bf16 %v3056_v35 }
  0x1e   : > { %3115 = vmatpush3.bf16.msra.mxu1 %v3344_v24  ;;  %3076 = vmatprep.subr.bf16.mxu0 %v3345_v25  ;;  %v3359_v24 = vld [vmem:[%s4010_s3 + $0x1c0] sm:$0xff]   ;;  %v3666_v25 = vadd.f32 %v3620_v40, %v926_v16  ;;  %v2998_v47 = vunpack.c.h.bf16 %v3056_v35  ;;  %v3001_v49 = vunpack.c.l.bf16 %v3057_v36  ;;  %v3002_v50 = vunpack.c.h.bf16 %v3057_v36 }
  0x1f   : > { %3116 = vmatprep.subr.bf16.mxu1 %v3346_v26  ;;  %v3669_v26 = vadd.f32 %v3620_v40, %v927_v17  ;;  %v3688_v34 = vadd.f32 %v3620_v40, %v1074_v23  ;;  %v2949_v51 = vunpack.c.l.bf16 %v3044_v37  ;;  %v1161_v54 = vmul.f32 %v2997_v46, %v3611_v33 }
  0x20   : > { %v1162_v55 = vmul.f32 %v2998_v47, %v3611_v33  ;;  %v1208_v63 = vmul.f32 %v3001_v49, %v3611_v33  ;;  %v1209_v0 = vmul.f32 %v3002_v50, %v3611_v33  ;;  %v2953_v15 = vunpack.c.l.bf16 %v3045_v9  ;;  %v3047_v50 = vld [vmem:[%s3600_s12 + $0x28] sm:$0xff]  }
  0x21   : > { %3077 = vmatpush3.bf16.msra.mxu0 %v3347_v27  ;;  %v3672_v27 = vadd.f32 %v3620_v40, %v976_v18  ;;  %v3708_v2 = vadd.f32 %v3620_v40, %v1161_v54  ;;  %v606_v7 = vmul.f32 %v2949_v51, %v3611_v33 }
  0x22   : > { %3117 = vmatpush3.bf16.msra.mxu1 %v3348_v28  ;;  %3078 = vmatprep.subr.bf16.mxu0 %v3349_v29  ;;  %v3675_v28 = vadd.f32 %v3620_v40, %v977_v19  ;;  %v3055_v29 = vld [vmem:[%s3600_s12 + $0x68] sm:$0xff]   ;;  %v3711_v4 = vadd.f32 %v3620_v40, %v1162_v55  ;;  %v3714_v5 = vadd.f32 %v3620_v40, %v1208_v63  ;;  %v2954_v19 = vunpack.c.h.bf16 %v3045_v9 }
  0x23   : > { %3118 = vmatprep.subr.bf16.mxu1 %v3350_v30  ;;  %v3679_v30 = vadd.f32 %v3620_v40, %v1023_v20  ;;  %v492_v41 = vld [vmem:[#allocation3] ss:$2 sm:$0xff]  ;;  %v494_v42 = vld [vmem:[#allocation3 + $0x1] ss:$2 sm:$0xff]  ;;  %v2993_v44 = vunpack.c.l.bf16 %v3055_v29  ;;  %v2994_v45 = vunpack.c.h.bf16 %v3055_v29  ;;  %v3717_v6 = vadd.f32 %v3620_v40, %v1209_v0 }
  0x24   : > { %v496_v43 = vld [vmem:[#allocation3 + $0x2] ss:$2 sm:$0xff]  ;;  %v498_v48 = vpack.c.bf16 %v494_v42, %v494_v42  ;;  %v497_v13 = vpack.c.bf16 %v492_v41, %v492_v41  ;;  %v608_v17 = vadd.f32 %v3620_v40, %v606_v7  ;;  %v653_v20 = vmul.f32 %v2953_v15, %v3611_v33 }
  0x25   : > { %3079 = vmatpush3.bf16.msra.mxu0 %v3351_v31  ;;  %v3682_v31 = vadd.f32 %v3620_v40, %v1024_v21  ;;  %529 = vst [vmem:[#allocation3 + $0x1] sm:$0xff] %v483_v59  ;;  %530 = vst [vmem:[#allocation3 + $0x9] sm:$0xff] %v484_v60  ;;  %v1111_v52 = vmul.f32 %v2993_v44, %v3611_v33  ;;  %v1112_v53 = vmul.f32 %v2994_v45, %v3611_v33  ;;  %v3046_v21 = vld [vmem:[%s3600_s12 + $0x20] sm:$0xff]  }
  0x26   : > { %3119 = vmatpush3.bf16.msra.mxu1 %v3352_v32  ;;  %3144 = vmatprep.subr.bf16.mxu0 %v3353_v56  ;;  %v3685_v32 = vadd.f32 %v3620_v40, %v1073_v22  ;;  %501 = vst [vmem:[#allocation2 + $0x8] sm:$0xf] %v498_v48  ;;  %v561_v56 = vmax.f32 %v559_v38, 0.0  ;;  %v2950_v59 = vunpack.c.h.bf16 %v3044_v37  ;;  %v499_v14 = vpack.c.bf16 %v496_v43, %v496_v43 }
  0x27   : > { %3184 = vmatprep.subr.bf16.mxu1 %v3359_v24  ;;  %v3702_v60 = vadd.f32 %v3620_v40, %v1111_v52  ;;  %v3705_v1 = vadd.f32 %v3620_v40, %v1112_v53  ;;  %500 = vst [vmem:[#allocation2] sm:$0xf] %v497_v13  ;;  %v610_v22 = vmax.f32 %v608_v17, 0.0  ;;  %v654_v24 = vmul.f32 %v2954_v19, %v3611_v33 }
  0x28   : > { %v607_v8 = vmul.f32 %v2950_v59, %v3611_v33  ;;  %502 = vst [vmem:[#allocation2 + $0x10] sm:$0xf] %v499_v14  ;;  %v2957_v29 = vunpack.c.l.bf16 %v3046_v21  ;;  %v655_v38 = vadd.f32 %v3620_v40, %v653_v20  ;;  %v2961_v59 = vunpack.c.l.bf16 %v3047_v50  ;;  %v3355_v14 = vld [vmem:[%s4010_s3 + $0x148] sm:$0xff]   ;;  %v3048_v20 = vld [vmem:[%s3600_s12 + $0x30] sm:$0xff]   ;;  %s3975_s12 = scalar_lea.vmem %s4017_s10, %s2800_s19 }
  0x29   : > { %v656_v46 = vadd.f32 %v3620_v40, %v654_v24  ;;  %v2962_v7 = vunpack.c.h.bf16 %v3047_v50  ;;  %v3356_v24 = vld [vmem:[%s4010_s3 + $0x108] sm:$0xff]   ;;  %2228 = vst [vmem:[%s3975_s12 + $0x2] sm:$0x3f] %v3425_v3 }
  0x2a   : > { %v609_v18 = vadd.f32 %v3620_v40, %v607_v8  ;;  %v703_v51 = vmul.f32 %v2957_v29, %v3611_v33  ;;  %v657_v52 = vmax.f32 %v655_v38, 0.0  ;;  %v741_v19 = vmul.f32 %v2961_v59, %v3611_v33  ;;  %v3357_v29 = vld [vmem:[%s4010_s3 + $0x150] sm:$0xff]   ;;  %v3362_v59 = vld [vmem:[%s4010_s3 + $0x118] sm:$0xff]  }
  0x2b   : > { %v658_v53 = vmax.f32 %v656_v46, 0.0  ;;  %v3358_v46 = vld [vmem:[%s4010_s3 + $0x110] sm:$0xff]  }
  0x2c   : > { %v531_v10 = vld [vmem:[#allocation3] ss:$2 sm:$0xff]  ;;  %v532_v11 = vld [vmem:[#allocation3 + $0x1] ss:$2 sm:$0xff]  ;;  %v611_v23 = vmax.f32 %v609_v18, 0.0  ;;  %v705_v0 = vadd.f32 %v3620_v40, %v703_v51  ;;  %v743_v38 = vadd.f32 %v3620_v40, %v741_v19  ;;  %v3371_v19 = vld [vmem:[%s4010_s3 + $0x1d8] sm:$0xff]  }
  0x2d   : > { %v533_v12 = vld [vmem:[#allocation3 + $0x2] ss:$2 sm:$0xff]  ;;  %v534_v16 = vpack.c.bf16 %v531_v10, %v531_v10  ;;  %v535_v42 = vpack.c.bf16 %v532_v11, %v532_v11 }
  0x2e   : > { %567 = vst [vmem:[#allocation3 + $0x1] sm:$0xff] %v560_v39  ;;  %568 = vst [vmem:[#allocation3 + $0x9] sm:$0xff] %v561_v56  ;;  %v2958_v39 = vunpack.c.h.bf16 %v3046_v21  ;;  %v536_v41 = vpack.c.bf16 %v533_v12, %v533_v12  ;;  %v3354_v12 = vld [vmem:[%s4010_s3 + $0x100] sm:$0xff]   ;;  %v707_v21 = vmax.f32 %v705_v0, 0.0 }
  0x2f   : > { %537 = vst [vmem:[#allocation2 + $0x18] sm:$0xf] %v534_v16  ;;  %538 = vst [vmem:[#allocation2 + $0x20] sm:$0xf] %v535_v42 }
  0x30   : > { %539 = vst [vmem:[#allocation2 + $0x28] sm:$0xf] %v536_v41  ;;  %v704_v54 = vmul.f32 %v2958_v39, %v3611_v33  ;;  %v2965_v39 = vunpack.c.l.bf16 %v3048_v20  ;;  %v2966_v41 = vunpack.c.h.bf16 %v3048_v20 }
  0x32   : > { %v706_v9 = vadd.f32 %v3620_v40, %v704_v54  ;;  %v3363_v54 = vld [vmem:[%s4010_s3 + $0x1c8] sm:$0xff]   ;;  %v792_v0 = vmul.f32 %v2966_v41, %v3611_v33 }
  0x35   : > { %v569_v35 = vld [vmem:[#allocation3] ss:$2 sm:$0xff]  ;;  %v570_v36 = vld [vmem:[#allocation3 + $0x1] ss:$2 sm:$0xff] }
  0x36   : > { %v571_v37 = vld [vmem:[#allocation3 + $0x2] ss:$2 sm:$0xff]  ;;  %v573_v43 = vpack.c.bf16 %v570_v36, %v570_v36  ;;  %v572_v44 = vpack.c.bf16 %v569_v35, %v569_v35 }
  0x37   : > { %617 = vst [vmem:[#allocation3 + $0x1] sm:$0xff] %v610_v22  ;;  %618 = vst [vmem:[#allocation3 + $0x9] sm:$0xff] %v611_v23  ;;  %v574_v45 = vpack.c.bf16 %v571_v37, %v571_v37  ;;  %v708_v22 = vmax.f32 %v706_v9, 0.0  ;;  %v742_v23 = vmul.f32 %v2962_v7, %v3611_v33  ;;  %v3364_v7 = vld [vmem:[%s4010_s3 + $0x188] sm:$0xff]  }
  0x38   : > { %v579_v47 = vrot.slane %v573_v43, 4  ;;  %588 = vst [vmem:[#allocation2 + $0x38] sm:$0xf] %v573_v43  ;;  %v578_v48 = vrot.slane %v572_v44, 4  ;;  %587 = vst [vmem:[#allocation2 + $0x30] sm:$0xf] %v572_v44 }
  0x39   : > { %v580_v49 = vrot.slane %v574_v45, 4  ;;  %589 = vst [vmem:[#allocation2 + $0x40] sm:$0xf] %v574_v45  ;;  %v744_v43 = vadd.f32 %v3620_v40, %v742_v23  ;;  %v3372_v23 = vld [vmem:[%s4010_s3 + $0x198] sm:$0xff]  }
  0x3a   : > { %585 = vst [vmem:[#allocation2 + $0x8] sm:$0xf0] %v579_v47  ;;  %584 = vst [vmem:[#allocation2] sm:$0xf0] %v578_v48  ;;  %v3360_v47 = vld [vmem:[%s4010_s3 + $0x180] sm:$0xff]  }
  0x3b   : > { %586 = vst [vmem:[#allocation2 + $0x10] sm:$0xf0] %v580_v49 }
  0x3e   : > { %v619_v55 = vld [vmem:[#allocation3] ss:$2 sm:$0xff]  ;;  %v620_v56 = vld [vmem:[#allocation3 + $0x1] ss:$2 sm:$0xff] }
  0x3f   : > { %v621_v63 = vld [vmem:[#allocation3 + $0x2] ss:$2 sm:$0xff]  ;;  %v622_v8 = vpack.c.bf16 %v619_v55, %v619_v55  ;;  %v623_v11 = vpack.c.bf16 %v620_v56, %v620_v56  ;;  %v745_v56 = vmax.f32 %v743_v38, 0.0 }
  0x40   : > { %664 = vst [vmem:[#allocation3 + $0x1] sm:$0xff] %v657_v52  ;;  %665 = vst [vmem:[#allocation3 + $0x9] sm:$0xff] %v658_v53  ;;  %v624_v10 = vpack.c.bf16 %v621_v63, %v621_v63  ;;  %v791_v52 = vmul.f32 %v2965_v39, %v3611_v33  ;;  %v3361_v53 = vld [vmem:[%s4010_s3 + $0x158] sm:$0xff]   ;;  %v746_v63 = vmax.f32 %v744_v43, 0.0  ;;  %v3367_v33 = vld [vmem:[%s4010_s3 + $0x1d0] sm:$0xff]  }
  0x41   : > { %v628_v13 = vrot.slane %v622_v8, 4  ;;  %v629_v16 = vrot.slane %v623_v11, 4  ;;  %v1240_v17 = vld [vmem:[#allocation2 + $0x8] sm:$0xff]  ;;  %v1239_v18 = vld [vmem:[#allocation2] sm:$0xff] }
  0x42   : > { %v630_v15 = vrot.slane %v624_v10, 4  ;;  %1883 = vmatprep.mubr.bf16.mxu0 %v1240_v17  ;;  %v1241_v48 = vld [vmem:[#allocation2 + $0x10] sm:$0xff]  ;;  %v3365_v8 = vld [vmem:[%s4010_s3 + $0x160] sm:$0xff]  }
  0x43   : > { %634 = vst [vmem:[#allocation2 + $0x18] sm:$0xf0] %v628_v13  ;;  %635 = vst [vmem:[#allocation2 + $0x20] sm:$0xf0] %v629_v16  ;;  %1884 = vmatmul.mubr.bf16.vlgmr.msra.gmra.mrb[0].mxu0 %v1239_v18  ;;  %v3366_v17 = vld [vmem:[%s4010_s3 + $0x120] sm:$0xff]   ;;  %v3368_v18 = vld [vmem:[%s4010_s3 + $0x190] sm:$0xff]  }
  0x44   : > { %636 = vst [vmem:[#allocation2 + $0x28] sm:$0xf0] %v630_v15  ;;  %3145 = vmatpush3.bf16.msra.mxu0 %v3354_v12  ;;  %v793_v12 = vadd.f32 %v3620_v40, %v791_v52  ;;  %v3376_v43 = vld [vmem:[%s4010_s3 + $0x1a0] sm:$0xff]   ;;  %v3377_v52 = vld [vmem:[%s4010_s3 + $0x178] sm:$0xff]  }
  0x45   : > { %3146 = vmatprep.subr.bf16.mxu0 %v3355_v14  ;;  %v794_v14 = vadd.f32 %v3620_v40, %v792_v0  ;;  %v3369_v40 = vld [vmem:[%s4010_s3 + $0x168] sm:$0xff]   ;;  %v843_v0 = vmax.f32 %v3638_v58, 0.0  ;;  %v3851_v58 = vld [vmem:[%s4010_s3 + $0x200] sm:$0xff]  }
  0x46   : > { %v795_v20 = vmax.f32 %v793_v12, 0.0 }
  0x47   : > { %v666_v35 = vld [vmem:[#allocation3] ss:$2 sm:$0xff]  ;;  %v667_v36 = vld [vmem:[#allocation3 + $0x1] ss:$2 sm:$0xff] }
  0x48   : > { %v668_v37 = vld [vmem:[#allocation3 + $0x2] ss:$2 sm:$0xff]  ;;  %v670_v42 = vpack.c.bf16 %v667_v36, %v667_v36  ;;  %v669_v44 = vpack.c.bf16 %v666_v35, %v666_v35  ;;  %3147 = vmatpush3.bf16.msra.mxu0 %v3356_v24 }
  0x49   : > { %714 = vst [vmem:[#allocation3 + $0x1] sm:$0xff] %v707_v21  ;;  %715 = vst [vmem:[#allocation3 + $0x9] sm:$0xff] %v708_v22  ;;  %v671_v45 = vpack.c.bf16 %v668_v37, %v668_v37  ;;  %3148 = vmatprep.subr.bf16.mxu0 %v3357_v29  ;;  %v796_v21 = vmax.f32 %v794_v14, 0.0  ;;  %v3370_v22 = vld [vmem:[%s4010_s3 + $0x128] sm:$0xff]   ;;  %v3373_v24 = vld [vmem:[%s4010_s3 + $0x170] sm:$0xff]  }
  0x4a   : > { %673 = vst [vmem:[#allocation2 + $0x50] sm:$0xf] %v670_v42  ;;  %672 = vst [vmem:[#allocation2 + $0x48] sm:$0xf] %v669_v44  ;;  %v678_v49 = vrot.slane %v669_v44, 4  ;;  %v679_v50 = vrot.slane %v670_v42, 4 }
  0x4b   : > { %674 = vst [vmem:[#allocation2 + $0x58] sm:$0xf] %v671_v45  ;;  %v1242_v51 = vld [vmem:[#allocation2 + $0x18] sm:$0xff]  ;;  %v680_v55 = vrot.slane %v671_v45, 4  ;;  %v3375_v29 = vld [vmem:[%s4010_s3 + $0x1e0] sm:$0xff]   ;;  %v3374_v42 = vld [vmem:[%s4010_s3 + $0x130] sm:$0xff]  }
  0x4c   : > { %1948 = vmatprep.mubr.bf16.mxu1 %v1242_v51  ;;  %684 = vst [vmem:[#allocation2 + $0x30] sm:$0xf0] %v678_v49  ;;  %685 = vst [vmem:[#allocation2 + $0x38] sm:$0xf0] %v679_v50  ;;  %3149 = vmatpush3.bf16.msra.mxu0 %v3358_v46  ;;  %v3818_v44 = vld [vmem:[%s4012_s5] ss:$0 sm:$0xff] }
  0x4d   : > { %1949 = vmatmul.mubr.bf16.vlgmr.msra.gmra.mrb[0].mxu1 %v1241_v48  ;;  %686 = vst [vmem:[#allocation2 + $0x40] sm:$0xf0] %v680_v55  ;;  %3150 = vmatprep.subr.bf16.mxu0 %v3361_v53  ;;  %v3823_v45 = vld [vmem:[%s4013_s6] ss:$0 sm:$0xff]  ;;  %v2234_v50 = vld [vmem:[%s3807_s24 + $0x8] sm:$0xff] }
  0x4e   : > { %3185 = vmatpush3.bf16.msra.mxu1 %v3360_v47  ;;  %v2233_v49 = vld [vmem:[%s3807_s24] sm:$0xff]  ;;  %v3379_v53 = vld [vmem:[%s4010_s3 + $0x1e8] sm:$0xff]   ;;  %v2242_v55 = vmul.f32 %v3818_v44, %v2234_v50 }
  0x4f   : > { %3186 = vmatprep.subr.bf16.mxu1 %v3363_v54  ;;  %v2907_v51 = vld [vmem:[%s3807_s24 + $0x20] sm:$0xff]  ;;  %v2241_v54 = vmul.f32 %v3818_v44, %v2233_v49 }
  0x50   : > { %v716_v9 = vld [vmem:[#allocation3] ss:$2 sm:$0xff]  ;;  %v717_v10 = vld [vmem:[#allocation3 + $0x1] ss:$2 sm:$0xff]  ;;  %3151 = vmatpush3.bf16.msra.mxu0 %v3362_v59  ;;  %v3378_v59 = vld [vmem:[%s4010_s3 + $0x138] sm:$0xff]  }
  0x51   : > { %v718_v11 = vld [vmem:[#allocation3 + $0x2] ss:$2 sm:$0xff]  ;;  %v719_v13 = vpack.c.bf16 %v716_v9, %v716_v9  ;;  %v720_v16 = vpack.c.bf16 %v717_v10, %v717_v10  ;;  %3152 = vmatprep.subr.bf16.mxu0 %v3365_v8  ;;  %v2250_v8 = vadd.f32 %v3823_v45, %v2242_v55 }
  0x52   : > { %752 = vst [vmem:[#allocation3 + $0x1] sm:$0xff] %v745_v56  ;;  %753 = vst [vmem:[#allocation3 + $0x9] sm:$0xff] %v746_v63  ;;  %v721_v15 = vpack.c.bf16 %v718_v11, %v718_v11  ;;  %3187 = vmatpush3.bf16.msra.mxu1 %v3364_v7  ;;  %v2908_v56 = vld [vmem:[%s3807_s24 + $0x28] sm:$0xff]  ;;  %v842_v63 = vmax.f32 %v3635_v57, 0.0  ;;  %v2249_v7 = vadd.f32 %v3823_v45, %v2241_v54  ;;  %v3382_v9 = vld [vmem:[%s4010_s3 + $0x1f0] sm:$0xff]  }
  0x53   : > { %722 = vst [vmem:[#allocation2 + $0x60] sm:$0xf] %v719_v13  ;;  %723 = vst [vmem:[#allocation2 + $0x68] sm:$0xf] %v720_v16  ;;  %3188 = vmatprep.subr.bf16.mxu1 %v3367_v33  ;;  %v2265_v33 = vmul.f32 %v2907_v51, %v3818_v44  ;;  %v3380_v57 = vld [vmem:[%s4010_s3 + $0x1a8] sm:$0xff]   ;;  %v2266_v10 = vmul.f32 %v2908_v56, %v3818_v44 }
  0x54   : > { %724 = vst [vmem:[#allocation2 + $0x70] sm:$0xf] %v721_v15  ;;  %3153 = vmatpush3.bf16.msra.mxu0 %v3366_v17  ;;  %v2251_v17 = vmax.f32 %v2249_v7, 0.0 }
  0x55   : > { %3154 = vmatprep.subr.bf16.mxu0 %v3369_v40  ;;  %v2267_v40 = vadd.f32 %v3823_v45, %v2265_v33  ;;  %v2911_v33 = vld [vmem:[%s3807_s24 + $0x60] sm:$0xff] }
  0x56   : > { %3189 = vmatpush3.bf16.msra.mxu1 %v3368_v18  ;;  %v2252_v18 = vmax.f32 %v2250_v8, 0.0  ;;  %2253 = vst [vmem:[#allocation5] sm:$0xff] %v2251_v17 }
  0x57   : > { %3190 = vmatprep.subr.bf16.mxu1 %v3371_v19 }
  0x58   : > { %3155 = vmatpush3.bf16.msra.mxu0 %v3370_v22  ;;  %2254 = vst [vmem:[#allocation5 + $0x8] sm:$0xff] %v2252_v18 }
  0x59   : > { %v754_v35 = vld [vmem:[#allocation3] ss:$2 sm:$0xff]  ;;  %v755_v36 = vld [vmem:[#allocation3 + $0x1] ss:$2 sm:$0xff]  ;;  %3156 = vmatprep.subr.bf16.mxu0 %v3373_v24  ;;  %v2268_v24 = vadd.f32 %v3823_v45, %v2266_v10  ;;  %v931_v10 = vmax.f32 %v3669_v26, 0.0 }
  0x5a   : > { %v756_v37 = vld [vmem:[#allocation3 + $0x2] ss:$2 sm:$0xff]  ;;  %v758_v38 = vpack.c.bf16 %v755_v36, %v755_v36  ;;  %v757_v39 = vpack.c.bf16 %v754_v35, %v754_v35  ;;  %3191 = vmatpush3.bf16.msra.mxu1 %v3372_v23 }
  0x5b   : > { %802 = vst [vmem:[#allocation3 + $0x1] sm:$0xff] %v795_v20  ;;  %803 = vst [vmem:[#allocation3 + $0x9] sm:$0xff] %v796_v21  ;;  %v759_v41 = vpack.c.bf16 %v756_v37, %v756_v37  ;;  %3192 = vmatprep.subr.bf16.mxu1 %v3375_v29  ;;  %v3383_v20 = vld [vmem:[%s4010_s3 + $0x1b0] sm:$0xff]   ;;  %v3385_v21 = vld [vmem:[%s4010_s3 + $0x1f8] sm:$0xff]  }
  0x5c   : > { %v764_v46 = vrot.slane %v758_v38, 4  ;;  %773 = vst [vmem:[#allocation2 + $0x80] sm:$0xf] %v758_v38  ;;  %v763_v47 = vrot.slane %v757_v39, 4  ;;  %772 = vst [vmem:[#allocation2 + $0x78] sm:$0xf] %v757_v39  ;;  %3157 = vmatpush3.bf16.msra.mxu0 %v3374_v42 }
  0x5d   : > { %v765_v48 = vrot.slane %v759_v41, 4  ;;  %774 = vst [vmem:[#allocation2 + $0x88] sm:$0xf] %v759_v41  ;;  %3158 = vmatprep.subr.bf16.mxu0 %v3377_v52  ;;  %v2909_v29 = vld [vmem:[%s3807_s24 + $0x40] sm:$0xff]  ;;  %v2910_v37 = vld [vmem:[%s3807_s24 + $0x48] sm:$0xff]  ;;  %v892_v38 = vmax.f32 %v3641_v61, 0.0 }
  0x5e   : > { %770 = vst [vmem:[#allocation2 + $0x50] sm:$0xf0] %v764_v46  ;;  %769 = vst [vmem:[#allocation2 + $0x48] sm:$0xf0] %v763_v47  ;;  %3193 = vmatpush3.bf16.msra.mxu1 %v3376_v43  ;;  %v893_v39 = vmax.f32 %v3644_v62, 0.0  ;;  %v2285_v41 = vmul.f32 %v2909_v29, %v3818_v44  ;;  %v3386_v42 = vld [vmem:[%s4010_s3 + $0x1b8] sm:$0xff]   ;;  %v2286_v62 = vmul.f32 %v2910_v37, %v3818_v44 }
  0x5f   : > { %771 = vst [vmem:[#allocation2 + $0x58] sm:$0xf0] %v765_v48  ;;  %3194 = vmatprep.subr.bf16.mxu1 %v3379_v53  ;;  %v3877_v43 = vld [vmem:[%s4014_s7] sm:$0xff]   ;;  %v2269_v61 = vmax.f32 %v2267_v40, 0.0  ;;  %v2270_v46 = vmax.f32 %v2268_v24, 0.0  ;;  %v980_v24 = vmax.f32 %v3672_v27, 0.0 }
  0x60   : > { %3159 = vmatpush3.bf16.msra.mxu0 %v3378_v59  ;;  %v2287_v53 = vadd.f32 %v3823_v45, %v2285_v41  ;;  %v2288_v59 = vadd.f32 %v3823_v45, %v2286_v62  ;;  %v981_v29 = vmax.f32 %v3675_v28, 0.0 }
  0x61   : > { %3248 = vmatprep.subr.bf16.mxu0 %v3851_v58 }
  0x62   : > { %v804_v11 = vld [vmem:[#allocation3] ss:$2 sm:$0xff]  ;;  %v805_v12 = vld [vmem:[#allocation3 + $0x1] ss:$2 sm:$0xff]  ;;  %3195 = vmatpush3.bf16.msra.mxu1 %v3380_v57 }
  0x63   : > { %v806_v13 = vld [vmem:[#allocation3 + $0x2] ss:$2 sm:$0xff]  ;;  %v807_v14 = vpack.c.bf16 %v804_v11, %v804_v11  ;;  %v808_v16 = vpack.c.bf16 %v805_v12, %v805_v12  ;;  %3196 = vmatprep.subr.bf16.mxu1 %v3382_v9  ;;  %v930_v9 = vmax.f32 %v3666_v25, 0.0  ;;  %v2289_v11 = vmax.f32 %v2287_v53, 0.0 }
  0x64   : > { %849 = vst [vmem:[#allocation3 + $0x1] sm:$0xff] %v842_v63  ;;  %850 = vst [vmem:[#allocation3 + $0x9] sm:$0xff] %v843_v0  ;;  %v809_v15 = vpack.c.bf16 %v806_v13, %v806_v13  ;;  %v2255_v0 = vld [vmem:[#allocation5] ss:$2 sm:$0xff]  ;;  %v2912_v57 = vld [vmem:[%s3807_s24 + $0x68] sm:$0xff]  ;;  %v2290_v12 = vmax.f32 %v2288_v59, 0.0  ;;  %v2302_v13 = vmul.f32 %v2911_v33, %v3818_v44 }
  0x65   : > { %v813_v19 = vrot.slane %v807_v14, 4  ;;  %v814_v23 = vrot.slane %v808_v16, 4  ;;  %v1249_v35 = vld [vmem:[#allocation2 + $0x50] sm:$0xff]  ;;  %v1248_v36 = vld [vmem:[#allocation2 + $0x48] sm:$0xff]  ;;  %v2256_v8 = vpack.c.bf16 %v2255_v0, %v2255_v0  ;;  %2271 = vst [vmem:[#allocation5] sm:$0xff] %v2269_v61  ;;  %2272 = vst [vmem:[#allocation5 + $0x8] sm:$0xff] %v2270_v46  ;;  %v2303_v14 = vmul.f32 %v2912_v57, %v3818_v44 }
  0x66   : > { %v815_v22 = vrot.slane %v809_v15, 4  ;;  %1891 = vmatprep.mubr.bf16.mxu0 %v1249_v35  ;;  %3197 = vmatpush3.bf16.msra.mxu1 %v3383_v20  ;;  %v1250_v54 = vld [vmem:[#allocation2 + $0x58] sm:$0xff] }
  0x67   : > { %819 = vst [vmem:[#allocation2 + $0x60] sm:$0xf0] %v813_v19  ;;  %820 = vst [vmem:[#allocation2 + $0x68] sm:$0xf0] %v814_v23  ;;  %1892 = vmatmul.mubr.bf16.gmra.mrb[4].mxu0 %v1248_v36  ;;  %3198 = vmatprep.subr.bf16.mxu1 %v3385_v21  ;;  %v2304_v19 = vadd.f32 %v3823_v45, %v2302_v13  ;;  %v2305_v20 = vadd.f32 %v3823_v45, %v2303_v14  ;;  %v2913_v21 = vld [vmem:[%s3807_s24 + $0x80] sm:$0xff]  ;;  %v2914_v23 = vld [vmem:[%s3807_s24 + $0x88] sm:$0xff] }
  0x68   : > { %821 = vst [vmem:[#allocation2 + $0x70] sm:$0xf0] %v815_v22  ;;  %2257 = vst [vmem:[#allocation4] sm:$0xf] %v2256_v8  ;;  %v2322_v36 = vmul.f32 %v2913_v21, %v3818_v44 }
  0x69   : > { %v2306_v37 = vmax.f32 %v2304_v19, 0.0  ;;  %v1078_v19 = vmax.f32 %v3688_v34, 0.0 }
  0x6a   : > { %3199 = vmatpush3.bf16.msra.mxu1 %v3386_v42  ;;  %v2324_v28 = vadd.f32 %v3823_v45, %v2322_v36 }
  0x6b   : > { %v851_v47 = vld [vmem:[#allocation3] ss:$2 sm:$0xff]  ;;  %v852_v48 = vld [vmem:[#allocation3 + $0x1] ss:$2 sm:$0xff]  ;;  %3272 = vmatprep.subr.bf16.mxu1 %v3877_v43 }
  0x6c   : > { %v853_v49 = vld [vmem:[#allocation3 + $0x2] ss:$2 sm:$0xff]  ;;  %v855_v50 = vpack.c.bf16 %v852_v48, %v852_v48  ;;  %v854_v51 = vpack.c.bf16 %v851_v47, %v851_v47  ;;  %v2326_v0 = vmax.f32 %v2324_v28, 0.0 }
  0x6d   : > { %899 = vst [vmem:[#allocation3 + $0x1] sm:$0xff] %v892_v38  ;;  %900 = vst [vmem:[#allocation3 + $0x9] sm:$0xff] %v893_v39  ;;  %v856_v52 = vpack.c.bf16 %v853_v49, %v853_v49  ;;  %v2273_v40 = vld [vmem:[#allocation5] ss:$2 sm:$0xff]  ;;  %v2307_v38 = vmax.f32 %v2305_v20, 0.0  ;;  %v2323_v39 = vmul.f32 %v2914_v23, %v3818_v44 }
  0x6e   : > { %858 = vst [vmem:[#allocation2 + $0x98] sm:$0xf] %v855_v50  ;;  %857 = vst [vmem:[#allocation2 + $0x90] sm:$0xf] %v854_v51  ;;  %v864_v56 = vrot.slane %v855_v50, 4  ;;  %v863_v63 = vrot.slane %v854_v51, 4  ;;  %v2274_v22 = vpack.c.bf16 %v2273_v40, %v2273_v40 }
  0x6f   : > { %859 = vst [vmem:[#allocation2 + $0xa0] sm:$0xf] %v856_v52  ;;  %v865_v55 = vrot.slane %v856_v52, 4  ;;  %v1251_v7 = vld [vmem:[#allocation2 + $0x60] sm:$0xff]  ;;  %2291 = vst [vmem:[#allocation5] sm:$0xff] %v2289_v11  ;;  %v2325_v51 = vadd.f32 %v3823_v45, %v2323_v39  ;;  %v1077_v40 = vmax.f32 %v3685_v32, 0.0 }
  0x70   : > { %1956 = vmatprep.mubr.bf16.mxu1 %v1251_v7  ;;  %870 = vst [vmem:[#allocation2 + $0x80] sm:$0xf0] %v864_v56  ;;  %869 = vst [vmem:[#allocation2 + $0x78] sm:$0xf0] %v863_v63  ;;  %v2276_v35 = vrot.slane %v2274_v22, 4  ;;  %v2915_v52 = vld [vmem:[%s3807_s24 + $0xa0] sm:$0xff] }
  0x71   : > { %871 = vst [vmem:[#allocation2 + $0x88] sm:$0xf0] %v865_v55  ;;  %1957 = vmatmul.mubr.bf16.gmra.mrb[4].mxu1 %v1250_v54  ;;  %2292 = vst [vmem:[#allocation5 + $0x8] sm:$0xff] %v2290_v12  ;;  %v2916_v54 = vld [vmem:[%s3807_s24 + $0xa8] sm:$0xff]  ;;  %v1027_v55 = vmax.f32 %v3679_v30, 0.0  ;;  %v1028_v56 = vmax.f32 %v3682_v31, 0.0  ;;  %v2339_v63 = vmul.f32 %v2915_v52, %v3818_v44 }
  0x72   : > { %2278 = vst [vmem:[#allocation4] sm:$0xf0] %v2276_v35  ;;  %v2327_v59 = vmax.f32 %v2325_v51, 0.0  ;;  %v2340_v7 = vmul.f32 %v2916_v54, %v3818_v44 }
  0x74   : > { %v901_v15 = vld [vmem:[#allocation3] ss:$2 sm:$0xff]  ;;  %v902_v16 = vld [vmem:[#allocation3 + $0x1] ss:$2 sm:$0xff] }
  0x75   : > { %v903_v17 = vld [vmem:[#allocation3 + $0x2] ss:$2 sm:$0xff]  ;;  %v904_v25 = vpack.c.bf16 %v901_v15, %v901_v15  ;;  %v905_v18 = vpack.c.bf16 %v902_v16, %v902_v16  ;;  %v2342_v15 = vadd.f32 %v3823_v45, %v2340_v7 }
  0x76   : > { %937 = vst [vmem:[#allocation3 + $0x1] sm:$0xff] %v930_v9  ;;  %938 = vst [vmem:[#allocation3 + $0x9] sm:$0xff] %v931_v10  ;;  %v906_v26 = vpack.c.bf16 %v903_v17, %v903_v17  ;;  %v2341_v10 = vadd.f32 %v3823_v45, %v2339_v63  ;;  %v2917_v16 = vld [vmem:[%s3807_s24 + $0xc0] sm:$0xff] }
  0x77   : > { %907 = vst [vmem:[#allocation2 + $0xa8] sm:$0xf] %v904_v25  ;;  %908 = vst [vmem:[#allocation2 + $0xb0] sm:$0xf] %v905_v18  ;;  %v2918_v18 = vld [vmem:[%s3807_s24 + $0xc8] sm:$0xff]  ;;  %v2359_v21 = vmul.f32 %v2917_v16, %v3818_v44  ;;  %v2344_v23 = vmax.f32 %v2342_v15, 0.0 }
  0x78   : > { %909 = vst [vmem:[#allocation2 + $0xb8] sm:$0xf] %v906_v26  ;;  %v2293_v50 = vld [vmem:[#allocation5] ss:$2 sm:$0xff]  ;;  %v2343_v22 = vmax.f32 %v2341_v10, 0.0 }
  0x79   : > { %v2294_v53 = vpack.c.bf16 %v2293_v50, %v2293_v50  ;;  %2308 = vst [vmem:[#allocation5] sm:$0xff] %v2306_v37  ;;  %2309 = vst [vmem:[#allocation5 + $0x8] sm:$0xff] %v2307_v38  ;;  %v2361_v38 = vadd.f32 %v3823_v45, %v2359_v21  ;;  %v1116_v50 = vmax.f32 %v3705_v1, 0.0 }
  0x7b   : > { %2295 = vst [vmem:[#allocation4 + $0x8] sm:$0xf] %v2294_v53  ;;  %v2363_v51 = vmax.f32 %v2361_v38, 0.0 }
  0x7d   : > { %v939_v41 = vld [vmem:[#allocation3] ss:$2 sm:$0xff]  ;;  %v940_v42 = vld [vmem:[#allocation3 + $0x1] ss:$2 sm:$0xff] }
  0x7e   : > { %v941_v61 = vld [vmem:[#allocation3 + $0x2] ss:$2 sm:$0xff]  ;;  %v943_v46 = vpack.c.bf16 %v940_v42, %v940_v42  ;;  %v942_v62 = vpack.c.bf16 %v939_v41, %v939_v41 }
  0x7f   : > { %987 = vst [vmem:[#allocation3 + $0x1] sm:$0xff] %v980_v24  ;;  %988 = vst [vmem:[#allocation3 + $0x9] sm:$0xff] %v981_v29  ;;  %v944_v27 = vpack.c.bf16 %v941_v61, %v941_v61  ;;  %v2360_v24 = vmul.f32 %v2918_v18, %v3818_v44 }
  0x80   : > { %v949_v47 = vrot.slane %v943_v46, 4  ;;  %958 = vst [vmem:[#allocation2 + $0xc8] sm:$0xf] %v943_v46  ;;  %v948_v48 = vrot.slane %v942_v62, 4  ;;  %957 = vst [vmem:[#allocation2 + $0xc0] sm:$0xf] %v942_v62 }
  0x81   : > { %v950_v49 = vrot.slane %v944_v27, 4  ;;  %959 = vst [vmem:[#allocation2 + $0xd0] sm:$0xf] %v944_v27  ;;  %v2310_v14 = vld [vmem:[#allocation5] ss:$2 sm:$0xff]  ;;  %v2362_v62 = vadd.f32 %v3823_v45, %v2360_v24 }
  0x82   : > { %955 = vst [vmem:[#allocation2 + $0x98] sm:$0xf0] %v949_v47  ;;  %954 = vst [vmem:[#allocation2 + $0x90] sm:$0xf0] %v948_v48  ;;  %v2311_v26 = vpack.c.bf16 %v2310_v14, %v2310_v14  ;;  %v2919_v47 = vld [vmem:[%s3807_s24 + $0xe0] sm:$0xff]  ;;  %v2920_v48 = vld [vmem:[%s3807_s24 + $0xe8] sm:$0xff] }
  0x83   : > { %956 = vst [vmem:[#allocation2 + $0xa0] sm:$0xf0] %v950_v49  ;;  %2328 = vst [vmem:[#allocation5] sm:$0xff] %v2326_v0  ;;  %v1115_v49 = vmax.f32 %v3702_v60, 0.0  ;;  %v2364_v52 = vmax.f32 %v2362_v62, 0.0  ;;  %v2376_v53 = vmul.f32 %v2919_v47, %v3818_v44  ;;  %v2377_v54 = vmul.f32 %v2920_v48, %v3818_v44  ;;  %v1243_v62 = vld [vmem:[#allocation2 + $0x20] sm:$0xff] }
  0x84   : > { %2329 = vst [vmem:[#allocation5 + $0x8] sm:$0xff] %v2327_v59  ;;  %v2313_v20 = vrot.slane %v2311_v26, 4  ;;  %v1165_v44 = vmax.f32 %v3708_v2, 0.0  ;;  %v1213_v26 = vmax.f32 %v3717_v6, 0.0  ;;  %s2933_s24 = sshll.u32 %s4023_s13, 5 }
  0x85   : > { %v2378_v7 = vadd.f32 %v3823_v45, %v2376_v53  ;;  %v1252_v53 = vld [vmem:[#allocation2 + $0x68] sm:$0xff]  ;;  %s3985_s25 = scalar_lea.vmem %s4015_s8, %s2933_s24  ;;  %s436_s28 = scalar_lea.vmem %s4016_s9, %s2933_s24 }
  0x86   : > { %v989_v8 = vld [vmem:[#allocation3] ss:$2 sm:$0xff]  ;;  %v990_v33 = vld [vmem:[#allocation3 + $0x1] ss:$2 sm:$0xff]  ;;  %2315 = vst [vmem:[#allocation4 + $0x8] sm:$0xf0] %v2313_v20 }
  0x87   : > { %v991_v57 = vld [vmem:[#allocation3 + $0x2] ss:$2 sm:$0xff]  ;;  %v992_v9 = vpack.c.bf16 %v989_v8, %v989_v8  ;;  %v993_v31 = vpack.c.bf16 %v990_v33, %v990_v33  ;;  %v2379_v8 = vadd.f32 %v3823_v45, %v2377_v54 }
  0x88   : > { %1034 = vst [vmem:[#allocation3 + $0x1] sm:$0xff] %v1027_v55  ;;  %1035 = vst [vmem:[#allocation3 + $0x9] sm:$0xff] %v1028_v56  ;;  %v994_v30 = vpack.c.bf16 %v991_v57, %v991_v57  ;;  %v1166_v57 = vmax.f32 %v3711_v4, 0.0  ;;  %v1245_v54 = vld [vmem:[#allocation2 + $0x30] sm:$0xff] }
  0x89   : > { %v998_v11 = vrot.slane %v992_v9, 4  ;;  %v999_v13 = vrot.slane %v993_v31, 4  ;;  %v1258_v17 = vld [vmem:[#allocation2 + $0x98] sm:$0xff]  ;;  %v1257_v25 = vld [vmem:[#allocation2 + $0x90] sm:$0xff]  ;;  %v2381_v31 = vmax.f32 %v2379_v8, 0.0 }
  0x8a   : > { %v1000_v12 = vrot.slane %v994_v30, 4  ;;  %1899 = vmatprep.mubr.bf16.mxu0 %v1258_v17  ;;  %v1259_v39 = vld [vmem:[#allocation2 + $0xa0] sm:$0xff]  ;;  %v2380_v30 = vmax.f32 %v2378_v7, 0.0 }
  0x8b   : > { %1004 = vst [vmem:[#allocation2 + $0xa8] sm:$0xf0] %v998_v11  ;;  %1005 = vst [vmem:[#allocation2 + $0xb0] sm:$0xf0] %v999_v13  ;;  %1900 = vmatmul.mubr.bf16.gmra.mrb[8].mxu0 %v1257_v25  ;;  %v2330_v46 = vld [vmem:[#allocation5] ss:$2 sm:$0xff] }
  0x8c   : > { %1006 = vst [vmem:[#allocation2 + $0xb8] sm:$0xf0] %v1000_v12  ;;  %v2331_v28 = vpack.c.bf16 %v2330_v46, %v2330_v46  ;;  %2345 = vst [vmem:[#allocation5] sm:$0xff] %v2343_v22  ;;  %v1212_v25 = vmax.f32 %v3714_v5, 0.0 }
  0x8d   : > { %2346 = vst [vmem:[#allocation5 + $0x8] sm:$0xff] %v2344_v23 }
  0x8e   : > { %2332 = vst [vmem:[#allocation4 + $0x10] sm:$0xf] %v2331_v28 }
  0x8f   : > { %v1036_v29 = vld [vmem:[#allocation3] ss:$2 sm:$0xff]  ;;  %v1037_v35 = vld [vmem:[#allocation3 + $0x1] ss:$2 sm:$0xff] }
  0x90   : > { %v1038_v36 = vld [vmem:[#allocation3 + $0x2] ss:$2 sm:$0xff]  ;;  %v1040_v37 = vpack.c.bf16 %v1037_v35, %v1037_v35  ;;  %v1039_v32 = vpack.c.bf16 %v1036_v29, %v1036_v29 }
  0x91   : > { %1084 = vst [vmem:[#allocation3 + $0x1] sm:$0xff] %v1077_v40  ;;  %1085 = vst [vmem:[#allocation3 + $0x9] sm:$0xff] %v1078_v19  ;;  %v1041_v34 = vpack.c.bf16 %v1038_v36, %v1038_v36 }
  0x92   : > { %1043 = vst [vmem:[#allocation2 + $0xe0] sm:$0xf] %v1040_v37  ;;  %1042 = vst [vmem:[#allocation2 + $0xd8] sm:$0xf] %v1039_v32  ;;  %v1049_v41 = vrot.slane %v1040_v37, 4  ;;  %v1048_v42 = vrot.slane %v1039_v32, 4 }
  0x93   : > { %1044 = vst [vmem:[#allocation2 + $0xe8] sm:$0xf] %v1041_v34  ;;  %v1050_v61 = vrot.slane %v1041_v34, 4  ;;  %v1260_v27 = vld [vmem:[#allocation2 + $0xa8] sm:$0xff] }
  0x94   : > { %1964 = vmatprep.mubr.bf16.mxu1 %v1260_v27  ;;  %1055 = vst [vmem:[#allocation2 + $0xc8] sm:$0xf0] %v1049_v41  ;;  %1054 = vst [vmem:[#allocation2 + $0xc0] sm:$0xf0] %v1048_v42  ;;  %v2347_v59 = vld [vmem:[#allocation5] ss:$2 sm:$0xff] }
  0x95   : > { %1056 = vst [vmem:[#allocation2 + $0xd0] sm:$0xf0] %v1050_v61  ;;  %1965 = vmatmul.mubr.bf16.gmra.mrb[8].mxu1 %v1259_v39  ;;  %v2348_v33 = vpack.c.bf16 %v2347_v59, %v2347_v59  ;;  %2365 = vst [vmem:[#allocation5] sm:$0xff] %v2363_v51  ;;  %v1244_v37 = vld [vmem:[#allocation2 + $0x28] sm:$0xff]  ;;  %v1246_v51 = vld [vmem:[#allocation2 + $0x38] sm:$0xff] }
  0x96   : > { %2366 = vst [vmem:[#allocation5 + $0x8] sm:$0xff] %v2364_v52  ;;  %v3387_v52 = vld [vmem:[%s4010_s3 + $0x210] sm:$0xff]   ;;  %v3391_v59 = vld [vmem:[%s4010_s3 + $0x228] sm:$0xff]  }
  0x97   : > { %v2350_v9 = vrot.slane %v2348_v33, 4  ;;  %v3394_v33 = vld [vmem:[%s4014_s7 + $0x10] sm:$0xff]  }
  0x98   : > { %v1086_v55 = vld [vmem:[#allocation3] ss:$2 sm:$0xff]  ;;  %v1087_v56 = vld [vmem:[#allocation3 + $0x1] ss:$2 sm:$0xff] }
  0x99   : > { %v1088_v63 = vld [vmem:[#allocation3 + $0x2] ss:$2 sm:$0xff]  ;;  %v1089_v60 = vpack.c.bf16 %v1086_v55, %v1086_v55  ;;  %v1090_v1 = vpack.c.bf16 %v1087_v56, %v1087_v56  ;;  %2352 = vst [vmem:[#allocation4 + $0x10] sm:$0xf0] %v2350_v9  ;;  %v3388_v55 = vld [vmem:[%s4010_s3 + $0x218] sm:$0xff]  }
  0x9a   : > { %1122 = vst [vmem:[#allocation3 + $0x1] sm:$0xff] %v1115_v49  ;;  %1123 = vst [vmem:[#allocation3 + $0x9] sm:$0xff] %v1116_v50  ;;  %v1091_v0 = vpack.c.bf16 %v1088_v63, %v1088_v63  ;;  %v3384_v49 = vld [vmem:[%s4010_s3 + $0x208] sm:$0xff]   ;;  %v1253_v50 = vld [vmem:[#allocation2 + $0x70] sm:$0xff] }
  0x9b   : > { %1092 = vst [vmem:[#allocation2 + $0xf0] sm:$0xf] %v1089_v60  ;;  %1093 = vst [vmem:[#allocation2 + $0xf8] sm:$0xf] %v1090_v1  ;;  %v1262_v56 = vld [vmem:[#allocation2 + $0xb8] sm:$0xff]  ;;  %v1255_v63 = vld [vmem:[#allocation2 + $0x80] sm:$0xff] }
  0x9c   : > { %1094 = vst [vmem:[#allocation2 + $0x100] sm:$0xf] %v1091_v0  ;;  %v3389_v60 = vld [vmem:[%s4010_s3 + $0x220] sm:$0xff]   ;;  %v1261_v0 = vld [vmem:[#allocation2 + $0xb0] sm:$0xff]  ;;  %v1254_v1 = vld [vmem:[#allocation2 + $0x78] sm:$0xff] }
  0x9d   : > { %v2367_v2 = vld [vmem:[#allocation5] ss:$2 sm:$0xff]  ;;  %v1264_v8 = vld [vmem:[#allocation2 + $0xc8] sm:$0xff] }
  0x9e   : > { %v2368_v4 = vpack.c.bf16 %v2367_v2, %v2367_v2  ;;  %2382 = vst [vmem:[#allocation5] sm:$0xff] %v2380_v30  ;;  %2383 = vst [vmem:[#allocation5 + $0x8] sm:$0xff] %v2381_v31  ;;  %v1263_v9 = vld [vmem:[#allocation2 + $0xc0] sm:$0xff]  ;;  %v3395_v30 = vld [vmem:[%s4010_s3 + $0x238] sm:$0xff]  }
  0xa0   : > { %2369 = vst [vmem:[#allocation4 + $0x18] sm:$0xf] %v2368_v4  ;;  %v2391_v4 = vld [vmem:[#allocation4 + $0x8] sm:$0xff] }
  0xa1   : > { %v1125_v10 = vld [vmem:[#allocation3 + $0x1] ss:$2 sm:$0xff]  ;;  %v1126_v11 = vld [vmem:[#allocation3 + $0x2] ss:$2 sm:$0xff] }
  0xa2   : > { %v1124_v12 = vld [vmem:[#allocation3] ss:$2 sm:$0xff]  ;;  %v1128_v13 = vpack.c.bf16 %v1125_v10, %v1125_v10  ;;  %v1129_v15 = vpack.c.bf16 %v1126_v11, %v1126_v11 }
  0xa3   : > { %v1127_v14 = vpack.c.bf16 %v1124_v12, %v1124_v12  ;;  %1172 = vst [vmem:[#allocation3 + $0x1] sm:$0xff] %v1165_v44  ;;  %1173 = vst [vmem:[#allocation3 + $0x9] sm:$0xff] %v1166_v57  ;;  %v3393_v44 = vld [vmem:[%s4010_s3 + $0x230] sm:$0xff]   ;;  %v3397_v10 = vld [vmem:[%s4014_s7 + $0x20] sm:$0xff]  }
  0xa4   : > { %v1134_v45 = vrot.slane %v1128_v13, 4  ;;  %1143 = vst [vmem:[#allocation2 + $0x110] sm:$0xf] %v1128_v13  ;;  %v1135_v17 = vrot.slane %v1129_v15, 4  ;;  %1144 = vst [vmem:[#allocation2 + $0x118] sm:$0xf] %v1129_v15 }
  0xa5   : > { %v1133_v16 = vrot.slane %v1127_v14, 4  ;;  %1142 = vst [vmem:[#allocation2 + $0x108] sm:$0xf] %v1127_v14  ;;  %v2384_v35 = vld [vmem:[#allocation5] ss:$2 sm:$0xff]  ;;  %v3398_v12 = vld [vmem:[%s4014_s7 + $0x28] sm:$0xff]  }
  0xa6   : > { %1140 = vst [vmem:[#allocation2 + $0xe0] sm:$0xf0] %v1134_v45  ;;  %1141 = vst [vmem:[#allocation2 + $0xe8] sm:$0xf0] %v1135_v17  ;;  %v2385_v6 = vpack.c.bf16 %v2384_v35, %v2384_v35  ;;  %v1247_v11 = vld [vmem:[#allocation2 + $0x40] sm:$0xff]  ;;  %v1256_v14 = vld [vmem:[#allocation2 + $0x88] sm:$0xff] }
  0xa7   : > { %1139 = vst [vmem:[#allocation2 + $0xd8] sm:$0xf0] %v1133_v16  ;;  %v1265_v15 = vld [vmem:[#allocation2 + $0xd0] sm:$0xff]  ;;  %v2390_v16 = vld [vmem:[#allocation4] sm:$0xff] }
  0xa8   : > { %v2387_v32 = vrot.slane %v2385_v6, 4  ;;  %v3399_v45 = vld [vmem:[%s4014_s7 + $0x30] sm:$0xff]   ;;  %v3400_v17 = vld [vmem:[%s4014_s7 + $0x38] sm:$0xff]  }
  0xaa   : > { %v1174_v18 = vld [vmem:[#allocation3] ss:$2 sm:$0xff]  ;;  %v1175_v19 = vld [vmem:[#allocation3 + $0x1] ss:$2 sm:$0xff]  ;;  %2389 = vst [vmem:[#allocation4 + $0x18] sm:$0xf0] %v2387_v32 }
  0xab   : > { %v1176_v40 = vld [vmem:[#allocation3 + $0x2] ss:$2 sm:$0xff]  ;;  %v1177_v20 = vpack.c.bf16 %v1174_v18, %v1174_v18  ;;  %v1178_v22 = vpack.c.bf16 %v1175_v19, %v1175_v19 }
  0xac   : > { %v1179_v21 = vpack.c.bf16 %v1176_v40, %v1176_v40  ;;  %1219 = vst [vmem:[#allocation3 + $0x1] sm:$0xff] %v1212_v25  ;;  %1220 = vst [vmem:[#allocation3 + $0x9] sm:$0xff] %v1213_v26  ;;  %v2392_v25 = vld [vmem:[#allocation4 + $0x10] sm:$0xff] }
  0xad   : > { %v1183_v23 = vrot.slane %v1177_v20, 4  ;;  %v1184_v29 = vrot.slane %v1178_v22, 4  ;;  %v1267_v36 = vld [vmem:[#allocation2 + $0xe0] sm:$0xff]  ;;  %v1268_v46 = vld [vmem:[#allocation2 + $0xe8] sm:$0xff] }
  0xae   : > { %v1185_v24 = vrot.slane %v1179_v21, 4  ;;  %v1266_v5 = vld [vmem:[#allocation2 + $0xd8] sm:$0xff]  ;;  %1907 = vmatprep.mubr.bf16.mxu0 %v1267_v36 }
  0xaf   : > { %1189 = vst [vmem:[#allocation2 + $0xf0] sm:$0xf0] %v1183_v23  ;;  %1190 = vst [vmem:[#allocation2 + $0xf8] sm:$0xf0] %v1184_v29  ;;  %1908 = vmatmul.mubr.bf16.gmra.mrb[12].mxu0 %v1266_v5 }
  0xb0   : > { %1191 = vst [vmem:[#allocation2 + $0x100] sm:$0xf0] %v1185_v24  ;;  %2013 = vmatprep.mubr.bf16.mxu0 %v1244_v37 }
  0xb1   : > { %v2393_v26 = vld [vmem:[#allocation4 + $0x18] sm:$0xff] }
  0xb3   : > { %v1222_v34 = vld [vmem:[#allocation3 + $0x1] ss:$2 sm:$0xff]  ;;  %v1221_v38 = vld [vmem:[#allocation3] ss:$2 sm:$0xff] }
  0xb4   : > { %v1223_v39 = vld [vmem:[#allocation3 + $0x2] ss:$2 sm:$0xff]  ;;  %v1225_v41 = vpack.c.bf16 %v1222_v34, %v1222_v34  ;;  %v1224_v42 = vpack.c.bf16 %v1221_v38, %v1221_v38 }
  0xb5   : > { %v1226_v61 = vpack.c.bf16 %v1223_v39, %v1223_v39 }
  0xb6   : > { %v1231_v27 = vrot.slane %v1225_v41, 4  ;;  %v1230_v28 = vrot.slane %v1224_v42, 4  ;;  %v1269_v48 = vld [vmem:[#allocation2 + $0xf0] sm:$0xff]  ;;  %v1270_v57 = vld [vmem:[#allocation2 + $0xf8] sm:$0xff] }
  0xb7   : > { %v1232_v47 = vrot.slane %v1226_v61, 4  ;;  %1972 = vmatprep.mubr.bf16.mxu1 %v1269_v48  ;;  %2014 = vmatmul.mubr.bf16.vlgmr.msra.gmra.mrb[16].mxu0 %v1243_v62  ;;  %v1271_v7 = vld [vmem:[#allocation2 + $0x100] sm:$0xff] }
  0xb8   : > { %1237 = vst [vmem:[#allocation2 + $0x110] sm:$0xf0] %v1231_v27  ;;  %1236 = vst [vmem:[#allocation2 + $0x108] sm:$0xf0] %v1230_v28  ;;  %1973 = vmatmul.mubr.bf16.gmra.mrb[12].mxu1 %v1268_v46  ;;  %3249 = vmatpush3.bf16.msra.mxu0 %v3851_v58  ;;  %v3392_v58 = vld [vmem:[%s4014_s7 + $0x8] sm:$0xff]  }
  0xb9   : > { %1238 = vst [vmem:[#allocation2 + $0x118] sm:$0xf0] %v1232_v47  ;;  %2021 = vmatprep.mubr.bf16.mxu0 %v1253_v50  ;;  %3250 = vmatprep.subr.bf16.mxu0 %v3384_v49 }
  0xba   : > { %2078 = vmatprep.mubr.bf16.mxu1 %v1246_v51 }
  0xbc   : > { %3251 = vmatpush3.bf16.msra.mxu0 %v3384_v49 }
  0xbd   : > { %3252 = vmatprep.subr.bf16.mxu0 %v3387_v52 }
  0xbf   : > { %2022 = vmatmul.mubr.bf16.gmra.mrb[20].mxu0 %v1252_v53  ;;  %v1273_v31 = vld [vmem:[#allocation2 + $0x110] sm:$0xff]  ;;  %v1272_v13 = vld [vmem:[#allocation2 + $0x108] sm:$0xff] }
  0xc0   : > { %2079 = vmatmul.mubr.bf16.vlgmr.msra.gmra.mrb[16].mxu1 %v1245_v54  ;;  %3253 = vmatpush3.bf16.msra.mxu0 %v3387_v52  ;;  %v1274_v2 = vld [vmem:[#allocation2 + $0x118] sm:$0xff] }
  0xc1   : > { %2029 = vmatprep.mubr.bf16.mxu0 %v1262_v56  ;;  %3254 = vmatprep.subr.bf16.mxu0 %v3388_v55 }
  0xc2   : > { %2086 = vmatprep.mubr.bf16.mxu1 %v1255_v63  ;;  %3273 = vmatpush3.bf16.msra.mxu1 %v3877_v43  ;;  %v3396_v43 = vld [vmem:[%s4014_s7 + $0x18] sm:$0xff]  }
  0xc3   : > { %3274 = vmatprep.subr.bf16.mxu1 %v3392_v58 }
  0xc4   : > { %3255 = vmatpush3.bf16.msra.mxu0 %v3388_v55 }
  0xc5   : > { %3256 = vmatprep.subr.bf16.mxu0 %v3389_v60 }
  0xc6   : > { %3275 = vmatpush3.bf16.msra.mxu1 %v3392_v58 }
  0xc7   : > { %2030 = vmatmul.mubr.bf16.gmra.mrb[24].mxu0 %v1261_v0  ;;  %3276 = vmatprep.subr.bf16.mxu1 %v3394_v33 }
  0xc8   : > { %2087 = vmatmul.mubr.bf16.gmra.mrb[20].mxu1 %v1254_v1  ;;  %3257 = vmatpush3.bf16.msra.mxu0 %v3389_v60 }
  0xc9   : > { %2037 = vmatprep.mubr.bf16.mxu0 %v1271_v7  ;;  %3258 = vmatprep.subr.bf16.mxu0 %v3391_v59 }
  0xca   : > { %2094 = vmatprep.mubr.bf16.mxu1 %v1264_v8  ;;  %3277 = vmatpush3.bf16.msra.mxu1 %v3394_v33 }
  0xcb   : > { %3278 = vmatprep.subr.bf16.mxu1 %v3396_v43 }
  0xcc   : > { %3259 = vmatpush3.bf16.msra.mxu0 %v3391_v59 }
  0xcd   : > { %3260 = vmatprep.subr.bf16.mxu0 %v3393_v44 }
  0xce   : > { %3279 = vmatpush3.bf16.msra.mxu1 %v3396_v43 }
  0xcf   : > { %2038 = vmatmul.mubr.bf16.gmra.mrb[28].mxu0 %v1270_v57  ;;  %3280 = vmatprep.subr.bf16.mxu1 %v3397_v10 }
  0xd0   : > { %2095 = vmatmul.mubr.bf16.gmra.mrb[24].mxu1 %v1263_v9  ;;  %3261 = vmatpush3.bf16.msra.mxu0 %v3393_v44 }
  0xd1   : > { %3262 = vmatprep.subr.bf16.mxu0 %v3395_v30  ;;  %2102 = vmatprep.mubr.bf16.mxu1 %v1273_v31 }
  0xd2   : > { %3264 = vmatprep.mubr.bf16.mxu0 %v1247_v11  ;;  %3281 = vmatpush3.bf16.msra.mxu1 %v3397_v10 }
  0xd3   : > { %3282 = vmatprep.subr.bf16.mxu1 %v3398_v12 }
  0xd4   : > { %3263 = vmatpush3.bf16.msra.mxu0 %v3395_v30 }
  0xd6   : > { %3283 = vmatpush3.bf16.msra.mxu1 %v3398_v12 }
  0xd7   : > { %3265 = vmatmul.mubr.bf16.vlgmr.msra.gmra.mrb[32].mxu0 %v1256_v14  ;;  %3284 = vmatprep.subr.bf16.mxu1 %v3399_v45 }
  0xd8   : > { %2103 = vmatmul.mubr.bf16.gmra.mrb[28].mxu1 %v1272_v13  ;;  %3268 = vmatprep.mubr.bf16.mxu0 %v1265_v15 }
  0xd9   : > { %3288 = vmatprep.mubr.bf16.mxu1 %v2390_v16 }
  0xda   : > { %3285 = vmatpush3.bf16.msra.mxu1 %v3399_v45 }
  0xdb   : > { %3286 = vmatprep.subr.bf16.mxu1 %v3400_v17 }
  0xde   : > { %3287 = vmatpush3.bf16.msra.mxu1 %v3400_v17 }
  0xdf   : > { %3269 = vmatmul.mubr.bf16.gmra.mrb[36].mxu0 %v1274_v2 }
  0xe1   : > { %3289 = vmatmul.mubr.bf16.vlgmr.msra.gmra.mrb[32].mxu1 %v2391_v4 }
  0xe2   : > { %3292 = vmatprep.mubr.bf16.mxu1 %v2392_v25 }
  0xe9   : > { %3293 = vmatmul.mubr.bf16.gmra.mrb[36].mxu1 %v2393_v26 }
 0x116   : > { %v3080_v18 = vpop.f32.mrb[0].mxu0 }
 0x117   : > { %v3081_v40 = vpop.f32.mrb[1].mxu0 }
 0x118   : > { %v3082_v19 = vadd.f32 %v3081_v40, %v3080_v18  ;;  %v3083_v20 = vpop.f32.mrb[2].mxu0 }
 0x119   : > { %v3084_v21 = vpop.f32.mrb[3].mxu0 }
 0x11a   : > { %v3085_v22 = vadd.f32 %v3084_v21, %v3083_v20 }
 0x120   : > { %v3120_v23 = vpop.f32.mrb[0].mxu1 }
 0x121   : > { %v3121_v24 = vpop.f32.mrb[1].mxu1 }
 0x122   : > { %v3122_v29 = vadd.f32 %v3121_v24, %v3120_v23  ;;  %v3123_v35 = vpop.f32.mrb[2].mxu1 }
 0x123   : > { %v3124_v36 = vpop.f32.mrb[3].mxu1 }
 0x124   : > { %v1951_v5 = vadd.f32 %v3122_v29, %v3082_v19  ;;  %v3125_v37 = vadd.f32 %v3124_v36, %v3123_v35 }
 0x126   : > { %v1954_v6 = vadd.f32 %v3125_v37, %v3085_v22 }
 0x13a   : > { %v3086_v32 = vpop.f32.mrb[4].mxu0 }
 0x13b   : > { %v3087_v34 = vpop.f32.mrb[5].mxu0 }
 0x13c   : > { %v3088_v38 = vadd.f32 %v3087_v34, %v3086_v32  ;;  %v3089_v39 = vpop.f32.mrb[6].mxu0 }
 0x13d   : > { %v3090_v41 = vpop.f32.mrb[7].mxu0 }
 0x13e   : > { %v3091_v42 = vadd.f32 %v3090_v41, %v3089_v39 }
 0x144   : > { %v3126_v61 = vpop.f32.mrb[4].mxu1 }
 0x145   : > { %v3127_v46 = vpop.f32.mrb[5].mxu1 }
 0x146   : > { %v3128_v62 = vadd.f32 %v3127_v46, %v3126_v61  ;;  %v3129_v27 = vpop.f32.mrb[6].mxu1 }
 0x147   : > { %v3130_v28 = vpop.f32.mrb[7].mxu1 }
 0x148   : > { %v1959_v47 = vadd.f32 %v3128_v62, %v3088_v38  ;;  %v3131_v48 = vadd.f32 %v3130_v28, %v3129_v27 }
 0x14a   : > { %v1962_v49 = vadd.f32 %v3131_v48, %v3091_v42 }
 0x15e   : > { %v3092_v50 = vpop.f32.mrb[8].mxu0 }
 0x15f   : > { %v3093_v51 = vpop.f32.mrb[9].mxu0 }
 0x160   : > { %v3094_v52 = vadd.f32 %v3093_v51, %v3092_v50  ;;  %v3095_v53 = vpop.f32.mrb[10].mxu0 }
 0x161   : > { %v3096_v54 = vpop.f32.mrb[11].mxu0 }
 0x162   : > { %v3097_v3 = vadd.f32 %v3096_v54, %v3095_v53 }
 0x168   : > { %v3132_v55 = vpop.f32.mrb[8].mxu1 }
 0x169   : > { %v3133_v56 = vpop.f32.mrb[9].mxu1 }
 0x16a   : > { %v3134_v63 = vadd.f32 %v3133_v56, %v3132_v55  ;;  %v3135_v58 = vpop.f32.mrb[10].mxu1 }
 0x16b   : > { %v3136_v60 = vpop.f32.mrb[11].mxu1 }
 0x16c   : > { %v1967_v0 = vadd.f32 %v3134_v63, %v3094_v52  ;;  %v3137_v1 = vadd.f32 %v3136_v60, %v3135_v58 }
 0x16e   : > { %v1970_v59 = vadd.f32 %v3137_v1, %v3097_v3 }
 0x182   : > { %v3098_v7 = vpop.f32.mrb[12].mxu0 }
 0x183   : > { %v3099_v8 = vpop.f32.mrb[13].mxu0 }
 0x184   : > { %v3100_v33 = vadd.f32 %v3099_v8, %v3098_v7  ;;  %v3101_v43 = vpop.f32.mrb[14].mxu0 }
 0x185   : > { %v3102_v44 = vpop.f32.mrb[15].mxu0 }
 0x186   : > { %v3103_v57 = vadd.f32 %v3102_v44, %v3101_v43 }
 0x18a   : > { %v3160_v30 = vpop.f32.mrb[16].mxu0 }
 0x18b   : > { %v3138_v9 = vpop.f32.mrb[12].mxu1  ;;  %v3161_v10 = vpop.f32.mrb[17].mxu0 }
 0x18c   : > { %v3139_v31 = vpop.f32.mrb[13].mxu1  ;;  %v3162_v12 = vadd.f32 %v3161_v10, %v3160_v30  ;;  %v3163_v14 = vpop.f32.mrb[18].mxu0 }
 0x18d   : > { %v3140_v11 = vadd.f32 %v3139_v31, %v3138_v9  ;;  %v3141_v13 = vpop.f32.mrb[14].mxu1  ;;  %v3164_v45 = vpop.f32.mrb[19].mxu0 }
 0x18e   : > { %v3142_v15 = vpop.f32.mrb[15].mxu1  ;;  %v2016_v17 = vadd.f32 %v3162_v12, %v1951_v5  ;;  %v3165_v4 = vadd.f32 %v3164_v45, %v3163_v14 }
 0x18f   : > { %v1975_v16 = vadd.f32 %v3140_v11, %v3100_v33  ;;  %v3143_v2 = vadd.f32 %v3142_v15, %v3141_v13 }
 0x190   : > { %v2019_v26 = vadd.f32 %v3165_v4, %v1954_v6 }
 0x191   : > { %v1978_v25 = vadd.f32 %v3143_v2, %v3103_v57 }
 0x192   : > { %v3166_v18 = vpop.f32.mrb[20].mxu0 }
 0x193   : > { %v3200_v40 = vpop.f32.mrb[16].mxu1  ;;  %v3167_v19 = vpop.f32.mrb[21].mxu0 }
 0x194   : > { %v3201_v20 = vpop.f32.mrb[17].mxu1  ;;  %v3168_v21 = vadd.f32 %v3167_v19, %v3166_v18  ;;  %v3169_v23 = vpop.f32.mrb[22].mxu0 }
 0x195   : > { %v3202_v22 = vadd.f32 %v3201_v20, %v3200_v40  ;;  %v3203_v24 = vpop.f32.mrb[18].mxu1  ;;  %v3170_v29 = vpop.f32.mrb[23].mxu0 }
 0x196   : > { %v3204_v35 = vpop.f32.mrb[19].mxu1  ;;  %v2024_v36 = vadd.f32 %v3168_v21, %v1959_v47  ;;  %v3171_v37 = vadd.f32 %v3170_v29, %v3169_v23 }
 0x197   : > { %v3205_v32 = vadd.f32 %v3204_v35, %v3203_v24  ;;  %v2081_v34 = vadd.f32 %v3202_v22, %v2016_v17 }
 0x198   : > { %v2027_v38 = vadd.f32 %v3171_v37, %v1962_v49 }
 0x199   : > { %v2084_v5 = vadd.f32 %v3205_v32, %v2019_v26 }
 0x19a   : > { %v3172_v39 = vpop.f32.mrb[24].mxu0 }
 0x19b   : > { %v3206_v41 = vpop.f32.mrb[20].mxu1  ;;  %v3173_v42 = vpop.f32.mrb[25].mxu0 }
 0x19c   : > { %v3207_v6 = vpop.f32.mrb[21].mxu1  ;;  %v3174_v61 = vadd.f32 %v3173_v42, %v3172_v39  ;;  %v3175_v62 = vpop.f32.mrb[26].mxu0 }
 0x19d   : > { %v3208_v46 = vadd.f32 %v3207_v6, %v3206_v41  ;;  %v3209_v27 = vpop.f32.mrb[22].mxu1  ;;  %v3176_v28 = vpop.f32.mrb[27].mxu0 }
 0x19e   : > { %v3210_v48 = vpop.f32.mrb[23].mxu1  ;;  %v2032_v50 = vadd.f32 %v3174_v61, %v1967_v0  ;;  %v3177_v51 = vadd.f32 %v3176_v28, %v3175_v62 }
 0x19f   : > { %v3211_v52 = vadd.f32 %v3210_v48, %v3209_v27  ;;  %v2089_v53 = vadd.f32 %v3208_v46, %v2024_v36 }
 0x1a0   : > { %v2035_v47 = vadd.f32 %v3177_v51, %v1970_v59 }
 0x1a1   : > { %v2092_v54 = vadd.f32 %v3211_v52, %v2027_v38 }
 0x1a2   : > { %v3178_v3 = vpop.f32.mrb[28].mxu0 }
 0x1a3   : > { %v3212_v55 = vpop.f32.mrb[24].mxu1  ;;  %v3179_v49 = vpop.f32.mrb[29].mxu0 }
 0x1a4   : > { %v3213_v56 = vpop.f32.mrb[25].mxu1  ;;  %v3180_v63 = vadd.f32 %v3179_v49, %v3178_v3  ;;  %v3181_v60 = vpop.f32.mrb[30].mxu0 }
 0x1a5   : > { %v3214_v58 = vadd.f32 %v3213_v56, %v3212_v55  ;;  %v3215_v1 = vpop.f32.mrb[26].mxu1  ;;  %v3182_v7 = vpop.f32.mrb[31].mxu0 }
 0x1a6   : > { %v3216_v8 = vpop.f32.mrb[27].mxu1  ;;  %v2040_v33 = vadd.f32 %v3180_v63, %v1975_v16  ;;  %v3183_v43 = vadd.f32 %v3182_v7, %v3181_v60 }
 0x1a7   : > { %v3217_v44 = vadd.f32 %v3216_v8, %v3215_v1  ;;  %v2097_v0 = vadd.f32 %v3214_v58, %v2032_v50 }
 0x1a8   : > { %v2043_v57 = vadd.f32 %v3183_v43, %v1978_v25 }
 0x1a9   : > { %v2100_v9 = vadd.f32 %v3217_v44, %v2035_v47 }
 0x1aa   : > { %v3266_v30 = vpop.f32.mrb[32].mxu0 }
 0x1ab   : > { %v3218_v59 = vpop.f32.mrb[28].mxu1  ;;  %v2154_v31 = vadd.f32 %v3266_v30, %v2089_v53  ;;  %v2145_v11 = vpop.f32.mrb[33].mxu0 }
 0x1ac   : > { %v3219_v10 = vpop.f32.mrb[29].mxu1  ;;  %v2146_v13 = vadd.f32 %v2145_v11, %v2081_v34  ;;  %v3267_v15 = vpop.f32.mrb[34].mxu0 }
 0x1ad   : > { %v3220_v12 = vadd.f32 %v3219_v10, %v3218_v59  ;;  %v3221_v14 = vpop.f32.mrb[30].mxu1  ;;  %v2157_v45 = vadd.f32 %v3267_v15, %v2092_v54  ;;  %v2148_v2 = vpop.f32.mrb[35].mxu0  ;;  %v2208_v22 = vmul.f32 %v2154_v31, %v2154_v31 }
 0x1ae   : > { %v3222_v17 = vpop.f32.mrb[31].mxu1  ;;  %v2149_v4 = vadd.f32 %v2148_v2, %v2084_v5  ;;  %v2206_v26 = vmul.f32 %v2146_v13, %v2146_v13 }
 0x1af   : > { %v3223_v16 = vadd.f32 %v3222_v17, %v3221_v14  ;;  %v2105_v25 = vadd.f32 %v3220_v12, %v2040_v33  ;;  %v3011_v18 = vpack.c.bf16 %v2157_v45, %v2154_v31  ;;  %v2209_v37 = vmul.f32 %v2157_v45, %v2157_v45 }
 0x1b0   : > { %v3006_v40 = vpack.c.bf16 %v2149_v4, %v2146_v13  ;;  %v2192_v19 = vadd.f32 %v2149_v4, %v2146_v13  ;;  %v2207_v20 = vmul.f32 %v2149_v4, %v2149_v4 }
 0x1b1   : > { %v2108_v21 = vadd.f32 %v3223_v16, %v2043_v57  ;;  %3058 = vst [vmem:[%s3985_s25 + $0x8] sm:$0xff] %v3011_v18  }
 0x1b2   : > { %3007 = vst [vmem:[%s3985_s25] sm:$0xff] %v3006_v40   ;;  %v2193_v23 = vadd.f32 %v2192_v19, %v2154_v31  ;;  %v2214_v24 = vadd.f32 %v2207_v20, %v2206_v26  ;;  %v3270_v29 = vpop.f32.mrb[36].mxu0 }
 0x1b3   : > { %v2170_v35 = vadd.f32 %v3270_v29, %v2105_v25  ;;  %v2161_v36 = vpop.f32.mrb[37].mxu0 }
 0x1b4   : > { %v2215_v32 = vadd.f32 %v2214_v24, %v2208_v22  ;;  %v2162_v34 = vadd.f32 %v2161_v36, %v2097_v0  ;;  %v2194_v38 = vadd.f32 %v2193_v23, %v2157_v45  ;;  %v3271_v5 = vpop.f32.mrb[38].mxu0  ;;  %v3290_v62 = vpop.f32.mrb[32].mxu1 }
 0x1b5   : > { %v2173_v39 = vadd.f32 %v3271_v5, %v2108_v21  ;;  %v2164_v41 = vpop.f32.mrb[39].mxu0  ;;  %v2492_v28 = vpop.f32.mrb[33].mxu1  ;;  %v2212_v3 = vmul.f32 %v2170_v35, %v2170_v35 }
 0x1b6   : > { %v2195_v42 = vadd.f32 %v2194_v38, %v2162_v34  ;;  %v2210_v6 = vmul.f32 %v2162_v34, %v2162_v34  ;;  %v2216_v61 = vadd.f32 %v2215_v32, %v2209_v37  ;;  %v2165_v46 = vadd.f32 %v2164_v41, %v2100_v9  ;;  %v3291_v53 = vpop.f32.mrb[34].mxu1 }
 0x1b7   : > { %v3021_v27 = vpack.c.bf16 %v2173_v39, %v2170_v35  ;;  %v3031_v47 = vpack.c.bf16 %v3291_v53, %v3290_v62  ;;  %v2495_v54 = vpop.f32.mrb[35].mxu1  ;;  %v2213_v63 = vmul.f32 %v2173_v39, %v2173_v39 }
 0x1b8   : > { %v2217_v48 = vadd.f32 %v2216_v61, %v2210_v6  ;;  %v3016_v50 = vpack.c.bf16 %v2165_v46, %v2162_v34  ;;  %v2196_v51 = vadd.f32 %v2195_v42, %v2165_v46  ;;  %v2211_v52 = vmul.f32 %v2165_v46, %v2165_v46 }
 0x1b9   : > { %3060 = vst [vmem:[%s3985_s25 + $0x18] sm:$0xff] %v3021_v27   ;;  %v3026_v56 = vpack.c.bf16 %v2495_v54, %v2492_v28  ;;  %3061 = vst [vmem:[%s436_s28 + $0x8] sm:$0xff] %v3031_v47  }
 0x1ba   : > { %3059 = vst [vmem:[%s3985_s25 + $0x10] sm:$0xff] %v3016_v50   ;;  %v2197_v55 = vadd.f32 %v2196_v51, %v2170_v35  ;;  %v2218_v49 = vadd.f32 %v2217_v48, %v2211_v52 }
 0x1bb   : > { %3027 = vst [vmem:[%s436_s28] sm:$0xff] %v3026_v56  }
 0x1bc   : > { %v2198_v58 = vadd.f32 %v2197_v55, %v2173_v39  ;;  %v2219_v60 = vadd.f32 %v2218_v49, %v2212_v3  ;;  %v3294_v8 = vpop.f32.mrb[36].mxu1 }
 0x1bd   : > { %v2508_v33 = vpop.f32.mrb[37].mxu1 }
 0x1be   : > { %v2199_v1 = vrot.slane %v2198_v58, 4  ;;  %v2220_v7 = vadd.f32 %v2219_v60, %v2213_v63  ;;  %v3295_v0 = vpop.f32.mrb[38].mxu1 }
 0x1bf   : > { %v3041_v57 = vpack.c.bf16 %v3295_v0, %v3294_v8  ;;  %v2511_v9 = vpop.f32.mrb[39].mxu1 }
 0x1c0   : > { %v2200_v43 = vadd.f32 %v2199_v1, %v2198_v58  ;;  %v2221_v44 = vrot.slane %v2220_v7, 4  ;;  %v3036_v31 = vpack.c.bf16 %v2511_v9, %v2508_v33 }
 0x1c1   : > { %3063 = vst [vmem:[%s436_s28 + $0x18] sm:$0xff] %v3041_v57  }
 0x1c2   : > { %v2201_v59 = vrot.slane %v2200_v43, 2  ;;  %v2222_v30 = vadd.f32 %v2221_v44, %v2220_v7  ;;  %3062 = vst [vmem:[%s436_s28 + $0x10] sm:$0xff] %v3036_v31  }
 0x1c4   : > { %v2202_v10 = vadd.f32 %v2201_v59, %v2200_v43  ;;  %v2223_v11 = vrot.slane %v2222_v30, 2 }
 0x1c6   : > { %v2203_v12 = vrot.slane %v2202_v10, 1  ;;  %v2224_v13 = vadd.f32 %v2223_v11, %v2222_v30 }
 0x1c8   : > { %v2204_v14 = vadd.f32 %v2203_v12, %v2202_v10  ;;  %v2225_v15 = vrot.slane %v2224_v13, 1 }
 0x1ca   : > { %2205 = vst [vmem:[%s3975_s12] sm:$0x1] %v2204_v14  ;;  %v2226_v45 = vadd.f32 %v2225_v15, %v2224_v13 }
 0x1cc   : > { %2227 = vst [vmem:[%s3975_s12 + $0x1] sm:$0x1] %v2226_v45 }
 0x1cd PF: > { %s21_s15 = sadd.s32 1, %s3423_s15   ;;  %s4018_s13 = smov %s3419_s14 }
 0x1ce   : > { %p18_p5 = scmp.ge.s32.totalorder %s21_s15, 4   ;;  %s4019_s14 = smov %s4021_s16 }
 0x1d0   :  { %20 = sbr.rel (!%p18_p5) target bundleno = 2 (0x2), region = 136 }

</bundles_post_ra>
